<compile_context>
chip_gen: v7x
topology: tpu7x:2x2x1
jax: 0.10.0
libtpu: 0.0.40
codegen_flags: <defaults>
</compile_context>

<pallas_src>
import functools

import jax
import jax.numpy as jnp
from jax.experimental import pallas as pl
from jax.experimental.pallas import tpu as pltpu

NUM_CLASSES = 3
HEAD_WIDTH = 32
STRIDES = (4, 8, 16)          # downsampling factor of the three FPN levels


def _round_up(x, m):
    return -(-x // m) * m


def _choose_tm(m):
    """M-tile: <=128, multiple of 16 (bf16 sublane tile), >=2 grid steps when possible
    so both v7x TensorCores get work (v5e/v6e single-TC: one extra tiny step only)."""
    if m <= 16:
        return m
    return min(128, _round_up(-(-m // 2), 16))


# ----------------------------------------------------------------------------
# Pallas kernel 1: conv-as-matmul.  bf16 operands on the MXU, f32 accumulate,
# fused bias + (optional) SiLU in f32 before the final cast.
# ----------------------------------------------------------------------------
def _mm_bias_act_kernel(x_ref, w_ref, b_ref, o_ref, *, act):
    acc = jnp.dot(x_ref[...], w_ref[...], preferred_element_type=jnp.float32)
    acc = acc + b_ref[...]
    if act:  # SiLU = x * sigmoid(x) on the f32 accumulator (v5e has no bf16 VPU/EUP path)
        acc = acc * (1.0 / (1.0 + jnp.exp(-acc)))
    o_ref[...] = acc.astype(o_ref.dtype)


def matmul_bias_act(patches, w, b, act, out_dtype):
    """patches: [M, K], w: [K, N], b: [1, N] -> [M, N] out_dtype."""
    M, K = patches.shape
    N = w.shape[1]
    tm = _choose_tm(M)
    return pl.pallas_call(
        functools.partial(_mm_bias_act_kernel, act=act),
        out_shape=jax.ShapeDtypeStruct((M, N), out_dtype),
        grid=(pl.cdiv(M, tm),),
        in_specs=[
            pl.BlockSpec((tm, K), lambda i: (i, 0)),
            pl.BlockSpec((K, N), lambda i: (0, 0)),
            pl.BlockSpec((1, N), lambda i: (0, 0)),
        ],
        out_specs=pl.BlockSpec((tm, N), lambda i: (i, 0)),
        compiler_params=pltpu.CompilerParams(dimension_semantics=("parallel",)),
    )(patches.astype(jnp.bfloat16), w.astype(jnp.bfloat16), b.astype(jnp.float32))


# ----------------------------------------------------------------------------
# Pallas kernel 2: fused head prediction + YOLOX decode.
# Input rows are [cls_feat | reg_feat]; the block weight maps them to
# channels [x, y, w, h, obj, cls...].  Epilogue decodes in place:
#   xy = (xy + grid) * stride ; wh = exp(wh) * stride ; obj/cls = sigmoid.
# ----------------------------------------------------------------------------
def _pred_decode_kernel(x_ref, w_ref, b_ref, g_ref, o_ref, *, stride):
    acc = jnp.dot(x_ref[...], w_ref[...], preferred_element_type=jnp.float32)
    acc = acc + b_ref[...]                          # [TM, 5+nc] f32 logits
    xy = (acc[:, 0:2] + g_ref[...]) * stride
    wh = jnp.exp(acc[:, 2:4]) * stride
    oc = 1.0 / (1.0 + jnp.exp(-acc[:, 4:]))         # sigmoid(obj, cls)
    o_ref[:, 0:2] = xy.astype(o_ref.dtype)
    o_ref[:, 2:4] = wh.astype(o_ref.dtype)
    o_ref[:, 4:] = oc.astype(o_ref.dtype)


def pred_decode(feats, w, b, gxy, stride):
    """feats: [M, 2*HEAD_WIDTH], w: [2*HEAD_WIDTH, 5+nc], b: [1, 5+nc], gxy: [M, 2]."""
    M, K = feats.shape
    N = w.shape[1]
    tm = _choose_tm(M)
    return pl.pallas_call(
        functools.partial(_pred_decode_kernel, stride=float(stride)),
        out_shape=jax.ShapeDtypeStruct((M, N), jnp.float32),
        grid=(pl.cdiv(M, tm),),
        in_specs=[
            pl.BlockSpec((tm, K), lambda i: (i, 0)),
            pl.BlockSpec((K, N), lambda i: (0, 0)),
            pl.BlockSpec((1, N), lambda i: (0, 0)),
            pl.BlockSpec((tm, 2), lambda i: (i, 0)),
        ],
        out_specs=pl.BlockSpec((tm, N), lambda i: (i, 0)),
        compiler_params=pltpu.CompilerParams(dimension_semantics=("parallel",)),
    )(feats.astype(jnp.bfloat16), w.astype(jnp.bfloat16),
      b.astype(jnp.float32), gxy.astype(jnp.float32))


# ----------------------------------------------------------------------------
# Conv wrapper (1x1 skips im2col; 3x3 uses host-side patch gather).
# ----------------------------------------------------------------------------
def _im2col(x, kh, kw, stride, pad):
    """x: [B, H, W, C] -> patches [B*Ho*Wo, kh*kw*C]."""
    B, H, W, C = x.shape
    x = jnp.pad(x, ((0, 0), (pad, pad), (pad, pad), (0, 0)))
    Ho = (H + 2 * pad - kh) // stride + 1
    Wo = (W + 2 * pad - kw) // stride + 1
    cols = []
    for i in range(kh):
        for j in range(kw):
            cols.append(x[:, i:i + stride * Ho:stride, j:j + stride * Wo:stride, :])
    patches = jnp.concatenate(cols, axis=-1)  # [B, Ho, Wo, kh*kw*C]
    return patches.reshape(B * Ho * Wo, kh * kw * C), Ho, Wo


def conv2d(x, w, b, *, stride=1, act=True, out_dtype=jnp.bfloat16):
    """x: [B,H,W,Cin]; w: [kh,kw,Cin,Cout]; b: [Cout]; pad=(k-1)//2."""
    kh, kw, cin, cout = w.shape
    B = x.shape[0]
    if cin % 8 != 0:  # stem: pad channels 3 -> 8 so K tiles cleanly (zero weights = no-op)
        cpad = (-cin) % 8
        x = jnp.pad(x, ((0, 0), (0, 0), (0, 0), (0, cpad)))
        w = jnp.pad(w, ((0, 0), (0, 0), (0, cpad), (0, 0)))
        cin += cpad
    if kh == 1 and kw == 1 and stride == 1:
        Ho, Wo = x.shape[1], x.shape[2]
        patches = x.reshape(B * Ho * Wo, cin)
    else:
        pad = (kh - 1) // 2
        patches, Ho, Wo = _im2col(x, kh, kw, stride, pad)
    out = matmul_bias_act(patches, w.reshape(kh * kw * cin, cout),
                          b.reshape(1, cout), act, out_dtype)
    return out.reshape(B, Ho, Wo, cout)


# ----------------------------------------------------------------------------
# Deterministic parameter init (synthetic weights, BN folded to identity).
# ----------------------------------------------------------------------------
def init_params(key):
    def conv_p(k, kh, kw, cin, cout):
        k1, k2 = jax.random.split(k)
        scale = 1.0 / float(kh * kw * cin) ** 0.5
        return {"w": jax.random.normal(k1, (kh, kw, cin, cout), jnp.float32) * scale,
                "b": jax.random.normal(k2, (cout,), jnp.float32) * 0.01}

    keys = iter(jax.random.split(key, 64))
    p = {
        "stem": conv_p(next(keys), 3, 3, 3, 16),
        "dark2": conv_p(next(keys), 3, 3, 16, 32),
        "dark3": conv_p(next(keys), 3, 3, 32, 64),
        "dark4": conv_p(next(keys), 3, 3, 64, 128),
        "lat3": conv_p(next(keys), 1, 1, 32, 32),
        "lat4": conv_p(next(keys), 1, 1, 64, 64),
        "lat5": conv_p(next(keys), 1, 1, 128, 128),
        "head": [],
    }
    for cin in (32, 64, 128):
        p["head"].append({
            "stem": conv_p(next(keys), 1, 1, cin, HEAD_WIDTH),
            "cls_conv": conv_p(next(keys), 3, 3, HEAD_WIDTH, HEAD_WIDTH),
            "reg_conv": conv_p(next(keys), 3, 3, HEAD_WIDTH, HEAD_WIDTH),
            "cls_pred": conv_p(next(keys), 1, 1, HEAD_WIDTH, NUM_CLASSES),
            "reg_pred": conv_p(next(keys), 1, 1, HEAD_WIDTH, 4),
            "obj_pred": conv_p(next(keys), 1, 1, HEAD_WIDTH, 1),
        })
    return p


# ----------------------------------------------------------------------------
# Forward pass:  fpn_outs = backbone(x);  outputs = head(fpn_outs)   (eval path)
# ----------------------------------------------------------------------------
def backbone_fpn(p, x):
    c1 = conv2d(x,  p["stem"]["w"],  p["stem"]["b"],  stride=2)   # /2
    c2 = conv2d(c1, p["dark2"]["w"], p["dark2"]["b"], stride=2)   # /4
    c3 = conv2d(c2, p["dark3"]["w"], p["dark3"]["b"], stride=2)   # /8
    c4 = conv2d(c3, p["dark4"]["w"], p["dark4"]["b"], stride=2)   # /16
    p3 = conv2d(c2, p["lat3"]["w"], p["lat3"]["b"], stride=1)
    p4 = conv2d(c3, p["lat4"]["w"], p["lat4"]["b"], stride=1)
    p5 = conv2d(c4, p["lat5"]["w"], p["lat5"]["b"], stride=1)
    return (p3, p4, p5)


def head_forward(p, fpn_outs):
    B = fpn_outs[0].shape[0]
    C = 5 + NUM_CLASSES
    level_outs = []
    for lvl, (feat, stride) in enumerate(zip(fpn_outs, STRIDES)):
        hp = p["head"][lvl]
        H, W = feat.shape[1], feat.shape[2]
        M = B * H * W

        # fused cls_conv + reg_conv (same input, concat weights along N -> lane-denser output)
        w_cr = jnp.concatenate([hp["cls_conv"]["w"], hp["reg_conv"]["w"]], axis=-1)  # [3,3,32,64]
        b_cr = jnp.concatenate([hp["cls_conv"]["b"], hp["reg_conv"]["b"]], axis=-1)

        # fused block weight for reg/obj/cls 1x1 preds acting on [cls_feat | reg_feat]
        w_pred = jnp.zeros((2 * HEAD_WIDTH, C), jnp.float32)
        w_pred = w_pred.at[:HEAD_WIDTH, 5:].set(
            hp["cls_pred"]["w"].reshape(HEAD_WIDTH, NUM_CLASSES))
        w_pred = w_pred.at[HEAD_WIDTH:, 0:4].set(hp["reg_pred"]["w"].reshape(HEAD_WIDTH, 4))
        w_pred = w_pred.at[HEAD_WIDTH:, 4:5].set(hp["obj_pred"]["w"].reshape(HEAD_WIDTH, 1))
        b_pred = jnp.concatenate(
            [hp["reg_pred"]["b"], hp["obj_pred"]["b"], hp["cls_pred"]["b"]]).reshape(1, C)

        s = conv2d(feat, hp["stem"]["w"], hp["stem"]["b"], stride=1)        # [B,H,W,32]
        cr = conv2d(s, w_cr, b_cr, stride=1)                                # [B,H,W,64] = [cls|reg]
        feats = cr.reshape(M, 2 * HEAD_WIDTH)

        yv, xv = jnp.meshgrid(jnp.arange(H, dtype=jnp.float32),
                              jnp.arange(W, dtype=jnp.float32), indexing="ij")
        gxy = jnp.broadcast_to(jnp.stack([xv, yv], axis=-1)[None],
                               (B, H, W, 2)).reshape(M, 2)

        dec = pred_decode(feats, w_pred, b_pred, gxy, stride)               # [M, 5+nc] decoded
        level_outs.append(dec.reshape(B, H * W, C))
    return jnp.concatenate(level_outs, axis=1)                              # [B, A, 5+nc]


def yolox_forward(params, x_nchw):
    x = jnp.transpose(x_nchw, (0, 2, 3, 1))          # NCHW -> NHWC
    fpn_outs = backbone_fpn(params, x)
    return head_forward(params, fpn_outs)


if __name__ == "__main__":
    key = jax.random.PRNGKey(0)
    pk, xk = jax.random.split(key)
    params = init_params(pk)
    x = jax.random.normal(xk, (2, 3, 32, 32), jnp.float32)   # NCHW, like the PyTorch module

    fwd = jax.jit(yolox_forward)
    out = jax.block_until_ready(fwd(params, x))

    n_anchors = 8 * 8 + 4 * 4 + 2 * 2
    assert out.shape == (2, n_anchors, 5 + NUM_CLASSES), out.shape
    assert bool(jnp.all(jnp.isfinite(out)))
    print("KERNEL_OK")
</pallas_src>

<mosaic_0001>
module attributes {stable_mosaic.version = 11 : i64} {
  func.func @_mm_bias_act_kernel(%arg0: i32, %arg1: memref<128x72xbf16, #tpu.memory_space<vmem>>, %arg2: memref<72x16xbf16, #tpu.memory_space<vmem>>, %arg3: memref<1x16xf32, #tpu.memory_space<vmem>>, %arg4: memref<128x16xbf16, #tpu.memory_space<vmem>>) attributes {dimension_semantics = [#tpu.dimension_semantics<parallel>], iteration_bounds = array<i64: 4>, scalar_prefetch = 0 : i64, scratch_operands = 0 : i64, tpu.core_type = #tpu.core_type<tc>, window_params = [{transform_indices = @transform_0, window_bounds = array<i64: 128, 72>}, {pipeline_mode = #tpu.pipeline_mode<synchronous>, transform_indices = @transform_1, window_bounds = array<i64: 72, 16>}, {pipeline_mode = #tpu.pipeline_mode<synchronous>, transform_indices = @transform_2, window_bounds = array<i64: 1, 16>}, {transform_indices = @transform_3, window_bounds = array<i64: 128, 16>}]} {
    %c0 = arith.constant 0 : index
    %c0_0 = arith.constant 0 : index
    %0 = vector.load %arg1[%c0, %c0_0] : memref<128x72xbf16, #tpu.memory_space<vmem>>, vector<128x72xbf16>
    %c0_1 = arith.constant 0 : index
    %c0_2 = arith.constant 0 : index
    %1 = vector.load %arg2[%c0_1, %c0_2] : memref<72x16xbf16, #tpu.memory_space<vmem>>, vector<72x16xbf16>
    %cst = arith.constant dense<0.000000e+00> : vector<128x16xf32>
    %2 = tpu.matmul %0, %1, %cst {dimension_numbers = #tpu.dot_dimension_numbers<[1], [0], [0], [1], [0, 0, 1, 1], [], []>} : vector<128x72xbf16>, vector<72x16xbf16>, vector<128x16xf32> -> vector<128x16xf32>
    %c0_3 = arith.constant 0 : index
    %c0_4 = arith.constant 0 : index
    %3 = vector.load %arg3[%c0_3, %c0_4] : memref<1x16xf32, #tpu.memory_space<vmem>>, vector<1x16xf32>
    %4 = vector.broadcast %3 : vector<1x16xf32> to vector<128x16xf32>
    %5 = arith.addf %2, %4 : vector<128x16xf32>
    %cst_5 = arith.constant 0.000000e+00 : f32
    %6 = vector.broadcast %cst_5 : f32 to vector<128x16xf32>
    %7 = arith.subf %6, %5 : vector<128x16xf32>
    %8 = math.exp %7 : vector<128x16xf32>
    %cst_6 = arith.constant 1.000000e+00 : f32
    %9 = vector.broadcast %cst_6 : f32 to vector<128x16xf32>
    %10 = arith.addf %9, %8 : vector<128x16xf32>
    %cst_7 = arith.constant 1.000000e+00 : f32
    %11 = vector.broadcast %cst_7 : f32 to vector<128x16xf32>
    %12 = arith.divf %11, %10 : vector<128x16xf32>
    %13 = arith.mulf %5, %12 : vector<128x16xf32>
    %14 = arith.truncf %13 : vector<128x16xf32> to vector<128x16xbf16>
    %c0_8 = arith.constant 0 : index
    %c0_9 = arith.constant 0 : index
    %15 = vector.load %arg4[%c0_8, %c0_9] : memref<128x16xbf16, #tpu.memory_space<vmem>>, vector<128x16xbf16>
    tpu.vector_store %arg4[%c0_8, %c0_9], %14 {strides = array<i32>} : memref<128x16xbf16, #tpu.memory_space<vmem>>, vector<128x16xbf16>,
    return
  }
  func.func @transform_0(%arg0: i32) -> (i32, i32) {
    %c0_i32 = arith.constant 0 : i32
    %c0_i32_0 = arith.constant 0 : i32
    return %arg0, %c0_i32 : i32, i32
  }
  func.func @transform_1(%arg0: i32) -> (i32, i32) {
    %c0_i32 = arith.constant 0 : i32
    %c0_i32_0 = arith.constant 0 : i32
    %c0_i32_1 = arith.constant 0 : i32
    return %c0_i32, %c0_i32_0 : i32, i32
  }
  func.func @transform_2(%arg0: i32) -> (i32, i32) {
    %c0_i32 = arith.constant 0 : i32
    %c0_i32_0 = arith.constant 0 : i32
    %c0_i32_1 = arith.constant 0 : i32
    return %c0_i32, %c0_i32_0 : i32, i32
  }
  func.func @transform_3(%arg0: i32) -> (i32, i32) {
    %c0_i32 = arith.constant 0 : i32
    %c0_i32_0 = arith.constant 0 : i32
    return %arg0, %c0_i32 : i32, i32
  }
}

module attributes {stable_mosaic.version = 11 : i64} {
  func.func @_mm_bias_act_kernel(%arg0: i32, %arg1: memref<64x32xbf16, #tpu.memory_space<vmem>>, %arg2: memref<32x32xbf16, #tpu.memory_space<vmem>>, %arg3: memref<1x32xf32, #tpu.memory_space<vmem>>, %arg4: memref<64x32xbf16, #tpu.memory_space<vmem>>) attributes {dimension_semantics = [#tpu.dimension_semantics<parallel>], iteration_bounds = array<i64: 2>, scalar_prefetch = 0 : i64, scratch_operands = 0 : i64, tpu.core_type = #tpu.core_type<tc>, window_params = [{transform_indices = @transform_0, window_bounds = array<i64: 64, 32>}, {pipeline_mode = #tpu.pipeline_mode<synchronous>, transform_indices = @transform_1, window_bounds = array<i64: 32, 32>}, {pipeline_mode = #tpu.pipeline_mode<synchronous>, transform_indices = @transform_2, window_bounds = array<i64: 1, 32>}, {transform_indices = @transform_3, window_bounds = array<i64: 64, 32>}]} {
    %c0 = arith.constant 0 : index
    %c0_0 = arith.constant 0 : index
    %0 = vector.load %arg1[%c0, %c0_0] : memref<64x32xbf16, #tpu.memory_space<vmem>>, vector<64x32xbf16>
    %c0_1 = arith.constant 0 : index
    %c0_2 = arith.constant 0 : index
    %1 = vector.load %arg2[%c0_1, %c0_2] : memref<32x32xbf16, #tpu.memory_space<vmem>>, vector<32x32xbf16>
    %cst = arith.constant dense<0.000000e+00> : vector<64x32xf32>
    %2 = tpu.matmul %0, %1, %cst {dimension_numbers = #tpu.dot_dimension_numbers<[1], [0], [0], [1], [0, 0, 1, 1], [], []>} : vector<64x32xbf16>, vector<32x32xbf16>, vector<64x32xf32> -> vector<64x32xf32>
    %c0_3 = arith.constant 0 : index
    %c0_4 = arith.constant 0 : index
    %3 = vector.load %arg3[%c0_3, %c0_4] : memref<1x32xf32, #tpu.memory_space<vmem>>, vector<1x32xf32>
    %4 = vector.broadcast %3 : vector<1x32xf32> to vector<64x32xf32>
    %5 = arith.addf %2, %4 : vector<64x32xf32>
    %cst_5 = arith.constant 0.000000e+00 : f32
    %6 = vector.broadcast %cst_5 : f32 to vector<64x32xf32>
    %7 = arith.subf %6, %5 : vector<64x32xf32>
    %8 = math.exp %7 : vector<64x32xf32>
    %cst_6 = arith.constant 1.000000e+00 : f32
    %9 = vector.broadcast %cst_6 : f32 to vector<64x32xf32>
    %10 = arith.addf %9, %8 : vector<64x32xf32>
    %cst_7 = arith.constant 1.000000e+00 : f32
    %11 = vector.broadcast %cst_7 : f32 to vector<64x32xf32>
    %12 = arith.divf %11, %10 : vector<64x32xf32>
    %13 = arith.mulf %5, %12 : vector<64x32xf32>
    %14 = arith.truncf %13 : vector<64x32xf32> to vector<64x32xbf16>
    %c0_8 = arith.constant 0 : index
    %c0_9 = arith.constant 0 : index
    %15 = vector.load %arg4[%c0_8, %c0_9] : memref<64x32xbf16, #tpu.memory_space<vmem>>, vector<64x32xbf16>
    tpu.vector_store %arg4[%c0_8, %c0_9], %14 {strides = array<i32>} : memref<64x32xbf16, #tpu.memory_space<vmem>>, vector<64x32xbf16>,
    return
  }
  func.func @transform_0(%arg0: i32) -> (i32, i32) {
    %c0_i32 = arith.constant 0 : i32
    %c0_i32_0 = arith.constant 0 : i32
    return %arg0, %c0_i32 : i32, i32
  }
  func.func @transform_1(%arg0: i32) -> (i32, i32) {
    %c0_i32 = arith.constant 0 : i32
    %c0_i32_0 = arith.constant 0 : i32
    %c0_i32_1 = arith.constant 0 : i32
    return %c0_i32, %c0_i32_0 : i32, i32
  }
  func.func @transform_2(%arg0: i32) -> (i32, i32) {
    %c0_i32 = arith.constant 0 : i32
    %c0_i32_0 = arith.constant 0 : i32
    %c0_i32_1 = arith.constant 0 : i32
    return %c0_i32, %c0_i32_0 : i32, i32
  }
  func.func @transform_3(%arg0: i32) -> (i32, i32) {
    %c0_i32 = arith.constant 0 : i32
    %c0_i32_0 = arith.constant 0 : i32
    return %arg0, %c0_i32 : i32, i32
  }
}

module attributes {stable_mosaic.version = 11 : i64} {
  func.func @_mm_bias_act_kernel(%arg0: i32, %arg1: memref<64x144xbf16, #tpu.memory_space<vmem>>, %arg2: memref<144x32xbf16, #tpu.memory_space<vmem>>, %arg3: memref<1x32xf32, #tpu.memory_space<vmem>>, %arg4: memref<64x32xbf16, #tpu.memory_space<vmem>>) attributes {dimension_semantics = [#tpu.dimension_semantics<parallel>], iteration_bounds = array<i64: 2>, scalar_prefetch = 0 : i64, scratch_operands = 0 : i64, tpu.core_type = #tpu.core_type<tc>, window_params = [{transform_indices = @transform_0, window_bounds = array<i64: 64, 144>}, {pipeline_mode = #tpu.pipeline_mode<synchronous>, transform_indices = @transform_1, window_bounds = array<i64: 144, 32>}, {pipeline_mode = #tpu.pipeline_mode<synchronous>, transform_indices = @transform_2, window_bounds = array<i64: 1, 32>}, {transform_indices = @transform_3, window_bounds = array<i64: 64, 32>}]} {
    %c0 = arith.constant 0 : index
    %c0_0 = arith.constant 0 : index
    %0 = vector.load %arg1[%c0, %c0_0] : memref<64x144xbf16, #tpu.memory_space<vmem>>, vector<64x144xbf16>
    %c0_1 = arith.constant 0 : index
    %c0_2 = arith.constant 0 : index
    %1 = vector.load %arg2[%c0_1, %c0_2] : memref<144x32xbf16, #tpu.memory_space<vmem>>, vector<144x32xbf16>
    %cst = arith.constant dense<0.000000e+00> : vector<64x32xf32>
    %2 = tpu.matmul %0, %1, %cst {dimension_numbers = #tpu.dot_dimension_numbers<[1], [0], [0], [1], [0, 0, 1, 1], [], []>} : vector<64x144xbf16>, vector<144x32xbf16>, vector<64x32xf32> -> vector<64x32xf32>
    %c0_3 = arith.constant 0 : index
    %c0_4 = arith.constant 0 : index
    %3 = vector.load %arg3[%c0_3, %c0_4] : memref<1x32xf32, #tpu.memory_space<vmem>>, vector<1x32xf32>
    %4 = vector.broadcast %3 : vector<1x32xf32> to vector<64x32xf32>
    %5 = arith.addf %2, %4 : vector<64x32xf32>
    %cst_5 = arith.constant 0.000000e+00 : f32
    %6 = vector.broadcast %cst_5 : f32 to vector<64x32xf32>
    %7 = arith.subf %6, %5 : vector<64x32xf32>
    %8 = math.exp %7 : vector<64x32xf32>
    %cst_6 = arith.constant 1.000000e+00 : f32
    %9 = vector.broadcast %cst_6 : f32 to vector<64x32xf32>
    %10 = arith.addf %9, %8 : vector<64x32xf32>
    %cst_7 = arith.constant 1.000000e+00 : f32
    %11 = vector.broadcast %cst_7 : f32 to vector<64x32xf32>
    %12 = arith.divf %11, %10 : vector<64x32xf32>
    %13 = arith.mulf %5, %12 : vector<64x32xf32>
    %14 = arith.truncf %13 : vector<64x32xf32> to vector<64x32xbf16>
    %c0_8 = arith.constant 0 : index
    %c0_9 = arith.constant 0 : index
    %15 = vector.load %arg4[%c0_8, %c0_9] : memref<64x32xbf16, #tpu.memory_space<vmem>>, vector<64x32xbf16>
    tpu.vector_store %arg4[%c0_8, %c0_9], %14 {strides = array<i32>} : memref<64x32xbf16, #tpu.memory_space<vmem>>, vector<64x32xbf16>,
    return
  }
  func.func @transform_0(%arg0: i32) -> (i32, i32) {
    %c0_i32 = arith.constant 0 : i32
    %c0_i32_0 = arith.constant 0 : i32
    return %arg0, %c0_i32 : i32, i32
  }
  func.func @transform_1(%arg0: i32) -> (i32, i32) {
    %c0_i32 = arith.constant 0 : i32
    %c0_i32_0 = arith.constant 0 : i32
    %c0_i32_1 = arith.constant 0 : i32
    return %c0_i32, %c0_i32_0 : i32, i32
  }
  func.func @transform_2(%arg0: i32) -> (i32, i32) {
    %c0_i32 = arith.constant 0 : i32
    %c0_i32_0 = arith.constant 0 : i32
    %c0_i32_1 = arith.constant 0 : i32
    return %c0_i32, %c0_i32_0 : i32, i32
  }
  func.func @transform_3(%arg0: i32) -> (i32, i32) {
    %c0_i32 = arith.constant 0 : i32
    %c0_i32_0 = arith.constant 0 : i32
    return %arg0, %c0_i32 : i32, i32
  }
}

module attributes {stable_mosaic.version = 11 : i64} {
  func.func @_mm_bias_act_kernel(%arg0: i32, %arg1: memref<64x288xbf16, #tpu.memory_space<vmem>>, %arg2: memref<288x64xbf16, #tpu.memory_space<vmem>>, %arg3: memref<1x64xf32, #tpu.memory_space<vmem>>, %arg4: memref<64x64xbf16, #tpu.memory_space<vmem>>) attributes {dimension_semantics = [#tpu.dimension_semantics<parallel>], iteration_bounds = array<i64: 2>, scalar_prefetch = 0 : i64, scratch_operands = 0 : i64, tpu.core_type = #tpu.core_type<tc>, window_params = [{transform_indices = @transform_0, window_bounds = array<i64: 64, 288>}, {pipeline_mode = #tpu.pipeline_mode<synchronous>, transform_indices = @transform_1, window_bounds = array<i64: 288, 64>}, {pipeline_mode = #tpu.pipeline_mode<synchronous>, transform_indices = @transform_2, window_bounds = array<i64: 1, 64>}, {transform_indices = @transform_3, window_bounds = array<i64: 64, 64>}]} {
    %c0 = arith.constant 0 : index
    %c0_0 = arith.constant 0 : index
    %0 = vector.load %arg1[%c0, %c0_0] : memref<64x288xbf16, #tpu.memory_space<vmem>>, vector<64x288xbf16>
    %c0_1 = arith.constant 0 : index
    %c0_2 = arith.constant 0 : index
    %1 = vector.load %arg2[%c0_1, %c0_2] : memref<288x64xbf16, #tpu.memory_space<vmem>>, vector<288x64xbf16>
    %cst = arith.constant dense<0.000000e+00> : vector<64x64xf32>
    %2 = tpu.matmul %0, %1, %cst {dimension_numbers = #tpu.dot_dimension_numbers<[1], [0], [0], [1], [0, 0, 1, 1], [], []>} : vector<64x288xbf16>, vector<288x64xbf16>, vector<64x64xf32> -> vector<64x64xf32>
    %c0_3 = arith.constant 0 : index
    %c0_4 = arith.constant 0 : index
    %3 = vector.load %arg3[%c0_3, %c0_4] : memref<1x64xf32, #tpu.memory_space<vmem>>, vector<1x64xf32>
    %4 = vector.broadcast %3 : vector<1x64xf32> to vector<64x64xf32>
    %5 = arith.addf %2, %4 : vector<64x64xf32>
    %cst_5 = arith.constant 0.000000e+00 : f32
    %6 = vector.broadcast %cst_5 : f32 to vector<64x64xf32>
    %7 = arith.subf %6, %5 : vector<64x64xf32>
    %8 = math.exp %7 : vector<64x64xf32>
    %cst_6 = arith.constant 1.000000e+00 : f32
    %9 = vector.broadcast %cst_6 : f32 to vector<64x64xf32>
    %10 = arith.addf %9, %8 : vector<64x64xf32>
    %cst_7 = arith.constant 1.000000e+00 : f32
    %11 = vector.broadcast %cst_7 : f32 to vector<64x64xf32>
    %12 = arith.divf %11, %10 : vector<64x64xf32>
    %13 = arith.mulf %5, %12 : vector<64x64xf32>
    %14 = arith.truncf %13 : vector<64x64xf32> to vector<64x64xbf16>
    %c0_8 = arith.constant 0 : index
    %c0_9 = arith.constant 0 : index
    %15 = vector.load %arg4[%c0_8, %c0_9] : memref<64x64xbf16, #tpu.memory_space<vmem>>, vector<64x64xbf16>
    tpu.vector_store %arg4[%c0_8, %c0_9], %14 {strides = array<i32>} : memref<64x64xbf16, #tpu.memory_space<vmem>>, vector<64x64xbf16>,
    return
  }
  func.func @transform_0(%arg0: i32) -> (i32, i32) {
    %c0_i32 = arith.constant 0 : i32
    %c0_i32_0 = arith.constant 0 : i32
    return %arg0, %c0_i32 : i32, i32
  }
  func.func @transform_1(%arg0: i32) -> (i32, i32) {
    %c0_i32 = arith.constant 0 : i32
    %c0_i32_0 = arith.constant 0 : i32
    %c0_i32_1 = arith.constant 0 : i32
    return %c0_i32, %c0_i32_0 : i32, i32
  }
  func.func @transform_2(%arg0: i32) -> (i32, i32) {
    %c0_i32 = arith.constant 0 : i32
    %c0_i32_0 = arith.constant 0 : i32
    %c0_i32_1 = arith.constant 0 : i32
    return %c0_i32, %c0_i32_0 : i32, i32
  }
  func.func @transform_3(%arg0: i32) -> (i32, i32) {
    %c0_i32 = arith.constant 0 : i32
    %c0_i32_0 = arith.constant 0 : i32
    return %arg0, %c0_i32 : i32, i32
  }
}

module attributes {stable_mosaic.version = 11 : i64} {
  func.func @_pred_decode_kernel(%arg0: i32, %arg1: memref<64x64xbf16, #tpu.memory_space<vmem>>, %arg2: memref<64x8xbf16, #tpu.memory_space<vmem>>, %arg3: memref<1x8xf32, #tpu.memory_space<vmem>>, %arg4: memref<64x2xf32, #tpu.memory_space<vmem>>, %arg5: memref<64x8xf32, #tpu.memory_space<vmem>>) attributes {dimension_semantics = [#tpu.dimension_semantics<parallel>], iteration_bounds = array<i64: 2>, scalar_prefetch = 0 : i64, scratch_operands = 0 : i64, tpu.core_type = #tpu.core_type<tc>, window_params = [{transform_indices = @transform_0, window_bounds = array<i64: 64, 64>}, {pipeline_mode = #tpu.pipeline_mode<synchronous>, transform_indices = @transform_1, window_bounds = array<i64: 64, 8>}, {pipeline_mode = #tpu.pipeline_mode<synchronous>, transform_indices = @transform_2, window_bounds = array<i64: 1, 8>}, {transform_indices = @transform_3, window_bounds = array<i64: 64, 2>}, {transform_indices = @transform_4, window_bounds = array<i64: 64, 8>}]} {
    %c0 = arith.constant 0 : index
    %c0_0 = arith.constant 0 : index
    %0 = vector.load %arg1[%c0, %c0_0] : memref<64x64xbf16, #tpu.memory_space<vmem>>, vector<64x64xbf16>
    %c0_1 = arith.constant 0 : index
    %c0_2 = arith.constant 0 : index
    %1 = vector.load %arg2[%c0_1, %c0_2] : memref<64x8xbf16, #tpu.memory_space<vmem>>, vector<64x8xbf16>
    %cst = arith.constant dense<0.000000e+00> : vector<64x8xf32>
    %2 = tpu.matmul %0, %1, %cst {dimension_numbers = #tpu.dot_dimension_numbers<[1], [0], [0], [1], [0, 0, 1, 1], [], []>} : vector<64x64xbf16>, vector<64x8xbf16>, vector<64x8xf32> -> vector<64x8xf32>
    %c0_3 = arith.constant 0 : index
    %c0_4 = arith.constant 0 : index
    %3 = vector.load %arg3[%c0_3, %c0_4] : memref<1x8xf32, #tpu.memory_space<vmem>>, vector<1x8xf32>
    %4 = vector.broadcast %3 : vector<1x8xf32> to vector<64x8xf32>
    %5 = arith.addf %2, %4 : vector<64x8xf32>
    %6 = vector.extract_strided_slice %5 {offsets = [0, 0], sizes = [64, 2], strides = [1, 1]} : vector<64x8xf32> to vector<64x2xf32>
    %c0_5 = arith.constant 0 : index
    %c0_6 = arith.constant 0 : index
    %7 = vector.load %arg4[%c0_5, %c0_6] : memref<64x2xf32, #tpu.memory_space<vmem>>, vector<64x2xf32>
    %8 = arith.addf %6, %7 : vector<64x2xf32>
    %cst_7 = arith.constant 4.000000e+00 : f32
    %9 = vector.broadcast %cst_7 : f32 to vector<64x2xf32>
    %10 = arith.mulf %8, %9 : vector<64x2xf32>
    %11 = vector.extract_strided_slice %5 {offsets = [0, 2], sizes = [64, 2], strides = [1, 1]} : vector<64x8xf32> to vector<64x2xf32>
    %12 = math.exp %11 : vector<64x2xf32>
    %cst_8 = arith.constant 4.000000e+00 : f32
    %13 = vector.broadcast %cst_8 : f32 to vector<64x2xf32>
    %14 = arith.mulf %12, %13 : vector<64x2xf32>
    %15 = vector.extract_strided_slice %5 {offsets = [0, 4], sizes = [64, 4], strides = [1, 1]} : vector<64x8xf32> to vector<64x4xf32>
    %cst_9 = arith.constant 0.000000e+00 : f32
    %16 = vector.broadcast %cst_9 : f32 to vector<64x4xf32>
    %17 = arith.subf %16, %15 : vector<64x4xf32>
    %18 = math.exp %17 : vector<64x4xf32>
    %cst_10 = arith.constant 1.000000e+00 : f32
    %19 = vector.broadcast %cst_10 : f32 to vector<64x4xf32>
    %20 = arith.addf %19, %18 : vector<64x4xf32>
    %cst_11 = arith.constant 1.000000e+00 : f32
    %21 = vector.broadcast %cst_11 : f32 to vector<64x4xf32>
    %22 = arith.divf %21, %20 : vector<64x4xf32>
    %c0_12 = arith.constant 0 : index
    %c0_13 = arith.constant 0 : index
    %23 = vector.load %arg5[%c0_12, %c0_13] : memref<64x8xf32, #tpu.memory_space<vmem>>, vector<64x2xf32>
    tpu.vector_store %arg5[%c0_12, %c0_13], %10 {strides = array<i32>} : memref<64x8xf32, #tpu.memory_space<vmem>>, vector<64x2xf32>,
    %c0_14 = arith.constant 0 : index
    %c2 = arith.constant 2 : index
    %24 = vector.load %arg5[%c0_14, %c2] : memref<64x8xf32, #tpu.memory_space<vmem>>, vector<64x2xf32>
    tpu.vector_store %arg5[%c0_14, %c2], %14 {strides = array<i32>} : memref<64x8xf32, #tpu.memory_space<vmem>>, vector<64x2xf32>,
    %c0_15 = arith.constant 0 : index
    %c4 = arith.constant 4 : index
    %25 = vector.load %arg5[%c0_15, %c4] : memref<64x8xf32, #tpu.memory_space<vmem>>, vector<64x4xf32>
    tpu.vector_store %arg5[%c0_15, %c4], %22 {strides = array<i32>} : memref<64x8xf32, #tpu.memory_space<vmem>>, vector<64x4xf32>,
    return
  }
  func.func @transform_0(%arg0: i32) -> (i32, i32) {
    %c0_i32 = arith.constant 0 : i32
    %c0_i32_0 = arith.constant 0 : i32
    return %arg0, %c0_i32 : i32, i32
  }
  func.func @transform_1(%arg0: i32) -> (i32, i32) {
    %c0_i32 = arith.constant 0 : i32
    %c0_i32_0 = arith.constant 0 : i32
    %c0_i32_1 = arith.constant 0 : i32
    return %c0_i32, %c0_i32_0 : i32, i32
  }
  func.func @transform_2(%arg0: i32) -> (i32, i32) {
    %c0_i32 = arith.constant 0 : i32
    %c0_i32_0 = arith.constant 0 : i32
    %c0_i32_1 = arith.constant 0 : i32
    return %c0_i32, %c0_i32_0 : i32, i32
  }
  func.func @transform_3(%arg0: i32) -> (i32, i32) {
    %c0_i32 = arith.constant 0 : i32
    %c0_i32_0 = arith.constant 0 : i32
    return %arg0, %c0_i32 : i32, i32
  }
  func.func @transform_4(%arg0: i32) -> (i32, i32) {
    %c0_i32 = arith.constant 0 : i32
    %c0_i32_0 = arith.constant 0 : i32
    return %arg0, %c0_i32 : i32, i32
  }
}

module attributes {stable_mosaic.version = 11 : i64} {
  func.func @_mm_bias_act_kernel(%arg0: i32, %arg1: memref<16x64xbf16, #tpu.memory_space<vmem>>, %arg2: memref<64x64xbf16, #tpu.memory_space<vmem>>, %arg3: memref<1x64xf32, #tpu.memory_space<vmem>>, %arg4: memref<16x64xbf16, #tpu.memory_space<vmem>>) attributes {dimension_semantics = [#tpu.dimension_semantics<parallel>], iteration_bounds = array<i64: 2>, scalar_prefetch = 0 : i64, scratch_operands = 0 : i64, tpu.core_type = #tpu.core_type<tc>, window_params = [{transform_indices = @transform_0, window_bounds = array<i64: 16, 64>}, {pipeline_mode = #tpu.pipeline_mode<synchronous>, transform_indices = @transform_1, window_bounds = array<i64: 64, 64>}, {pipeline_mode = #tpu.pipeline_mode<synchronous>, transform_indices = @transform_2, window_bounds = array<i64: 1, 64>}, {transform_indices = @transform_3, window_bounds = array<i64: 16, 64>}]} {
    %c0 = arith.constant 0 : index
    %c0_0 = arith.constant 0 : index
    %0 = vector.load %arg1[%c0, %c0_0] : memref<16x64xbf16, #tpu.memory_space<vmem>>, vector<16x64xbf16>
    %c0_1 = arith.constant 0 : index
    %c0_2 = arith.constant 0 : index
    %1 = vector.load %arg2[%c0_1, %c0_2] : memref<64x64xbf16, #tpu.memory_space<vmem>>, vector<64x64xbf16>
    %cst = arith.constant dense<0.000000e+00> : vector<16x64xf32>
    %2 = tpu.matmul %0, %1, %cst {dimension_numbers = #tpu.dot_dimension_numbers<[1], [0], [0], [1], [0, 0, 1, 1], [], []>} : vector<16x64xbf16>, vector<64x64xbf16>, vector<16x64xf32> -> vector<16x64xf32>
    %c0_3 = arith.constant 0 : index
    %c0_4 = arith.constant 0 : index
    %3 = vector.load %arg3[%c0_3, %c0_4] : memref<1x64xf32, #tpu.memory_space<vmem>>, vector<1x64xf32>
    %4 = vector.broadcast %3 : vector<1x64xf32> to vector<16x64xf32>
    %5 = arith.addf %2, %4 : vector<16x64xf32>
    %cst_5 = arith.constant 0.000000e+00 : f32
    %6 = vector.broadcast %cst_5 : f32 to vector<16x64xf32>
    %7 = arith.subf %6, %5 : vector<16x64xf32>
    %8 = math.exp %7 : vector<16x64xf32>
    %cst_6 = arith.constant 1.000000e+00 : f32
    %9 = vector.broadcast %cst_6 : f32 to vector<16x64xf32>
    %10 = arith.addf %9, %8 : vector<16x64xf32>
    %cst_7 = arith.constant 1.000000e+00 : f32
    %11 = vector.broadcast %cst_7 : f32 to vector<16x64xf32>
    %12 = arith.divf %11, %10 : vector<16x64xf32>
    %13 = arith.mulf %5, %12 : vector<16x64xf32>
    %14 = arith.truncf %13 : vector<16x64xf32> to vector<16x64xbf16>
    %c0_8 = arith.constant 0 : index
    %c0_9 = arith.constant 0 : index
    %15 = vector.load %arg4[%c0_8, %c0_9] : memref<16x64xbf16, #tpu.memory_space<vmem>>, vector<16x64xbf16>
    tpu.vector_store %arg4[%c0_8, %c0_9], %14 {strides = array<i32>} : memref<16x64xbf16, #tpu.memory_space<vmem>>, vector<16x64xbf16>,
    return
  }
  func.func @transform_0(%arg0: i32) -> (i32, i32) {
    %c0_i32 = arith.constant 0 : i32
    %c0_i32_0 = arith.constant 0 : i32
    return %arg0, %c0_i32 : i32, i32
  }
  func.func @transform_1(%arg0: i32) -> (i32, i32) {
    %c0_i32 = arith.constant 0 : i32
    %c0_i32_0 = arith.constant 0 : i32
    %c0_i32_1 = arith.constant 0 : i32
    return %c0_i32, %c0_i32_0 : i32, i32
  }
  func.func @transform_2(%arg0: i32) -> (i32, i32) {
    %c0_i32 = arith.constant 0 : i32
    %c0_i32_0 = arith.constant 0 : i32
    %c0_i32_1 = arith.constant 0 : i32
    return %c0_i32, %c0_i32_0 : i32, i32
  }
  func.func @transform_3(%arg0: i32) -> (i32, i32) {
    %c0_i32 = arith.constant 0 : i32
    %c0_i32_0 = arith.constant 0 : i32
    return %arg0, %c0_i32 : i32, i32
  }
}

module attributes {stable_mosaic.version = 11 : i64} {
  func.func @_mm_bias_act_kernel(%arg0: i32, %arg1: memref<16x288xbf16, #tpu.memory_space<vmem>>, %arg2: memref<288x64xbf16, #tpu.memory_space<vmem>>, %arg3: memref<1x64xf32, #tpu.memory_space<vmem>>, %arg4: memref<16x64xbf16, #tpu.memory_space<vmem>>) attributes {dimension_semantics = [#tpu.dimension_semantics<parallel>], iteration_bounds = array<i64: 2>, scalar_prefetch = 0 : i64, scratch_operands = 0 : i64, tpu.core_type = #tpu.core_type<tc>, window_params = [{transform_indices = @transform_0, window_bounds = array<i64: 16, 288>}, {pipeline_mode = #tpu.pipeline_mode<synchronous>, transform_indices = @transform_1, window_bounds = array<i64: 288, 64>}, {pipeline_mode = #tpu.pipeline_mode<synchronous>, transform_indices = @transform_2, window_bounds = array<i64: 1, 64>}, {transform_indices = @transform_3, window_bounds = array<i64: 16, 64>}]} {
    %c0 = arith.constant 0 : index
    %c0_0 = arith.constant 0 : index
    %0 = vector.load %arg1[%c0, %c0_0] : memref<16x288xbf16, #tpu.memory_space<vmem>>, vector<16x288xbf16>
    %c0_1 = arith.constant 0 : index
    %c0_2 = arith.constant 0 : index
    %1 = vector.load %arg2[%c0_1, %c0_2] : memref<288x64xbf16, #tpu.memory_space<vmem>>, vector<288x64xbf16>
    %cst = arith.constant dense<0.000000e+00> : vector<16x64xf32>
    %2 = tpu.matmul %0, %1, %cst {dimension_numbers = #tpu.dot_dimension_numbers<[1], [0], [0], [1], [0, 0, 1, 1], [], []>} : vector<16x288xbf16>, vector<288x64xbf16>, vector<16x64xf32> -> vector<16x64xf32>
    %c0_3 = arith.constant 0 : index
    %c0_4 = arith.constant 0 : index
    %3 = vector.load %arg3[%c0_3, %c0_4] : memref<1x64xf32, #tpu.memory_space<vmem>>, vector<1x64xf32>
    %4 = vector.broadcast %3 : vector<1x64xf32> to vector<16x64xf32>
    %5 = arith.addf %2, %4 : vector<16x64xf32>
    %cst_5 = arith.constant 0.000000e+00 : f32
    %6 = vector.broadcast %cst_5 : f32 to vector<16x64xf32>
    %7 = arith.subf %6, %5 : vector<16x64xf32>
    %8 = math.exp %7 : vector<16x64xf32>
    %cst_6 = arith.constant 1.000000e+00 : f32
    %9 = vector.broadcast %cst_6 : f32 to vector<16x64xf32>
    %10 = arith.addf %9, %8 : vector<16x64xf32>
    %cst_7 = arith.constant 1.000000e+00 : f32
    %11 = vector.broadcast %cst_7 : f32 to vector<16x64xf32>
    %12 = arith.divf %11, %10 : vector<16x64xf32>
    %13 = arith.mulf %5, %12 : vector<16x64xf32>
    %14 = arith.truncf %13 : vector<16x64xf32> to vector<16x64xbf16>
    %c0_8 = arith.constant 0 : index
    %c0_9 = arith.constant 0 : index
    %15 = vector.load %arg4[%c0_8, %c0_9] : memref<16x64xbf16, #tpu.memory_space<vmem>>, vector<16x64xbf16>
    tpu.vector_store %arg4[%c0_8, %c0_9], %14 {strides = array<i32>} : memref<16x64xbf16, #tpu.memory_space<vmem>>, vector<16x64xbf16>,
    return
  }
  func.func @transform_0(%arg0: i32) -> (i32, i32) {
    %c0_i32 = arith.constant 0 : i32
    %c0_i32_0 = arith.constant 0 : i32
    return %arg0, %c0_i32 : i32, i32
  }
  func.func @transform_1(%arg0: i32) -> (i32, i32) {
    %c0_i32 = arith.constant 0 : i32
    %c0_i32_0 = arith.constant 0 : i32
    %c0_i32_1 = arith.constant 0 : i32
    return %c0_i32, %c0_i32_0 : i32, i32
  }
  func.func @transform_2(%arg0: i32) -> (i32, i32) {
    %c0_i32 = arith.constant 0 : i32
    %c0_i32_0 = arith.constant 0 : i32
    %c0_i32_1 = arith.constant 0 : i32
    return %c0_i32, %c0_i32_0 : i32, i32
  }
  func.func @transform_3(%arg0: i32) -> (i32, i32) {
    %c0_i32 = arith.constant 0 : i32
    %c0_i32_0 = arith.constant 0 : i32
    return %arg0, %c0_i32 : i32, i32
  }
}

module attributes {stable_mosaic.version = 11 : i64} {
  func.func @_mm_bias_act_kernel(%arg0: i32, %arg1: memref<16x64xbf16, #tpu.memory_space<vmem>>, %arg2: memref<64x32xbf16, #tpu.memory_space<vmem>>, %arg3: memref<1x32xf32, #tpu.memory_space<vmem>>, %arg4: memref<16x32xbf16, #tpu.memory_space<vmem>>) attributes {dimension_semantics = [#tpu.dimension_semantics<parallel>], iteration_bounds = array<i64: 2>, scalar_prefetch = 0 : i64, scratch_operands = 0 : i64, tpu.core_type = #tpu.core_type<tc>, window_params = [{transform_indices = @transform_0, window_bounds = array<i64: 16, 64>}, {pipeline_mode = #tpu.pipeline_mode<synchronous>, transform_indices = @transform_1, window_bounds = array<i64: 64, 32>}, {pipeline_mode = #tpu.pipeline_mode<synchronous>, transform_indices = @transform_2, window_bounds = array<i64: 1, 32>}, {transform_indices = @transform_3, window_bounds = array<i64: 16, 32>}]} {
    %c0 = arith.constant 0 : index
    %c0_0 = arith.constant 0 : index
    %0 = vector.load %arg1[%c0, %c0_0] : memref<16x64xbf16, #tpu.memory_space<vmem>>, vector<16x64xbf16>
    %c0_1 = arith.constant 0 : index
    %c0_2 = arith.constant 0 : index
    %1 = vector.load %arg2[%c0_1, %c0_2] : memref<64x32xbf16, #tpu.memory_space<vmem>>, vector<64x32xbf16>
    %cst = arith.constant dense<0.000000e+00> : vector<16x32xf32>
    %2 = tpu.matmul %0, %1, %cst {dimension_numbers = #tpu.dot_dimension_numbers<[1], [0], [0], [1], [0, 0, 1, 1], [], []>} : vector<16x64xbf16>, vector<64x32xbf16>, vector<16x32xf32> -> vector<16x32xf32>
    %c0_3 = arith.constant 0 : index
    %c0_4 = arith.constant 0 : index
    %3 = vector.load %arg3[%c0_3, %c0_4] : memref<1x32xf32, #tpu.memory_space<vmem>>, vector<1x32xf32>
    %4 = vector.broadcast %3 : vector<1x32xf32> to vector<16x32xf32>
    %5 = arith.addf %2, %4 : vector<16x32xf32>
    %cst_5 = arith.constant 0.000000e+00 : f32
    %6 = vector.broadcast %cst_5 : f32 to vector<16x32xf32>
    %7 = arith.subf %6, %5 : vector<16x32xf32>
    %8 = math.exp %7 : vector<16x32xf32>
    %cst_6 = arith.constant 1.000000e+00 : f32
    %9 = vector.broadcast %cst_6 : f32 to vector<16x32xf32>
    %10 = arith.addf %9, %8 : vector<16x32xf32>
    %cst_7 = arith.constant 1.000000e+00 : f32
    %11 = vector.broadcast %cst_7 : f32 to vector<16x32xf32>
    %12 = arith.divf %11, %10 : vector<16x32xf32>
    %13 = arith.mulf %5, %12 : vector<16x32xf32>
    %14 = arith.truncf %13 : vector<16x32xf32> to vector<16x32xbf16>
    %c0_8 = arith.constant 0 : index
    %c0_9 = arith.constant 0 : index
    %15 = vector.load %arg4[%c0_8, %c0_9] : memref<16x32xbf16, #tpu.memory_space<vmem>>, vector<16x32xbf16>
    tpu.vector_store %arg4[%c0_8, %c0_9], %14 {strides = array<i32>} : memref<16x32xbf16, #tpu.memory_space<vmem>>, vector<16x32xbf16>,
    return
  }
  func.func @transform_0(%arg0: i32) -> (i32, i32) {
    %c0_i32 = arith.constant 0 : i32
    %c0_i32_0 = arith.constant 0 : i32
    return %arg0, %c0_i32 : i32, i32
  }
  func.func @transform_1(%arg0: i32) -> (i32, i32) {
    %c0_i32 = arith.constant 0 : i32
    %c0_i32_0 = arith.constant 0 : i32
    %c0_i32_1 = arith.constant 0 : i32
    return %c0_i32, %c0_i32_0 : i32, i32
  }
  func.func @transform_2(%arg0: i32) -> (i32, i32) {
    %c0_i32 = arith.constant 0 : i32
    %c0_i32_0 = arith.constant 0 : i32
    %c0_i32_1 = arith.constant 0 : i32
    return %c0_i32, %c0_i32_0 : i32, i32
  }
  func.func @transform_3(%arg0: i32) -> (i32, i32) {
    %c0_i32 = arith.constant 0 : i32
    %c0_i32_0 = arith.constant 0 : i32
    return %arg0, %c0_i32 : i32, i32
  }
}

module attributes {stable_mosaic.version = 11 : i64} {
  func.func @_pred_decode_kernel(%arg0: i32, %arg1: memref<16x64xbf16, #tpu.memory_space<vmem>>, %arg2: memref<64x8xbf16, #tpu.memory_space<vmem>>, %arg3: memref<1x8xf32, #tpu.memory_space<vmem>>, %arg4: memref<16x2xf32, #tpu.memory_space<vmem>>, %arg5: memref<16x8xf32, #tpu.memory_space<vmem>>) attributes {dimension_semantics = [#tpu.dimension_semantics<parallel>], iteration_bounds = array<i64: 2>, scalar_prefetch = 0 : i64, scratch_operands = 0 : i64, tpu.core_type = #tpu.core_type<tc>, window_params = [{transform_indices = @transform_0, window_bounds = array<i64: 16, 64>}, {pipeline_mode = #tpu.pipeline_mode<synchronous>, transform_indices = @transform_1, window_bounds = array<i64: 64, 8>}, {pipeline_mode = #tpu.pipeline_mode<synchronous>, transform_indices = @transform_2, window_bounds = array<i64: 1, 8>}, {transform_indices = @transform_3, window_bounds = array<i64: 16, 2>}, {transform_indices = @transform_4, window_bounds = array<i64: 16, 8>}]} {
    %c0 = arith.constant 0 : index
    %c0_0 = arith.constant 0 : index
    %0 = vector.load %arg1[%c0, %c0_0] : memref<16x64xbf16, #tpu.memory_space<vmem>>, vector<16x64xbf16>
    %c0_1 = arith.constant 0 : index
    %c0_2 = arith.constant 0 : index
    %1 = vector.load %arg2[%c0_1, %c0_2] : memref<64x8xbf16, #tpu.memory_space<vmem>>, vector<64x8xbf16>
    %cst = arith.constant dense<0.000000e+00> : vector<16x8xf32>
    %2 = tpu.matmul %0, %1, %cst {dimension_numbers = #tpu.dot_dimension_numbers<[1], [0], [0], [1], [0, 0, 1, 1], [], []>} : vector<16x64xbf16>, vector<64x8xbf16>, vector<16x8xf32> -> vector<16x8xf32>
    %c0_3 = arith.constant 0 : index
    %c0_4 = arith.constant 0 : index
    %3 = vector.load %arg3[%c0_3, %c0_4] : memref<1x8xf32, #tpu.memory_space<vmem>>, vector<1x8xf32>
    %4 = vector.broadcast %3 : vector<1x8xf32> to vector<16x8xf32>
    %5 = arith.addf %2, %4 : vector<16x8xf32>
    %6 = vector.extract_strided_slice %5 {offsets = [0, 0], sizes = [16, 2], strides = [1, 1]} : vector<16x8xf32> to vector<16x2xf32>
    %c0_5 = arith.constant 0 : index
    %c0_6 = arith.constant 0 : index
    %7 = vector.load %arg4[%c0_5, %c0_6] : memref<16x2xf32, #tpu.memory_space<vmem>>, vector<16x2xf32>
    %8 = arith.addf %6, %7 : vector<16x2xf32>
    %cst_7 = arith.constant 8.000000e+00 : f32
    %9 = vector.broadcast %cst_7 : f32 to vector<16x2xf32>
    %10 = arith.mulf %8, %9 : vector<16x2xf32>
    %11 = vector.extract_strided_slice %5 {offsets = [0, 2], sizes = [16, 2], strides = [1, 1]} : vector<16x8xf32> to vector<16x2xf32>
    %12 = math.exp %11 : vector<16x2xf32>
    %cst_8 = arith.constant 8.000000e+00 : f32
    %13 = vector.broadcast %cst_8 : f32 to vector<16x2xf32>
    %14 = arith.mulf %12, %13 : vector<16x2xf32>
    %15 = vector.extract_strided_slice %5 {offsets = [0, 4], sizes = [16, 4], strides = [1, 1]} : vector<16x8xf32> to vector<16x4xf32>
    %cst_9 = arith.constant 0.000000e+00 : f32
    %16 = vector.broadcast %cst_9 : f32 to vector<16x4xf32>
    %17 = arith.subf %16, %15 : vector<16x4xf32>
    %18 = math.exp %17 : vector<16x4xf32>
    %cst_10 = arith.constant 1.000000e+00 : f32
    %19 = vector.broadcast %cst_10 : f32 to vector<16x4xf32>
    %20 = arith.addf %19, %18 : vector<16x4xf32>
    %cst_11 = arith.constant 1.000000e+00 : f32
    %21 = vector.broadcast %cst_11 : f32 to vector<16x4xf32>
    %22 = arith.divf %21, %20 : vector<16x4xf32>
    %c0_12 = arith.constant 0 : index
    %c0_13 = arith.constant 0 : index
    %23 = vector.load %arg5[%c0_12, %c0_13] : memref<16x8xf32, #tpu.memory_space<vmem>>, vector<16x2xf32>
    tpu.vector_store %arg5[%c0_12, %c0_13], %10 {strides = array<i32>} : memref<16x8xf32, #tpu.memory_space<vmem>>, vector<16x2xf32>,
    %c0_14 = arith.constant 0 : index
    %c2 = arith.constant 2 : index
    %24 = vector.load %arg5[%c0_14, %c2] : memref<16x8xf32, #tpu.memory_space<vmem>>, vector<16x2xf32>
    tpu.vector_store %arg5[%c0_14, %c2], %14 {strides = array<i32>} : memref<16x8xf32, #tpu.memory_space<vmem>>, vector<16x2xf32>,
    %c0_15 = arith.constant 0 : index
    %c4 = arith.constant 4 : index
    %25 = vector.load %arg5[%c0_15, %c4] : memref<16x8xf32, #tpu.memory_space<vmem>>, vector<16x4xf32>
    tpu.vector_store %arg5[%c0_15, %c4], %22 {strides = array<i32>} : memref<16x8xf32, #tpu.memory_space<vmem>>, vector<16x4xf32>,
    return
  }
  func.func @transform_0(%arg0: i32) -> (i32, i32) {
    %c0_i32 = arith.constant 0 : i32
    %c0_i32_0 = arith.constant 0 : i32
    return %arg0, %c0_i32 : i32, i32
  }
  func.func @transform_1(%arg0: i32) -> (i32, i32) {
    %c0_i32 = arith.constant 0 : i32
    %c0_i32_0 = arith.constant 0 : i32
    %c0_i32_1 = arith.constant 0 : i32
    return %c0_i32, %c0_i32_0 : i32, i32
  }
  func.func @transform_2(%arg0: i32) -> (i32, i32) {
    %c0_i32 = arith.constant 0 : i32
    %c0_i32_0 = arith.constant 0 : i32
    %c0_i32_1 = arith.constant 0 : i32
    return %c0_i32, %c0_i32_0 : i32, i32
  }
  func.func @transform_3(%arg0: i32) -> (i32, i32) {
    %c0_i32 = arith.constant 0 : i32
    %c0_i32_0 = arith.constant 0 : i32
    return %arg0, %c0_i32 : i32, i32
  }
  func.func @transform_4(%arg0: i32) -> (i32, i32) {
    %c0_i32 = arith.constant 0 : i32
    %c0_i32_0 = arith.constant 0 : i32
    return %arg0, %c0_i32 : i32, i32
  }
}

module attributes {stable_mosaic.version = 11 : i64} {
  func.func @_mm_bias_act_kernel(%arg0: i32, %arg1: memref<8x128xbf16, #tpu.memory_space<vmem>>, %arg2: memref<128x128xbf16, #tpu.memory_space<vmem>>, %arg3: memref<1x128xf32, #tpu.memory_space<vmem>>, %arg4: memref<8x128xbf16, #tpu.memory_space<vmem>>) attributes {dimension_semantics = [#tpu.dimension_semantics<parallel>], iteration_bounds = array<i64: 1>, scalar_prefetch = 0 : i64, scratch_operands = 0 : i64, tpu.core_type = #tpu.core_type<tc>, window_params = [{transform_indices = @transform_0, window_bounds = array<i64: 8, 128>}, {pipeline_mode = #tpu.pipeline_mode<synchronous>, transform_indices = @transform_1, window_bounds = array<i64: 128, 128>}, {pipeline_mode = #tpu.pipeline_mode<synchronous>, transform_indices = @transform_2, window_bounds = array<i64: 1, 128>}, {transform_indices = @transform_3, window_bounds = array<i64: 8, 128>}]} {
    %c0 = arith.constant 0 : index
    %c0_0 = arith.constant 0 : index
    %0 = vector.load %arg1[%c0, %c0_0] : memref<8x128xbf16, #tpu.memory_space<vmem>>, vector<8x128xbf16>
    %c0_1 = arith.constant 0 : index
    %c0_2 = arith.constant 0 : index
    %1 = vector.load %arg2[%c0_1, %c0_2] : memref<128x128xbf16, #tpu.memory_space<vmem>>, vector<128x128xbf16>
    %cst = arith.constant dense<0.000000e+00> : vector<8x128xf32>
    %2 = tpu.matmul %0, %1, %cst {dimension_numbers = #tpu.dot_dimension_numbers<[1], [0], [0], [1], [0, 0, 1, 1], [], []>} : vector<8x128xbf16>, vector<128x128xbf16>, vector<8x128xf32> -> vector<8x128xf32>
    %c0_3 = arith.constant 0 : index
    %c0_4 = arith.constant 0 : index
    %3 = vector.load %arg3[%c0_3, %c0_4] : memref<1x128xf32, #tpu.memory_space<vmem>>, vector<1x128xf32>
    %4 = vector.broadcast %3 : vector<1x128xf32> to vector<8x128xf32>
    %5 = arith.addf %2, %4 : vector<8x128xf32>
    %cst_5 = arith.constant 0.000000e+00 : f32
    %6 = vector.broadcast %cst_5 : f32 to vector<8x128xf32>
    %7 = arith.subf %6, %5 : vector<8x128xf32>
    %8 = math.exp %7 : vector<8x128xf32>
    %cst_6 = arith.constant 1.000000e+00 : f32
    %9 = vector.broadcast %cst_6 : f32 to vector<8x128xf32>
    %10 = arith.addf %9, %8 : vector<8x128xf32>
    %cst_7 = arith.constant 1.000000e+00 : f32
    %11 = vector.broadcast %cst_7 : f32 to vector<8x128xf32>
    %12 = arith.divf %11, %10 : vector<8x128xf32>
    %13 = arith.mulf %5, %12 : vector<8x128xf32>
    %14 = arith.truncf %13 : vector<8x128xf32> to vector<8x128xbf16>
    %c0_8 = arith.constant 0 : index
    %c0_9 = arith.constant 0 : index
    %15 = vector.load %arg4[%c0_8, %c0_9] : memref<8x128xbf16, #tpu.memory_space<vmem>>, vector<8x128xbf16>
    tpu.vector_store %arg4[%c0_8, %c0_9], %14 {strides = array<i32>} : memref<8x128xbf16, #tpu.memory_space<vmem>>, vector<8x128xbf16>,
    return
  }
  func.func @transform_0(%arg0: i32) -> (i32, i32) {
    %c0_i32 = arith.constant 0 : i32
    %c0_i32_0 = arith.constant 0 : i32
    return %arg0, %c0_i32 : i32, i32
  }
  func.func @transform_1(%arg0: i32) -> (i32, i32) {
    %c0_i32 = arith.constant 0 : i32
    %c0_i32_0 = arith.constant 0 : i32
    %c0_i32_1 = arith.constant 0 : i32
    return %c0_i32, %c0_i32_0 : i32, i32
  }
  func.func @transform_2(%arg0: i32) -> (i32, i32) {
    %c0_i32 = arith.constant 0 : i32
    %c0_i32_0 = arith.constant 0 : i32
    %c0_i32_1 = arith.constant 0 : i32
    return %c0_i32, %c0_i32_0 : i32, i32
  }
  func.func @transform_3(%arg0: i32) -> (i32, i32) {
    %c0_i32 = arith.constant 0 : i32
    %c0_i32_0 = arith.constant 0 : i32
    return %arg0, %c0_i32 : i32, i32
  }
}

module attributes {stable_mosaic.version = 11 : i64} {
  func.func @_mm_bias_act_kernel(%arg0: i32, %arg1: memref<8x576xbf16, #tpu.memory_space<vmem>>, %arg2: memref<576x128xbf16, #tpu.memory_space<vmem>>, %arg3: memref<1x128xf32, #tpu.memory_space<vmem>>, %arg4: memref<8x128xbf16, #tpu.memory_space<vmem>>) attributes {dimension_semantics = [#tpu.dimension_semantics<parallel>], iteration_bounds = array<i64: 1>, scalar_prefetch = 0 : i64, scratch_operands = 0 : i64, tpu.core_type = #tpu.core_type<tc>, window_params = [{transform_indices = @transform_0, window_bounds = array<i64: 8, 576>}, {pipeline_mode = #tpu.pipeline_mode<synchronous>, transform_indices = @transform_1, window_bounds = array<i64: 576, 128>}, {pipeline_mode = #tpu.pipeline_mode<synchronous>, transform_indices = @transform_2, window_bounds = array<i64: 1, 128>}, {transform_indices = @transform_3, window_bounds = array<i64: 8, 128>}]} {
    %c0 = arith.constant 0 : index
    %c0_0 = arith.constant 0 : index
    %0 = vector.load %arg1[%c0, %c0_0] : memref<8x576xbf16, #tpu.memory_space<vmem>>, vector<8x576xbf16>
    %c0_1 = arith.constant 0 : index
    %c0_2 = arith.constant 0 : index
    %1 = vector.load %arg2[%c0_1, %c0_2] : memref<576x128xbf16, #tpu.memory_space<vmem>>, vector<576x128xbf16>
    %cst = arith.constant dense<0.000000e+00> : vector<8x128xf32>
    %2 = tpu.matmul %0, %1, %cst {dimension_numbers = #tpu.dot_dimension_numbers<[1], [0], [0], [1], [0, 0, 1, 1], [], []>} : vector<8x576xbf16>, vector<576x128xbf16>, vector<8x128xf32> -> vector<8x128xf32>
    %c0_3 = arith.constant 0 : index
    %c0_4 = arith.constant 0 : index
    %3 = vector.load %arg3[%c0_3, %c0_4] : memref<1x128xf32, #tpu.memory_space<vmem>>, vector<1x128xf32>
    %4 = vector.broadcast %3 : vector<1x128xf32> to vector<8x128xf32>
    %5 = arith.addf %2, %4 : vector<8x128xf32>
    %cst_5 = arith.constant 0.000000e+00 : f32
    %6 = vector.broadcast %cst_5 : f32 to vector<8x128xf32>
    %7 = arith.subf %6, %5 : vector<8x128xf32>
    %8 = math.exp %7 : vector<8x128xf32>
    %cst_6 = arith.constant 1.000000e+00 : f32
    %9 = vector.broadcast %cst_6 : f32 to vector<8x128xf32>
    %10 = arith.addf %9, %8 : vector<8x128xf32>
    %cst_7 = arith.constant 1.000000e+00 : f32
    %11 = vector.broadcast %cst_7 : f32 to vector<8x128xf32>
    %12 = arith.divf %11, %10 : vector<8x128xf32>
    %13 = arith.mulf %5, %12 : vector<8x128xf32>
    %14 = arith.truncf %13 : vector<8x128xf32> to vector<8x128xbf16>
    %c0_8 = arith.constant 0 : index
    %c0_9 = arith.constant 0 : index
    %15 = vector.load %arg4[%c0_8, %c0_9] : memref<8x128xbf16, #tpu.memory_space<vmem>>, vector<8x128xbf16>
    tpu.vector_store %arg4[%c0_8, %c0_9], %14 {strides = array<i32>} : memref<8x128xbf16, #tpu.memory_space<vmem>>, vector<8x128xbf16>,
    return
  }
  func.func @transform_0(%arg0: i32) -> (i32, i32) {
    %c0_i32 = arith.constant 0 : i32
    %c0_i32_0 = arith.constant 0 : i32
    return %arg0, %c0_i32 : i32, i32
  }
  func.func @transform_1(%arg0: i32) -> (i32, i32) {
    %c0_i32 = arith.constant 0 : i32
    %c0_i32_0 = arith.constant 0 : i32
    %c0_i32_1 = arith.constant 0 : i32
    return %c0_i32, %c0_i32_0 : i32, i32
  }
  func.func @transform_2(%arg0: i32) -> (i32, i32) {
    %c0_i32 = arith.constant 0 : i32
    %c0_i32_0 = arith.constant 0 : i32
    %c0_i32_1 = arith.constant 0 : i32
    return %c0_i32, %c0_i32_0 : i32, i32
  }
  func.func @transform_3(%arg0: i32) -> (i32, i32) {
    %c0_i32 = arith.constant 0 : i32
    %c0_i32_0 = arith.constant 0 : i32
    return %arg0, %c0_i32 : i32, i32
  }
}

module attributes {stable_mosaic.version = 11 : i64} {
  func.func @_mm_bias_act_kernel(%arg0: i32, %arg1: memref<8x128xbf16, #tpu.memory_space<vmem>>, %arg2: memref<128x32xbf16, #tpu.memory_space<vmem>>, %arg3: memref<1x32xf32, #tpu.memory_space<vmem>>, %arg4: memref<8x32xbf16, #tpu.memory_space<vmem>>) attributes {dimension_semantics = [#tpu.dimension_semantics<parallel>], iteration_bounds = array<i64: 1>, scalar_prefetch = 0 : i64, scratch_operands = 0 : i64, tpu.core_type = #tpu.core_type<tc>, window_params = [{transform_indices = @transform_0, window_bounds = array<i64: 8, 128>}, {pipeline_mode = #tpu.pipeline_mode<synchronous>, transform_indices = @transform_1, window_bounds = array<i64: 128, 32>}, {pipeline_mode = #tpu.pipeline_mode<synchronous>, transform_indices = @transform_2, window_bounds = array<i64: 1, 32>}, {transform_indices = @transform_3, window_bounds = array<i64: 8, 32>}]} {
    %c0 = arith.constant 0 : index
    %c0_0 = arith.constant 0 : index
    %0 = vector.load %arg1[%c0, %c0_0] : memref<8x128xbf16, #tpu.memory_space<vmem>>, vector<8x128xbf16>
    %c0_1 = arith.constant 0 : index
    %c0_2 = arith.constant 0 : index
    %1 = vector.load %arg2[%c0_1, %c0_2] : memref<128x32xbf16, #tpu.memory_space<vmem>>, vector<128x32xbf16>
    %cst = arith.constant dense<0.000000e+00> : vector<8x32xf32>
    %2 = tpu.matmul %0, %1, %cst {dimension_numbers = #tpu.dot_dimension_numbers<[1], [0], [0], [1], [0, 0, 1, 1], [], []>} : vector<8x128xbf16>, vector<128x32xbf16>, vector<8x32xf32> -> vector<8x32xf32>
    %c0_3 = arith.constant 0 : index
    %c0_4 = arith.constant 0 : index
    %3 = vector.load %arg3[%c0_3, %c0_4] : memref<1x32xf32, #tpu.memory_space<vmem>>, vector<1x32xf32>
    %4 = vector.broadcast %3 : vector<1x32xf32> to vector<8x32xf32>
    %5 = arith.addf %2, %4 : vector<8x32xf32>
    %cst_5 = arith.constant 0.000000e+00 : f32
    %6 = vector.broadcast %cst_5 : f32 to vector<8x32xf32>
    %7 = arith.subf %6, %5 : vector<8x32xf32>
    %8 = math.exp %7 : vector<8x32xf32>
    %cst_6 = arith.constant 1.000000e+00 : f32
    %9 = vector.broadcast %cst_6 : f32 to vector<8x32xf32>
    %10 = arith.addf %9, %8 : vector<8x32xf32>
    %cst_7 = arith.constant 1.000000e+00 : f32
    %11 = vector.broadcast %cst_7 : f32 to vector<8x32xf32>
    %12 = arith.divf %11, %10 : vector<8x32xf32>
    %13 = arith.mulf %5, %12 : vector<8x32xf32>
    %14 = arith.truncf %13 : vector<8x32xf32> to vector<8x32xbf16>
    %c0_8 = arith.constant 0 : index
    %c0_9 = arith.constant 0 : index
    %15 = vector.load %arg4[%c0_8, %c0_9] : memref<8x32xbf16, #tpu.memory_space<vmem>>, vector<8x32xbf16>
    tpu.vector_store %arg4[%c0_8, %c0_9], %14 {strides = array<i32>} : memref<8x32xbf16, #tpu.memory_space<vmem>>, vector<8x32xbf16>,
    return
  }
  func.func @transform_0(%arg0: i32) -> (i32, i32) {
    %c0_i32 = arith.constant 0 : i32
    %c0_i32_0 = arith.constant 0 : i32
    return %arg0, %c0_i32 : i32, i32
  }
  func.func @transform_1(%arg0: i32) -> (i32, i32) {
    %c0_i32 = arith.constant 0 : i32
    %c0_i32_0 = arith.constant 0 : i32
    %c0_i32_1 = arith.constant 0 : i32
    return %c0_i32, %c0_i32_0 : i32, i32
  }
  func.func @transform_2(%arg0: i32) -> (i32, i32) {
    %c0_i32 = arith.constant 0 : i32
    %c0_i32_0 = arith.constant 0 : i32
    %c0_i32_1 = arith.constant 0 : i32
    return %c0_i32, %c0_i32_0 : i32, i32
  }
  func.func @transform_3(%arg0: i32) -> (i32, i32) {
    %c0_i32 = arith.constant 0 : i32
    %c0_i32_0 = arith.constant 0 : i32
    return %arg0, %c0_i32 : i32, i32
  }
}

module attributes {stable_mosaic.version = 11 : i64} {
  func.func @_mm_bias_act_kernel(%arg0: i32, %arg1: memref<8x288xbf16, #tpu.memory_space<vmem>>, %arg2: memref<288x64xbf16, #tpu.memory_space<vmem>>, %arg3: memref<1x64xf32, #tpu.memory_space<vmem>>, %arg4: memref<8x64xbf16, #tpu.memory_space<vmem>>) attributes {dimension_semantics = [#tpu.dimension_semantics<parallel>], iteration_bounds = array<i64: 1>, scalar_prefetch = 0 : i64, scratch_operands = 0 : i64, tpu.core_type = #tpu.core_type<tc>, window_params = [{transform_indices = @transform_0, window_bounds = array<i64: 8, 288>}, {pipeline_mode = #tpu.pipeline_mode<synchronous>, transform_indices = @transform_1, window_bounds = array<i64: 288, 64>}, {pipeline_mode = #tpu.pipeline_mode<synchronous>, transform_indices = @transform_2, window_bounds = array<i64: 1, 64>}, {transform_indices = @transform_3, window_bounds = array<i64: 8, 64>}]} {
    %c0 = arith.constant 0 : index
    %c0_0 = arith.constant 0 : index
    %0 = vector.load %arg1[%c0, %c0_0] : memref<8x288xbf16, #tpu.memory_space<vmem>>, vector<8x288xbf16>
    %c0_1 = arith.constant 0 : index
    %c0_2 = arith.constant 0 : index
    %1 = vector.load %arg2[%c0_1, %c0_2] : memref<288x64xbf16, #tpu.memory_space<vmem>>, vector<288x64xbf16>
    %cst = arith.constant dense<0.000000e+00> : vector<8x64xf32>
    %2 = tpu.matmul %0, %1, %cst {dimension_numbers = #tpu.dot_dimension_numbers<[1], [0], [0], [1], [0, 0, 1, 1], [], []>} : vector<8x288xbf16>, vector<288x64xbf16>, vector<8x64xf32> -> vector<8x64xf32>
    %c0_3 = arith.constant 0 : index
    %c0_4 = arith.constant 0 : index
    %3 = vector.load %arg3[%c0_3, %c0_4] : memref<1x64xf32, #tpu.memory_space<vmem>>, vector<1x64xf32>
    %4 = vector.broadcast %3 : vector<1x64xf32> to vector<8x64xf32>
    %5 = arith.addf %2, %4 : vector<8x64xf32>
    %cst_5 = arith.constant 0.000000e+00 : f32
    %6 = vector.broadcast %cst_5 : f32 to vector<8x64xf32>
    %7 = arith.subf %6, %5 : vector<8x64xf32>
    %8 = math.exp %7 : vector<8x64xf32>
    %cst_6 = arith.constant 1.000000e+00 : f32
    %9 = vector.broadcast %cst_6 : f32 to vector<8x64xf32>
    %10 = arith.addf %9, %8 : vector<8x64xf32>
    %cst_7 = arith.constant 1.000000e+00 : f32
    %11 = vector.broadcast %cst_7 : f32 to vector<8x64xf32>
    %12 = arith.divf %11, %10 : vector<8x64xf32>
    %13 = arith.mulf %5, %12 : vector<8x64xf32>
    %14 = arith.truncf %13 : vector<8x64xf32> to vector<8x64xbf16>
    %c0_8 = arith.constant 0 : index
    %c0_9 = arith.constant 0 : index
    %15 = vector.load %arg4[%c0_8, %c0_9] : memref<8x64xbf16, #tpu.memory_space<vmem>>, vector<8x64xbf16>
    tpu.vector_store %arg4[%c0_8, %c0_9], %14 {strides = array<i32>} : memref<8x64xbf16, #tpu.memory_space<vmem>>, vector<8x64xbf16>,
    return
  }
  func.func @transform_0(%arg0: i32) -> (i32, i32) {
    %c0_i32 = arith.constant 0 : i32
    %c0_i32_0 = arith.constant 0 : i32
    return %arg0, %c0_i32 : i32, i32
  }
  func.func @transform_1(%arg0: i32) -> (i32, i32) {
    %c0_i32 = arith.constant 0 : i32
    %c0_i32_0 = arith.constant 0 : i32
    %c0_i32_1 = arith.constant 0 : i32
    return %c0_i32, %c0_i32_0 : i32, i32
  }
  func.func @transform_2(%arg0: i32) -> (i32, i32) {
    %c0_i32 = arith.constant 0 : i32
    %c0_i32_0 = arith.constant 0 : i32
    %c0_i32_1 = arith.constant 0 : i32
    return %c0_i32, %c0_i32_0 : i32, i32
  }
  func.func @transform_3(%arg0: i32) -> (i32, i32) {
    %c0_i32 = arith.constant 0 : i32
    %c0_i32_0 = arith.constant 0 : i32
    return %arg0, %c0_i32 : i32, i32
  }
}

module attributes {stable_mosaic.version = 11 : i64} {
  func.func @_pred_decode_kernel(%arg0: i32, %arg1: memref<8x64xbf16, #tpu.memory_space<vmem>>, %arg2: memref<64x8xbf16, #tpu.memory_space<vmem>>, %arg3: memref<1x8xf32, #tpu.memory_space<vmem>>, %arg4: memref<8x2xf32, #tpu.memory_space<vmem>>, %arg5: memref<8x8xf32, #tpu.memory_space<vmem>>) attributes {dimension_semantics = [#tpu.dimension_semantics<parallel>], iteration_bounds = array<i64: 1>, scalar_prefetch = 0 : i64, scratch_operands = 0 : i64, tpu.core_type = #tpu.core_type<tc>, window_params = [{transform_indices = @transform_0, window_bounds = array<i64: 8, 64>}, {pipeline_mode = #tpu.pipeline_mode<synchronous>, transform_indices = @transform_1, window_bounds = array<i64: 64, 8>}, {pipeline_mode = #tpu.pipeline_mode<synchronous>, transform_indices = @transform_2, window_bounds = array<i64: 1, 8>}, {transform_indices = @transform_3, window_bounds = array<i64: 8, 2>}, {transform_indices = @transform_4, window_bounds = array<i64: 8, 8>}]} {
    %c0 = arith.constant 0 : index
    %c0_0 = arith.constant 0 : index
    %0 = vector.load %arg1[%c0, %c0_0] : memref<8x64xbf16, #tpu.memory_space<vmem>>, vector<8x64xbf16>
    %c0_1 = arith.constant 0 : index
    %c0_2 = arith.constant 0 : index
    %1 = vector.load %arg2[%c0_1, %c0_2] : memref<64x8xbf16, #tpu.memory_space<vmem>>, vector<64x8xbf16>
    %cst = arith.constant dense<0.000000e+00> : vector<8x8xf32>
    %2 = tpu.matmul %0, %1, %cst {dimension_numbers = #tpu.dot_dimension_numbers<[1], [0], [0], [1], [0, 0, 1, 1], [], []>} : vector<8x64xbf16>, vector<64x8xbf16>, vector<8x8xf32> -> vector<8x8xf32>
    %c0_3 = arith.constant 0 : index
    %c0_4 = arith.constant 0 : index
    %3 = vector.load %arg3[%c0_3, %c0_4] : memref<1x8xf32, #tpu.memory_space<vmem>>, vector<1x8xf32>
    %4 = vector.broadcast %3 : vector<1x8xf32> to vector<8x8xf32>
    %5 = arith.addf %2, %4 : vector<8x8xf32>
    %6 = vector.extract_strided_slice %5 {offsets = [0, 0], sizes = [8, 2], strides = [1, 1]} : vector<8x8xf32> to vector<8x2xf32>
    %c0_5 = arith.constant 0 : index
    %c0_6 = arith.constant 0 : index
    %7 = vector.load %arg4[%c0_5, %c0_6] : memref<8x2xf32, #tpu.memory_space<vmem>>, vector<8x2xf32>
    %8 = arith.addf %6, %7 : vector<8x2xf32>
    %cst_7 = arith.constant 1.600000e+01 : f32
    %9 = vector.broadcast %cst_7 : f32 to vector<8x2xf32>
    %10 = arith.mulf %8, %9 : vector<8x2xf32>
    %11 = vector.extract_strided_slice %5 {offsets = [0, 2], sizes = [8, 2], strides = [1, 1]} : vector<8x8xf32> to vector<8x2xf32>
    %12 = math.exp %11 : vector<8x2xf32>
    %cst_8 = arith.constant 1.600000e+01 : f32
    %13 = vector.broadcast %cst_8 : f32 to vector<8x2xf32>
    %14 = arith.mulf %12, %13 : vector<8x2xf32>
    %15 = vector.extract_strided_slice %5 {offsets = [0, 4], sizes = [8, 4], strides = [1, 1]} : vector<8x8xf32> to vector<8x4xf32>
    %cst_9 = arith.constant 0.000000e+00 : f32
    %16 = vector.broadcast %cst_9 : f32 to vector<8x4xf32>
    %17 = arith.subf %16, %15 : vector<8x4xf32>
    %18 = math.exp %17 : vector<8x4xf32>
    %cst_10 = arith.constant 1.000000e+00 : f32
    %19 = vector.broadcast %cst_10 : f32 to vector<8x4xf32>
    %20 = arith.addf %19, %18 : vector<8x4xf32>
    %cst_11 = arith.constant 1.000000e+00 : f32
    %21 = vector.broadcast %cst_11 : f32 to vector<8x4xf32>
    %22 = arith.divf %21, %20 : vector<8x4xf32>
    %c0_12 = arith.constant 0 : index
    %c0_13 = arith.constant 0 : index
    %23 = vector.load %arg5[%c0_12, %c0_13] : memref<8x8xf32, #tpu.memory_space<vmem>>, vector<8x2xf32>
    tpu.vector_store %arg5[%c0_12, %c0_13], %10 {strides = array<i32>} : memref<8x8xf32, #tpu.memory_space<vmem>>, vector<8x2xf32>,
    %c0_14 = arith.constant 0 : index
    %c2 = arith.constant 2 : index
    %24 = vector.load %arg5[%c0_14, %c2] : memref<8x8xf32, #tpu.memory_space<vmem>>, vector<8x2xf32>
    tpu.vector_store %arg5[%c0_14, %c2], %14 {strides = array<i32>} : memref<8x8xf32, #tpu.memory_space<vmem>>, vector<8x2xf32>,
    %c0_15 = arith.constant 0 : index
    %c4 = arith.constant 4 : index
    %25 = vector.load %arg5[%c0_15, %c4] : memref<8x8xf32, #tpu.memory_space<vmem>>, vector<8x4xf32>
    tpu.vector_store %arg5[%c0_15, %c4], %22 {strides = array<i32>} : memref<8x8xf32, #tpu.memory_space<vmem>>, vector<8x4xf32>,
    return
  }
  func.func @transform_0(%arg0: i32) -> (i32, i32) {
    %c0_i32 = arith.constant 0 : i32
    %c0_i32_0 = arith.constant 0 : i32
    return %arg0, %c0_i32 : i32, i32
  }
  func.func @transform_1(%arg0: i32) -> (i32, i32) {
    %c0_i32 = arith.constant 0 : i32
    %c0_i32_0 = arith.constant 0 : i32
    %c0_i32_1 = arith.constant 0 : i32
    return %c0_i32, %c0_i32_0 : i32, i32
  }
  func.func @transform_2(%arg0: i32) -> (i32, i32) {
    %c0_i32 = arith.constant 0 : i32
    %c0_i32_0 = arith.constant 0 : i32
    %c0_i32_1 = arith.constant 0 : i32
    return %c0_i32, %c0_i32_0 : i32, i32
  }
  func.func @transform_3(%arg0: i32) -> (i32, i32) {
    %c0_i32 = arith.constant 0 : i32
    %c0_i32_0 = arith.constant 0 : i32
    return %arg0, %c0_i32 : i32, i32
  }
  func.func @transform_4(%arg0: i32) -> (i32, i32) {
    %c0_i32 = arith.constant 0 : i32
    %c0_i32_0 = arith.constant 0 : i32
    return %arg0, %c0_i32 : i32, i32
  }
}

</mosaic_0001>

<bundles_post_ra>
// kernel: yolox_forward.16
= control target key start
LH: loop header
LB: loop body
LE: loop exit
PB: predicated region body
PF: predicated region fallthrough
CT: control target
= control target key end

     0   :  { %s878_s12 = smov 0   ;;  %s1044_s0 = inlined_call_operand.vmem [shape: bf16[512,72], index: 0, kind: input, shape index: {}]   ;;  %s1045_s1 = inlined_call_operand.vmem [shape: bf16[72,16], index: 1, kind: input, shape index: {}]   ;;  %s1046_s2 = inlined_call_operand.vmem [shape: f32[1,16], index: 2, kind: input, shape index: {}]   ;;  %s1047_s3 = inlined_call_operand.vmem [shape: bf16[512,16], index: 3, kind: output, shape index: {}]  }
   0x1 LB: > { %s649_s13 = sadd.s32 4294967295, %s856_s12   ;;  %p653_p0 = scmp.ge.s32.totalorder %s856_s12, 1  ;;  %s856_s12 = sphi %s878_s12, %s13_s12  }
   0x2   : > { %p138_p1 = scmp.lt.s32.totalorder %s856_s12, 5 }
   0x4   : > { %p139_p2 = pnand %p653_p0, %p138_p1 }
   0x5   : > { %v773_v0 = vld [vmem:[%s1045_s1] sm:$0xff] (!%p139_p2)   ;;  %v774_v1 = vld [vmem:[%s1045_s1 + $0x8] sm:$0xff] (!%p139_p2)   ;;  %s654_s18 = sshll.u32 (!%p139_p2), %s649_s13, 4  ;;  %v775_v2 = vld [vmem:[%s1045_s1 + $0x10] sm:$0xff] (!%p139_p2)   ;;  %vm274_vm0 = vcmask (!%p139_p2), 588800   ;;  %vm299_vm1 = vcmask (!%p139_p2), 1043456  }
   0x6   : > { %142 = sbr.rel (%p139_p2) target bundleno = 301 (0x12d), region = 32  ;;  %727 = vmatprep.subr.bf16.mxu0 (!%p139_p2), %v773_v0  ;;  %753 = vmatprep.subr.bf16.mxu1 (!%p139_p2), %v773_v0  ;;  %p163_p3 = scmp.lt.s32.totalorder (!%p139_p2), %s654_s18, 63  ;;  %v776_v3 = vld [vmem:[%s1045_s1 + $0x18] sm:$0xff] (!%p139_p2)   ;;  %v777_v6 = vld [vmem:[%s1045_s1 + $0x20] ss:$0 sps:$4 sm:$0xff] (!%p139_p2)   ;;  %vm576_vm2 = vcmask (!%p139_p2), 125952  }
   0x7   : > { %728 = vmatpush3.bf16.msra.mxu0 (!%p139_p2), %v773_v0  ;;  %758 = vmatpush3.bf16.msra.mxu1 (!%p139_p2), %v773_v0  ;;  %v301_v7 = vsel (!%p139_p2), %vm299_vm1, %v777_v6, 0  ;;  %v920_v14 = vld [vmem:[%s1046_s2] ss:$0 sm:$0xff] (!%p139_p2) }
   0x8   : > { %729 = vmatprep.subr.bf16.mxu0 (!%p139_p2), %v774_v1  ;;  %754 = vmatprep.subr.bf16.mxu1 (!%p139_p2), %v774_v1 }
   0xb   : > { %730 = vmatpush3.bf16.msra.mxu0 (!%p139_p2), %v774_v1  ;;  %759 = vmatpush3.bf16.msra.mxu1 (!%p139_p2), %v774_v1 }
   0xc   : > { %731 = vmatprep.subr.bf16.mxu0 (!%p139_p2), %v775_v2  ;;  %755 = vmatprep.subr.bf16.mxu1 (!%p139_p2), %v775_v2 }
   0xd   : > { %s1049_s18 = smov (!%p163_p3, %s654_s18), 63 }
   0xe   : > { %s655_s21 = sshll.u32 %s1049_s18, 2 }
   0xf   : > { %s166_s26 = scalar_lea.vmem %s1044_s0, %s655_s21  ;;  %732 = vmatpush3.bf16.msra.mxu0 %v775_v2  ;;  %760 = vmatpush3.bf16.msra.mxu1 %v775_v2  ;;  %s992_s6 = scalar_lea.vmem %s1047_s3, %s655_s21 }
  0x10   : > { %v778_v4 = vld [vmem:[%s166_s26] sm:$0xff]   ;;  %733 = vmatprep.subr.bf16.mxu0 %v776_v3  ;;  %756 = vmatprep.subr.bf16.mxu1 %v776_v3  ;;  %v780_v8 = vld [vmem:[%s166_s26 + $0x8] sm:$0xff]   ;;  %v782_v10 = vld [vmem:[%s166_s26 + $0x10] sm:$0xff]  }
  0x11   : > { %v779_v5 = vld [vmem:[%s166_s26 + $0x20] sm:$0xff]   ;;  %737 = vmatprep.mubr.msk.bf16.mxu0 %vm274_vm0, %v778_v4  ;;  %v781_v9 = vld [vmem:[%s166_s26 + $0x28] sm:$0xff]   ;;  %v783_v11 = vld [vmem:[%s166_s26 + $0x30] sm:$0xff]  }
  0x12   : > { %745 = vmatprep.mubr.msk.bf16.mxu1 %vm274_vm0, %v779_v5  ;;  %v784_v12 = vld [vmem:[%s166_s26 + $0x18] sm:$0xff]  }
  0x13   : > { %734 = vmatpush3.bf16.msra.mxu0 %v776_v3  ;;  %761 = vmatpush3.bf16.msra.mxu1 %v776_v3  ;;  %v785_v13 = vld [vmem:[%s166_s26 + $0x38] sm:$0xff]  }
  0x14   : > { %763 = vmatprep.subr.msk.bf16.mxu0 %vm299_vm1, %v777_v6  ;;  %764 = vmatprep.subr.msk.bf16.mxu1 %vm299_vm1, %v777_v6 }
  0x17   : > { %736 = vmatpush3.bf16.msra.mxu0 %v301_v7  ;;  %762 = vmatpush3.bf16.msra.mxu1 %v301_v7 }
  0x1a   : > { %738 = vmatmul.mubr.msk.bf16.vlgmr.msra.gmra.mrb[0].mxu0 %vm274_vm0, %v780_v8  ;;  %746 = vmatmul.mubr.msk.bf16.vlgmr.msra.gmra.mrb[0].mxu1 %vm274_vm0, %v781_v9 }
  0x1b   : > { %741 = vmatprep.mubr.msk.bf16.mxu0 %vm274_vm0, %v782_v10  ;;  %749 = vmatprep.mubr.msk.bf16.mxu1 %vm274_vm0, %v783_v11 }
  0x22   : > { %742 = vmatmul.mubr.msk.bf16.gmra.mrb[4].mxu0 %vm274_vm0, %v784_v12  ;;  %750 = vmatmul.mubr.msk.bf16.gmra.mrb[4].mxu1 %vm274_vm0, %v785_v13 }
  0xed   : > { %v739_v15 = vpop.f32.mrb[0].mxu0  ;;  %v747_v16 = vpop.f32.mrb[0].mxu1 }
  0xee   : > { %v923_v17 = vadd.f32 %v739_v15, %v920_v14  ;;  %v926_v18 = vadd.f32 %v747_v16, %v920_v14  ;;  %v337_v19 = vpop.f32.mrb[1].mxu0  ;;  %v369_v20 = vpop.f32.mrb[1].mxu1 }
  0xef   : > { %v929_v21 = vadd.f32 %v920_v14, %v337_v19  ;;  %v932_v22 = vadd.f32 %v920_v14, %v369_v20  ;;  %v740_v23 = vpop.f32.mrb[2].mxu0  ;;  %v748_v24 = vpop.f32.mrb[2].mxu1 }
  0xf0   : > { %v402_v25 = vsub.f32 0.0, %v923_v17  ;;  %v410_v26 = vsub.f32 0.0, %v926_v18  ;;  %v937_v27 = vadd.f32 %v740_v23, %v920_v14  ;;  %v940_v28 = vadd.f32 %v748_v24, %v920_v14  ;;  %v340_v29 = vpop.f32.mrb[3].mxu0  ;;  %v372_v30 = vpop.f32.mrb[3].mxu1 }
  0xf1   : > { %v400_v31 = vsub.f32 0.0, %v929_v21  ;;  %v408_v32 = vsub.f32 0.0, %v932_v22  ;;  %v945_v33 = vadd.f32 %v920_v14, %v340_v29  ;;  %v948_v34 = vadd.f32 %v920_v14, %v372_v30 }
  0xf2   : > { %v420_v35 = vmul.f32 1.442695, %v402_v25  ;;  %v436_v36 = vmul.f32 1.442695, %v410_v26  ;;  %v403_v37 = vsub.f32 0.0, %v937_v27  ;;  %v411_v38 = vsub.f32 0.0, %v940_v28 }
  0xf3   : > { %v416_v39 = vmul.f32 1.442695, %v400_v31  ;;  %v432_v40 = vmul.f32 1.442695, %v408_v32  ;;  %v401_v41 = vsub.f32 0.0, %v945_v33  ;;  %v409_v42 = vsub.f32 0.0, %v948_v34 }
  0xf4   : > { %786 = vpow2.f32 %v420_v35  ;;  %v422_v43 = vmul.f32 1.442695, %v403_v37  ;;  %v438_v44 = vmul.f32 1.442695, %v411_v38 }
  0xf5   : > { %788 = vpow2.f32 %v436_v36  ;;  %v743_v45 = vpop.f32.mrb[4].mxu0  ;;  %v751_v46 = vpop.f32.mrb[4].mxu1  ;;  %v418_v47 = vmul.f32 1.442695, %v401_v41  ;;  %v434_v52 = vmul.f32 1.442695, %v409_v42 }
  0xf6   : > { %790 = vpow2.f32 %v416_v39  ;;  %v955_v48 = vadd.f32 %v743_v45, %v920_v14  ;;  %v958_v49 = vadd.f32 %v751_v46, %v920_v14  ;;  %v353_v50 = vpop.f32.mrb[5].mxu0  ;;  %v385_v51 = vpop.f32.mrb[5].mxu1 }
  0xf7   : > { %792 = vpow2.f32 %v432_v40  ;;  %v961_v53 = vadd.f32 %v920_v14, %v353_v50  ;;  %v964_v54 = vadd.f32 %v920_v14, %v385_v51  ;;  %v744_v55 = vpop.f32.mrb[6].mxu0  ;;  %v752_v56 = vpop.f32.mrb[6].mxu1 }
  0xf8   : > { %794 = vpow2.f32 %v422_v43  ;;  %v406_v57 = vsub.f32 0.0, %v955_v48  ;;  %v414_v58 = vsub.f32 0.0, %v958_v49  ;;  %v969_v59 = vadd.f32 %v744_v55, %v920_v14  ;;  %v356_v60 = vpop.f32.mrb[7].mxu0  ;;  %v388_v61 = vpop.f32.mrb[7].mxu1 }
  0xf9   : > { %796 = vpow2.f32 %v438_v44  ;;  %v404_v62 = vsub.f32 0.0, %v961_v53  ;;  %v412_v63 = vsub.f32 0.0, %v964_v54  ;;  %v975_v16 = vadd.f32 %v752_v56, %v920_v14 }
  0xfa   : > { %798 = vpow2.f32 %v418_v47  ;;  %v428_v0 = vmul.f32 1.442695, %v406_v57  ;;  %v444_v1 = vmul.f32 1.442695, %v414_v58  ;;  %v407_v2 = vsub.f32 0.0, %v969_v59 }
  0xfb   : > { %800 = vpow2.f32 %v434_v52  ;;  %v424_v3 = vmul.f32 1.442695, %v404_v62  ;;  %v440_v4 = vmul.f32 1.442695, %v412_v63  ;;  %v978_v23 = vadd.f32 %v920_v14, %v356_v60 }
  0xfc   : > { %802 = vpow2.f32 %v428_v0  ;;  %v430_v5 = vmul.f32 1.442695, %v407_v2  ;;  %v981_v26 = vadd.f32 %v920_v14, %v388_v61  ;;  %v415_v35 = vsub.f32 0.0, %v975_v16 }
  0xfd   : > { %804 = vpow2.f32 %v444_v1  ;;  %v405_v38 = vsub.f32 0.0, %v978_v23 }
  0xfe   : > { %v787_v6 = vpop.eup %786  ;;  %806 = vpow2.f32 %v424_v3  ;;  %v413_v41 = vsub.f32 0.0, %v981_v26  ;;  %v446_v45 = vmul.f32 1.442695, %v415_v35 }
  0xff   : > { %v789_v7 = vpop.eup %788  ;;  %v450_v8 = vadd.f32 1.0, %v787_v6  ;;  %808 = vpow2.f32 %v440_v4  ;;  %v426_v50 = vmul.f32 1.442695, %v405_v38 }
 0x100   : > { %v791_v9 = vpop.eup %790  ;;  %v458_v10 = vadd.f32 1.0, %v789_v7  ;;  %810 = vpow2.f32 %v430_v5  ;;  %v442_v55 = vmul.f32 1.442695, %v413_v41 }
 0x101   : > { %v793_v11 = vpop.eup %792  ;;  %812 = vrcp.f32 %v450_v8  ;;  %v448_v12 = vadd.f32 1.0, %v791_v9 }
 0x102   : > { %v795_v13 = vpop.eup %794  ;;  %814 = vrcp.f32 %v458_v10  ;;  %v456_v15 = vadd.f32 1.0, %v793_v11 }
 0x103   : > { %v797_v19 = vpop.eup %796  ;;  %816 = vrcp.f32 %v448_v12  ;;  %v451_v20 = vadd.f32 1.0, %v795_v13 }
 0x104   : > { %v799_v24 = vpop.eup %798  ;;  %818 = vrcp.f32 %v456_v15  ;;  %v459_v25 = vadd.f32 1.0, %v797_v19 }
 0x105   : > { %v801_v29 = vpop.eup %800  ;;  %820 = vrcp.f32 %v451_v20  ;;  %v449_v30 = vadd.f32 1.0, %v799_v24 }
 0x106   : > { %v803_v31 = vpop.eup %802  ;;  %822 = vrcp.f32 %v459_v25  ;;  %v457_v32 = vadd.f32 1.0, %v801_v29 }
 0x107   : > { %v805_v36 = vpop.eup %804  ;;  %824 = vrcp.f32 %v449_v30  ;;  %v454_v37 = vadd.f32 1.0, %v803_v31 }
 0x108   : > { %v807_v39 = vpop.eup %806  ;;  %826 = vrcp.f32 %v457_v32  ;;  %v462_v40 = vadd.f32 1.0, %v805_v36 }
 0x109   : > { %v809_v14 = vpop.eup %808  ;;  %828 = vrcp.f32 %v454_v37  ;;  %v452_v42 = vadd.f32 1.0, %v807_v39 }
 0x10a   : > { %v811_v43 = vpop.eup %810  ;;  %830 = vrcp.f32 %v462_v40  ;;  %v460_v44 = vadd.f32 1.0, %v809_v14 }
 0x10b   : > { %v813_v46 = vpop.eup %812  ;;  %832 = vrcp.f32 %v452_v42  ;;  %v455_v47 = vadd.f32 1.0, %v811_v43 }
 0x10c   : > { %v815_v51 = vpop.eup %814  ;;  %v498_v52 = vmul.f32 %v813_v46, %v923_v17  ;;  %834 = vrcp.f32 %v460_v44 }
 0x10d   : > { %v817_v56 = vpop.eup %816  ;;  %v506_v57 = vmul.f32 %v815_v51, %v926_v18  ;;  %836 = vrcp.f32 %v455_v47 }
 0x10e   : > { %v819_v58 = vpop.eup %818  ;;  %v700_v60 = vpack.c.bf16 %v498_v52, %v498_v52  ;;  %v496_v61 = vmul.f32 %v817_v56, %v929_v21  ;;  %838 = vpow2.f32 %v446_v45 }
 0x10f   : > { %v821_v17 = vpop.eup %820  ;;  %v708_v62 = vpack.c.bf16 %v506_v57, %v506_v57  ;;  %v504_v63 = vmul.f32 %v819_v58, %v932_v22  ;;  %840 = vpow2.f32 %v426_v50 }
 0x110   : > { %v823_v0 = vpop.eup %822  ;;  %579 = vst.msk [vmem:[%s992_s6 + $0x8] sm:$0xf] %vm576_vm2, %v700_v60  ;;  %v698_v1 = vpack.c.bf16 %v496_v61, %v496_v61  ;;  %v499_v18 = vmul.f32 %v821_v17, %v937_v27  ;;  %842 = vpow2.f32 %v442_v55 }
 0x111   : > { %v825_v2 = vpop.eup %824  ;;  %587 = vst.msk [vmem:[%s992_s6 + $0x28] sm:$0xf] %vm576_vm2, %v708_v62  ;;  %v706_v21 = vpack.c.bf16 %v504_v63, %v504_v63  ;;  %v507_v3 = vmul.f32 %v823_v0, %v940_v28 }
 0x112   : > { %v827_v4 = vpop.eup %826  ;;  %577 = vst.msk [vmem:[%s992_s6] sm:$0xf] %vm576_vm2, %v698_v1  ;;  %v701_v22 = vpack.c.bf16 %v499_v18, %v499_v18  ;;  %v497_v5 = vmul.f32 %v825_v2, %v945_v33 }
 0x113   : > { %v829_v6 = vpop.eup %828  ;;  %585 = vst.msk [vmem:[%s992_s6 + $0x20] sm:$0xf] %vm576_vm2, %v706_v21  ;;  %v709_v27 = vpack.c.bf16 %v507_v3, %v507_v3  ;;  %v505_v7 = vmul.f32 %v827_v4, %v948_v34 }
 0x114   : > { %v831_v8 = vpop.eup %830  ;;  %580 = vst.msk [vmem:[%s992_s6 + $0xc] sm:$0xf] %vm576_vm2, %v701_v22  ;;  %v699_v9 = vpack.c.bf16 %v497_v5, %v497_v5  ;;  %v502_v28 = vmul.f32 %v829_v6, %v955_v48 }
 0x115   : > { %v833_v10 = vpop.eup %832  ;;  %588 = vst.msk [vmem:[%s992_s6 + $0x2c] sm:$0xf] %vm576_vm2, %v709_v27  ;;  %v707_v11 = vpack.c.bf16 %v505_v7, %v505_v7  ;;  %v510_v33 = vmul.f32 %v831_v8, %v958_v49 }
 0x116   : > { %v835_v12 = vpop.eup %834  ;;  %578 = vst.msk [vmem:[%s992_s6 + $0x4] sm:$0xf] %vm576_vm2, %v699_v9  ;;  %v704_v13 = vpack.c.bf16 %v502_v28, %v502_v28  ;;  %v500_v34 = vmul.f32 %v833_v10, %v961_v53 }
 0x117   : > { %v837_v15 = vpop.eup %836  ;;  %586 = vst.msk [vmem:[%s992_s6 + $0x24] sm:$0xf] %vm576_vm2, %v707_v11  ;;  %v712_v19 = vpack.c.bf16 %v510_v33, %v510_v33  ;;  %v508_v48 = vmul.f32 %v835_v12, %v964_v54 }
 0x118   : > { %v839_v20 = vpop.eup %838  ;;  %583 = vst.msk [vmem:[%s992_s6 + $0x18] sm:$0xf] %vm576_vm2, %v704_v13  ;;  %v702_v24 = vpack.c.bf16 %v500_v34, %v500_v34  ;;  %v503_v49 = vmul.f32 %v837_v15, %v969_v59 }
 0x119   : > { %v841_v25 = vpop.eup %840  ;;  %591 = vst.msk [vmem:[%s992_s6 + $0x38] sm:$0xf] %vm576_vm2, %v712_v19  ;;  %v710_v29 = vpack.c.bf16 %v508_v48, %v508_v48  ;;  %v463_v30 = vadd.f32 1.0, %v839_v20 }
 0x11a   : > { %v843_v53 = vpop.eup %842  ;;  %581 = vst.msk [vmem:[%s992_s6 + $0x10] sm:$0xf] %vm576_vm2, %v702_v24  ;;  %v705_v31 = vpack.c.bf16 %v503_v49, %v503_v49  ;;  %v453_v32 = vadd.f32 1.0, %v841_v25 }
 0x11b   : > { %589 = vst.msk [vmem:[%s992_s6 + $0x30] sm:$0xf] %vm576_vm2, %v710_v29  ;;  %844 = vrcp.f32 %v463_v30  ;;  %v461_v54 = vadd.f32 1.0, %v843_v53 }
 0x11c   : > { %584 = vst.msk [vmem:[%s992_s6 + $0x1c] sm:$0xf] %vm576_vm2, %v705_v31  ;;  %846 = vrcp.f32 %v453_v32 }
 0x11d   : > { %848 = vrcp.f32 %v461_v54 }
 0x125   : > { %v845_v59 = vpop.eup %844 }
 0x126   : > { %v847_v35 = vpop.eup %846  ;;  %v511_v36 = vmul.f32 %v845_v59, %v975_v16 }
 0x127   : > { %v849_v37 = vpop.eup %848  ;;  %v501_v38 = vmul.f32 %v847_v35, %v978_v23 }
 0x128   : > { %v713_v39 = vpack.c.bf16 %v511_v36, %v511_v36  ;;  %v509_v40 = vmul.f32 %v849_v37, %v981_v26 }
 0x129   : > { %v703_v41 = vpack.c.bf16 %v501_v38, %v501_v38 }
 0x12a   : > { %592 = vst.msk [vmem:[%s992_s6 + $0x3c] sm:$0xf] %vm576_vm2, %v713_v39  ;;  %v711_v14 = vpack.c.bf16 %v509_v40, %v509_v40 }
 0x12b   : > { %582 = vst.msk [vmem:[%s992_s6 + $0x14] sm:$0xf] %vm576_vm2, %v703_v41 }
 0x12c   : > { %590 = vst.msk [vmem:[%s992_s6 + $0x34] sm:$0xf] %vm576_vm2, %v711_v14 }
 0x12d PF: > { %s13_s12 = sadd.s32 1, %s856_s12  }
 0x12e   : > { %p10_p4 = scmp.ge.s32.totalorder %s13_s12, 6  }
 0x130   :  { %12 = sbr.rel (!%p10_p4) target bundleno = 1 (0x1), region = 62 }

// kernel: yolox_forward.20
= control target key start
LH: loop header
LB: loop body
LE: loop exit
PB: predicated region body
PF: predicated region fallthrough
CT: control target
= control target key end

     0   :  { %s591_s12 = smov 0   ;;  %s664_s0 = inlined_call_operand.vmem [shape: bf16[128,32], index: 0, kind: input, shape index: {}]   ;;  %s665_s1 = inlined_call_operand.vmem [shape: bf16[32,32], index: 1, kind: input, shape index: {}]   ;;  %s666_s2 = inlined_call_operand.vmem [shape: f32[1,32], index: 2, kind: input, shape index: {}]   ;;  %s667_s3 = inlined_call_operand.vmem [shape: bf16[128,32], index: 3, kind: output, shape index: {}]  }
   0x1 LB: > { %s457_s13 = sadd.s32 4294967295, %s569_s12   ;;  %p461_p0 = scmp.ge.s32.totalorder %s569_s12, 1  ;;  %s569_s12 = sphi %s591_s12, %s13_s12  }
   0x2   : > { %p138_p1 = scmp.lt.s32.totalorder %s569_s12, 3 }
   0x4   : > { %p139_p2 = pnand %p461_p0, %p138_p1 }
   0x5   : > { %v525_v0 = vld [vmem:[%s665_s1] sm:$0xff] (!%p139_p2)   ;;  %s462_s16 = sshll.u32 (!%p139_p2), %s457_s13, 3  ;;  %v526_v1 = vld [vmem:[%s665_s1 + $0x8] sm:$0xff] (!%p139_p2)   ;;  %vm226_vm0 = vcmask (!%p139_p2), 261120   ;;  %vm392_vm1 = vcmask (!%p139_p2), 257024  }
   0x6   : > { %142 = sbr.rel (%p139_p2) target bundleno = 272 (0x110), region = 32  ;;  %p163_p3 = scmp.lt.s32.totalorder (!%p139_p2), %s462_s16, 15  ;;  %501 = vmatprep.subr.bf16.mxu0 (!%p139_p2), %v525_v0  ;;  %513 = vmatprep.subr.bf16.mxu1 (!%p139_p2), %v525_v0  ;;  %v466_v6 = vld [vmem:[%s666_s2] ss:$0 sm:$0xff] (!%p139_p2) }
   0x7   : > { %502 = vmatpush3.bf16.msra.mxu0 (!%p139_p2), %v525_v0  ;;  %515 = vmatpush3.bf16.msra.mxu1 (!%p139_p2), %v525_v0 }
   0x8   : > { %503 = vmatprep.subr.bf16.mxu0 (!%p139_p2), %v526_v1  ;;  %514 = vmatprep.subr.bf16.mxu1 (!%p139_p2), %v526_v1 }
   0xb   : > { %504 = vmatpush3.bf16.msra.mxu0 (!%p139_p2), %v526_v1  ;;  %516 = vmatpush3.bf16.msra.mxu1 (!%p139_p2), %v526_v1 }
   0xd   : > { %s669_s16 = smov (!%p163_p3, %s462_s16), 15 }
   0xe   : > { %s463_s19 = sshll.u32 %s669_s16, 2 }
   0xf   : > { %s166_s22 = scalar_lea.vmem %s664_s0, %s463_s19  ;;  %s172_s27 = scalar_lea.vmem %s667_s3, %s463_s19 }
  0x10   : > { %v527_v2 = vld [vmem:[%s166_s22] sm:$0xff]   ;;  %v528_v3 = vld [vmem:[%s166_s22 + $0x10] sm:$0xff]   ;;  %v529_v4 = vld [vmem:[%s166_s22 + $0x8] sm:$0xff]  }
  0x11   : > { %505 = vmatprep.mubr.msk.bf16.mxu0 %vm226_vm0, %v527_v2  ;;  %509 = vmatprep.mubr.msk.bf16.mxu1 %vm226_vm0, %v528_v3  ;;  %v530_v5 = vld [vmem:[%s166_s22 + $0x18] sm:$0xff]  }
  0x12   : > { %506 = vmatmul.mubr.msk.bf16.vlgmr.msra.gmra.mrb[0].mxu0 %vm226_vm0, %v529_v4  ;;  %510 = vmatmul.mubr.msk.bf16.vlgmr.msra.gmra.mrb[0].mxu1 %vm226_vm0, %v530_v5 }
  0xe5   : > { %v507_v7 = vpop.f32.mrb[0].mxu0  ;;  %v511_v9 = vpop.f32.mrb[0].mxu1 }
  0xe6   : > { %v616_v8 = vadd.f32 %v507_v7, %v466_v6  ;;  %v273_v10 = vpop.f32.mrb[1].mxu0  ;;  %v618_v11 = vadd.f32 %v511_v9, %v466_v6  ;;  %v289_v13 = vpop.f32.mrb[1].mxu1 }
  0xe7   : > { %v620_v12 = vadd.f32 %v466_v6, %v273_v10  ;;  %v508_v14 = vpop.f32.mrb[2].mxu0  ;;  %v623_v16 = vadd.f32 %v466_v6, %v289_v13  ;;  %v512_v18 = vpop.f32.mrb[2].mxu1 }
  0xe8   : > { %v306_v15 = vsub.f32 0.0, %v616_v8  ;;  %v625_v17 = vadd.f32 %v508_v14, %v466_v6  ;;  %v276_v19 = vpop.f32.mrb[3].mxu0  ;;  %v310_v20 = vsub.f32 0.0, %v618_v11  ;;  %v629_v22 = vadd.f32 %v512_v18, %v466_v6  ;;  %v292_v24 = vpop.f32.mrb[3].mxu1 }
  0xe9   : > { %v304_v21 = vsub.f32 0.0, %v620_v12  ;;  %v631_v23 = vadd.f32 %v466_v6, %v276_v19  ;;  %v308_v26 = vsub.f32 0.0, %v623_v16  ;;  %v635_v28 = vadd.f32 %v466_v6, %v292_v24 }
  0xea   : > { %v316_v25 = vmul.f32 1.442695, %v306_v15  ;;  %v307_v27 = vsub.f32 0.0, %v625_v17  ;;  %v324_v29 = vmul.f32 1.442695, %v310_v20  ;;  %v311_v31 = vsub.f32 0.0, %v629_v22 }
  0xeb   : > { %v312_v30 = vmul.f32 1.442695, %v304_v21  ;;  %v305_v32 = vsub.f32 0.0, %v631_v23  ;;  %v320_v33 = vmul.f32 1.442695, %v308_v26  ;;  %v309_v35 = vsub.f32 0.0, %v635_v28 }
  0xec   : > { %531 = vpow2.f32 %v316_v25  ;;  %v318_v34 = vmul.f32 1.442695, %v307_v27  ;;  %v326_v36 = vmul.f32 1.442695, %v311_v31 }
  0xed   : > { %533 = vpow2.f32 %v324_v29  ;;  %v314_v37 = vmul.f32 1.442695, %v305_v32  ;;  %v322_v38 = vmul.f32 1.442695, %v309_v35 }
  0xee   : > { %535 = vpow2.f32 %v312_v30 }
  0xef   : > { %537 = vpow2.f32 %v320_v33 }
  0xf0   : > { %539 = vpow2.f32 %v318_v34 }
  0xf1   : > { %541 = vpow2.f32 %v326_v36 }
  0xf2   : > { %543 = vpow2.f32 %v314_v37 }
  0xf3   : > { %545 = vpow2.f32 %v322_v38 }
  0xf6   : > { %v532_v39 = vpop.eup %531 }
  0xf7   : > { %v534_v40 = vpop.eup %533  ;;  %v330_v41 = vadd.f32 1.0, %v532_v39 }
  0xf8   : > { %v536_v42 = vpop.eup %535  ;;  %v334_v43 = vadd.f32 1.0, %v534_v40 }
  0xf9   : > { %v538_v44 = vpop.eup %537  ;;  %547 = vrcp.f32 %v330_v41  ;;  %v328_v45 = vadd.f32 1.0, %v536_v42 }
  0xfa   : > { %v540_v46 = vpop.eup %539  ;;  %549 = vrcp.f32 %v334_v43  ;;  %v332_v47 = vadd.f32 1.0, %v538_v44 }
  0xfb   : > { %v542_v48 = vpop.eup %541  ;;  %551 = vrcp.f32 %v328_v45  ;;  %v331_v49 = vadd.f32 1.0, %v540_v46 }
  0xfc   : > { %v544_v50 = vpop.eup %543  ;;  %553 = vrcp.f32 %v332_v47  ;;  %v335_v51 = vadd.f32 1.0, %v542_v48 }
  0xfd   : > { %v546_v52 = vpop.eup %545  ;;  %555 = vrcp.f32 %v331_v49  ;;  %v329_v53 = vadd.f32 1.0, %v544_v50 }
  0xfe   : > { %557 = vrcp.f32 %v335_v51  ;;  %v333_v54 = vadd.f32 1.0, %v546_v52 }
  0xff   : > { %559 = vrcp.f32 %v329_v53 }
 0x100   : > { %561 = vrcp.f32 %v333_v54 }
 0x103   : > { %v548_v55 = vpop.eup %547 }
 0x104   : > { %v550_v56 = vpop.eup %549  ;;  %v354_v57 = vmul.f32 %v548_v55, %v616_v8 }
 0x105   : > { %v552_v58 = vpop.eup %551  ;;  %v358_v59 = vmul.f32 %v550_v56, %v618_v11 }
 0x106   : > { %v554_v60 = vpop.eup %553  ;;  %v489_v61 = vpack.c.bf16 %v354_v57, %v354_v57  ;;  %v352_v62 = vmul.f32 %v552_v58, %v620_v12 }
 0x107   : > { %v556_v63 = vpop.eup %555  ;;  %v493_v0 = vpack.c.bf16 %v358_v59, %v358_v59  ;;  %v356_v1 = vmul.f32 %v554_v60, %v623_v16 }
 0x108   : > { %v558_v2 = vpop.eup %557  ;;  %395 = vst.msk [vmem:[%s172_s27 + $0x8] sm:$0xf] %vm392_vm1, %v489_v61  ;;  %v487_v3 = vpack.c.bf16 %v352_v62, %v352_v62  ;;  %v355_v4 = vmul.f32 %v556_v63, %v625_v17 }
 0x109   : > { %v560_v5 = vpop.eup %559  ;;  %399 = vst.msk [vmem:[%s172_s27 + $0x18] sm:$0xf] %vm392_vm1, %v493_v0  ;;  %v491_v6 = vpack.c.bf16 %v356_v1, %v356_v1  ;;  %v359_v7 = vmul.f32 %v558_v2, %v629_v22 }
 0x10a   : > { %v562_v8 = vpop.eup %561  ;;  %393 = vst.msk [vmem:[%s172_s27] sm:$0xf] %vm392_vm1, %v487_v3  ;;  %v490_v9 = vpack.c.bf16 %v355_v4, %v355_v4  ;;  %v353_v10 = vmul.f32 %v560_v5, %v631_v23 }
 0x10b   : > { %397 = vst.msk [vmem:[%s172_s27 + $0x10] sm:$0xf] %vm392_vm1, %v491_v6  ;;  %v494_v11 = vpack.c.bf16 %v359_v7, %v359_v7  ;;  %v357_v12 = vmul.f32 %v562_v8, %v635_v28 }
 0x10c   : > { %396 = vst.msk [vmem:[%s172_s27 + $0xc] sm:$0xf] %vm392_vm1, %v490_v9  ;;  %v488_v13 = vpack.c.bf16 %v353_v10, %v353_v10 }
 0x10d   : > { %400 = vst.msk [vmem:[%s172_s27 + $0x1c] sm:$0xf] %vm392_vm1, %v494_v11  ;;  %v492_v14 = vpack.c.bf16 %v357_v12, %v357_v12 }
 0x10e   : > { %394 = vst.msk [vmem:[%s172_s27 + $0x4] sm:$0xf] %vm392_vm1, %v488_v13 }
 0x10f   : > { %398 = vst.msk [vmem:[%s172_s27 + $0x14] sm:$0xf] %vm392_vm1, %v492_v14 }
 0x110 PF: > { %s13_s12 = sadd.s32 1, %s569_s12  }
 0x111   : > { %p10_p4 = scmp.ge.s32.totalorder %s13_s12, 4  }
 0x113   :  { %12 = sbr.rel (!%p10_p4) target bundleno = 1 (0x1), region = 62 }

// kernel: yolox_forward.17
= control target key start
LH: loop header
LB: loop body
LE: loop exit
PB: predicated region body
PF: predicated region fallthrough
CT: control target
= control target key end

     0   :  { %s692_s12 = smov 0   ;;  %s797_s0 = inlined_call_operand.vmem [shape: bf16[128,144], index: 0, kind: input, shape index: {}]   ;;  %s798_s1 = inlined_call_operand.vmem [shape: bf16[144,32], index: 1, kind: input, shape index: {}]   ;;  %s799_s2 = inlined_call_operand.vmem [shape: f32[1,32], index: 2, kind: input, shape index: {}]   ;;  %s800_s3 = inlined_call_operand.vmem [shape: bf16[128,32], index: 3, kind: output, shape index: {}]  }
   0x1 LB: > { %s532_s13 = sadd.s32 4294967295, %s669_s12   ;;  %p536_p0 = scmp.ge.s32.totalorder %s669_s12, 1  ;;  %s669_s12 = sphi %s692_s12, %s13_s12  }
   0x2   : > { %p139_p1 = scmp.lt.s32.totalorder %s669_s12, 3 }
   0x4   : > { %p140_p2 = pnand %p536_p0, %p139_p1 }
   0x5   : > { %v610_v0 = vld [vmem:[%s798_s1] sm:$0xff] (!%p140_p2)   ;;  %v671_v1 = vmov (!%p140_p2), 0   ;;  %s537_s16 = sshll.u32 (!%p140_p2), %s532_s13, 3  ;;  %v611_v2 = vld [vmem:[%s798_s1 + $0x8] sm:$0xff] (!%p140_p2)   ;;  %v612_v3 = vld [vmem:[%s798_s1 + $0x10] sm:$0xff] (!%p140_p2)   ;;  %vm301_vm0 = vcmask (!%p140_p2), 130048  }
   0x6   : > { %143 = sbr.rel (%p140_p2) target bundleno = 300 (0x12c), region = 32  ;;  %314 = vmatprep.subr.bf16.mxu0 (!%p140_p2), %v671_v1  ;;  %583 = vmatprep.subr.bf16.mxu1 (!%p140_p2), %v671_v1  ;;  %p165_p3 = scmp.lt.s32.totalorder (!%p140_p2), %s537_s16, 15  ;;  %v613_v4 = vld [vmem:[%s798_s1 + $0x18] sm:$0xff] (!%p140_p2)   ;;  %v614_v7 = vld [vmem:[%s798_s1 + $0x20] sm:$0xff] (!%p140_p2)   ;;  %v615_v8 = vld [vmem:[%s798_s1 + $0x28] sm:$0xff] (!%p140_p2)   ;;  %vm467_vm1 = vcmask (!%p140_p2), 257024  }
   0x7   : > { %315 = vmatpush1.bf16.msra.mxu0 (!%p140_p2), %v610_v0  ;;  %592 = vmatpush1.bf16.msra.mxu1 (!%p140_p2), %v610_v0  ;;  %v616_v9 = vld [vmem:[%s798_s1 + $0x30] sm:$0xff] (!%p140_p2)   ;;  %v617_v10 = vld [vmem:[%s798_s1 + $0x38] sm:$0xff] (!%p140_p2)   ;;  %v618_v11 = vld [vmem:[%s798_s1 + $0x40] sm:$0xff] (!%p140_p2)  }
   0x8   : > { %316 = vmatprep.subr.bf16.mxu0 (!%p140_p2), %v671_v1  ;;  %584 = vmatprep.subr.bf16.mxu1 (!%p140_p2), %v671_v1  ;;  %v542_v18 = vld [vmem:[%s799_s2] ss:$0 sm:$0xff] (!%p140_p2) }
   0xb   : > { %317 = vmatpush1.bf16.msra.mxu0 (!%p140_p2), %v611_v2  ;;  %593 = vmatpush1.bf16.msra.mxu1 (!%p140_p2), %v611_v2 }
   0xc   : > { %318 = vmatprep.subr.bf16.mxu0 (!%p140_p2), %v671_v1  ;;  %585 = vmatprep.subr.bf16.mxu1 (!%p140_p2), %v671_v1 }
   0xd   : > { %s802_s16 = smov (!%p165_p3, %s537_s16), 15 }
   0xe   : > { %s574_s21 = sshll.u32 %s802_s16, 3  ;;  %s541_s13 = sshll.u32 %s802_s16, 2 }
   0xf   : > { %s715_s24 = scalar_lea.vmem %s797_s0, %s574_s21  ;;  %319 = vmatpush1.bf16.msra.mxu0 %v612_v3  ;;  %594 = vmatpush1.bf16.msra.mxu1 %v612_v3  ;;  %s175_s17 = scalar_lea.vmem %s800_s3, %s541_s13 }
  0x10   : > { %v621_v5 = vld [vmem:[%s715_s24 + $0x4] ss:$8 sps:$4 sm:$0xff]   ;;  %320 = vmatprep.subr.bf16.mxu0 %v671_v1  ;;  %586 = vmatprep.subr.bf16.mxu1 %v671_v1  ;;  %v619_v12 = vld [vmem:[%s715_s24] ss:$8 sps:$4 sm:$0xff]   ;;  %v625_v14 = vld [vmem:[%s715_s24 + $0x14] ss:$8 sps:$4 sm:$0xff]  }
  0x11   : > { %v624_v6 = vld [vmem:[%s715_s24 + $0x24] ss:$8 sps:$4 sm:$0xff]   ;;  %560 = vmatprep.mubr.msk.bf16.mxu0 %vm301_vm0, %v621_v5  ;;  %v622_v13 = vld [vmem:[%s715_s24 + $0x20] ss:$8 sps:$4 sm:$0xff]   ;;  %v627_v15 = vld [vmem:[%s715_s24 + $0x34] ss:$8 sps:$4 sm:$0xff]  }
  0x12   : > { %562 = vmatprep.mubr.msk.bf16.mxu1 %vm301_vm0, %v624_v6  ;;  %v629_v16 = vld [vmem:[%s715_s24 + $0x10] ss:$8 sps:$4 sm:$0xff]  }
  0x13   : > { %321 = vmatpush1.bf16.msra.mxu0 %v613_v4  ;;  %595 = vmatpush1.bf16.msra.mxu1 %v613_v4  ;;  %v630_v17 = vld [vmem:[%s715_s24 + $0x30] ss:$8 sps:$4 sm:$0xff]  }
  0x14   : > { %322 = vmatprep.subr.bf16.mxu0 %v671_v1  ;;  %587 = vmatprep.subr.bf16.mxu1 %v671_v1 }
  0x17   : > { %323 = vmatpush1.bf16.msra.mxu0 %v614_v7  ;;  %596 = vmatpush1.bf16.msra.mxu1 %v614_v7 }
  0x18   : > { %324 = vmatprep.subr.bf16.mxu0 %v671_v1  ;;  %588 = vmatprep.subr.bf16.mxu1 %v671_v1 }
  0x1b   : > { %325 = vmatpush1.bf16.msra.mxu0 %v615_v8  ;;  %597 = vmatpush1.bf16.msra.mxu1 %v615_v8 }
  0x1c   : > { %326 = vmatprep.subr.bf16.mxu0 %v671_v1  ;;  %589 = vmatprep.subr.bf16.mxu1 %v671_v1 }
  0x1f   : > { %327 = vmatpush1.bf16.msra.mxu0 %v616_v9  ;;  %598 = vmatpush1.bf16.msra.mxu1 %v616_v9 }
  0x20   : > { %328 = vmatprep.subr.bf16.mxu0 %v671_v1  ;;  %590 = vmatprep.subr.bf16.mxu1 %v671_v1 }
  0x23   : > { %329 = vmatpush1.bf16.msra.mxu0 %v617_v10  ;;  %599 = vmatpush1.bf16.msra.mxu1 %v617_v10 }
  0x24   : > { %330 = vmatprep.subr.bf16.mxu0 %v671_v1  ;;  %591 = vmatprep.subr.bf16.mxu1 %v671_v1 }
  0x27   : > { %331 = vmatpush1.bf16.msra.mxu0 %v618_v11  ;;  %600 = vmatpush1.bf16.msra.mxu1 %v618_v11 }
  0x2a   : > { %347 = vmatmul.mubr.bf16.vlgmr.msra.gmra.mrb[0].mxu0 %v619_v12  ;;  %363 = vmatmul.mubr.bf16.vlgmr.msra.gmra.mrb[0].mxu1 %v622_v13 }
  0x2b   : > { %561 = vmatprep.mubr.msk.bf16.mxu0 %vm301_vm0, %v625_v14  ;;  %563 = vmatprep.mubr.msk.bf16.mxu1 %vm301_vm0, %v627_v15 }
  0x32   : > { %355 = vmatmul.mubr.bf16.gmra.mrb[4].mxu0 %v629_v16  ;;  %371 = vmatmul.mubr.bf16.gmra.mrb[4].mxu1 %v630_v17 }
  0xfd   : > { %v348_v19 = vpop.f32.mrb[0].mxu0  ;;  %v364_v20 = vpop.f32.mrb[0].mxu1 }
  0xfe   : > { %v750_v21 = vadd.f32 %v542_v18, %v348_v19  ;;  %v752_v22 = vadd.f32 %v542_v18, %v364_v20  ;;  %v350_v23 = vpop.f32.mrb[1].mxu0  ;;  %v366_v24 = vpop.f32.mrb[1].mxu1 }
  0xff   : > { %v351_v25 = vpop.f32.mrb[2].mxu0  ;;  %v367_v26 = vpop.f32.mrb[2].mxu1 }
 0x100   : > { %v379_v27 = vsub.f32 0.0, %v750_v21  ;;  %v383_v28 = vsub.f32 0.0, %v752_v22  ;;  %v756_v29 = vadd.f32 %v542_v18, %v351_v25  ;;  %v758_v30 = vadd.f32 %v542_v18, %v367_v26  ;;  %v353_v31 = vpop.f32.mrb[3].mxu0  ;;  %v369_v32 = vpop.f32.mrb[3].mxu1 }
 0x102   : > { %v387_v33 = vmul.f32 1.442695, %v379_v27  ;;  %v395_v34 = vmul.f32 1.442695, %v383_v28  ;;  %v380_v35 = vsub.f32 0.0, %v756_v29  ;;  %v384_v36 = vsub.f32 0.0, %v758_v30 }
 0x104   : > { %631 = vpow2.f32 %v387_v33  ;;  %v389_v37 = vmul.f32 1.442695, %v380_v35  ;;  %v397_v38 = vmul.f32 1.442695, %v384_v36 }
 0x105   : > { %633 = vpow2.f32 %v395_v34  ;;  %v356_v39 = vpop.f32.mrb[4].mxu0  ;;  %v372_v40 = vpop.f32.mrb[4].mxu1 }
 0x106   : > { %635 = vpow2.f32 %v389_v37  ;;  %v762_v41 = vadd.f32 %v542_v18, %v356_v39  ;;  %v764_v42 = vadd.f32 %v542_v18, %v372_v40  ;;  %v358_v43 = vpop.f32.mrb[5].mxu0  ;;  %v374_v44 = vpop.f32.mrb[5].mxu1 }
 0x107   : > { %637 = vpow2.f32 %v397_v38  ;;  %v359_v45 = vpop.f32.mrb[6].mxu0  ;;  %v375_v46 = vpop.f32.mrb[6].mxu1 }
 0x108   : > { %v381_v47 = vsub.f32 0.0, %v762_v41  ;;  %v385_v48 = vsub.f32 0.0, %v764_v42  ;;  %v768_v49 = vadd.f32 %v542_v18, %v359_v45  ;;  %v770_v50 = vadd.f32 %v542_v18, %v375_v46  ;;  %v361_v51 = vpop.f32.mrb[7].mxu0  ;;  %v377_v52 = vpop.f32.mrb[7].mxu1 }
 0x10a   : > { %v391_v53 = vmul.f32 1.442695, %v381_v47  ;;  %v399_v54 = vmul.f32 1.442695, %v385_v48  ;;  %v382_v55 = vsub.f32 0.0, %v768_v49  ;;  %v386_v56 = vsub.f32 0.0, %v770_v50 }
 0x10c   : > { %639 = vpow2.f32 %v391_v53  ;;  %v393_v57 = vmul.f32 1.442695, %v382_v55  ;;  %v401_v58 = vmul.f32 1.442695, %v386_v56 }
 0x10d   : > { %641 = vpow2.f32 %v399_v54 }
 0x10e   : > { %v632_v59 = vpop.eup %631  ;;  %643 = vpow2.f32 %v393_v57 }
 0x10f   : > { %v634_v60 = vpop.eup %633  ;;  %v403_v61 = vadd.f32 1.0, %v632_v59  ;;  %645 = vpow2.f32 %v401_v58 }
 0x110   : > { %v636_v62 = vpop.eup %635  ;;  %v407_v63 = vadd.f32 1.0, %v634_v60 }
 0x111   : > { %v638_v0 = vpop.eup %637  ;;  %647 = vrcp.f32 %v403_v61  ;;  %v404_v1 = vadd.f32 1.0, %v636_v62 }
 0x112   : > { %649 = vrcp.f32 %v407_v63  ;;  %v408_v2 = vadd.f32 1.0, %v638_v0 }
 0x113   : > { %651 = vrcp.f32 %v404_v1 }
 0x114   : > { %653 = vrcp.f32 %v408_v2 }
 0x116   : > { %v640_v3 = vpop.eup %639 }
 0x117   : > { %v642_v4 = vpop.eup %641  ;;  %v405_v5 = vadd.f32 1.0, %v640_v3 }
 0x118   : > { %v644_v6 = vpop.eup %643  ;;  %v409_v7 = vadd.f32 1.0, %v642_v4 }
 0x119   : > { %v646_v8 = vpop.eup %645  ;;  %655 = vrcp.f32 %v405_v5  ;;  %v406_v9 = vadd.f32 1.0, %v644_v6 }
 0x11a   : > { %657 = vrcp.f32 %v409_v7  ;;  %v410_v10 = vadd.f32 1.0, %v646_v8 }
 0x11b   : > { %v648_v11 = vpop.eup %647  ;;  %659 = vrcp.f32 %v406_v9 }
 0x11c   : > { %v650_v12 = vpop.eup %649  ;;  %v427_v13 = vmul.f32 %v648_v11, %v750_v21  ;;  %661 = vrcp.f32 %v410_v10 }
 0x11d   : > { %v652_v14 = vpop.eup %651  ;;  %v431_v15 = vmul.f32 %v650_v12, %v752_v22 }
 0x11e   : > { %v654_v16 = vpop.eup %653  ;;  %v575_v17 = vpack.c.bf16 %v427_v13, %v427_v13  ;;  %v428_v18 = vmul.f32 %v652_v14, %v756_v29 }
 0x11f   : > { %v579_v19 = vpack.c.bf16 %v431_v15, %v431_v15  ;;  %v432_v20 = vmul.f32 %v654_v16, %v758_v30 }
 0x120   : > { %468 = vst.msk [vmem:[%s175_s17] sm:$0xf] %vm467_vm1, %v575_v17  ;;  %v576_v23 = vpack.c.bf16 %v428_v18, %v428_v18 }
 0x121   : > { %472 = vst.msk [vmem:[%s175_s17 + $0x10] sm:$0xf] %vm467_vm1, %v579_v19  ;;  %v580_v21 = vpack.c.bf16 %v432_v20, %v432_v20 }
 0x122   : > { %469 = vst.msk [vmem:[%s175_s17 + $0x4] sm:$0xf] %vm467_vm1, %v576_v23 }
 0x123   : > { %v656_v24 = vpop.eup %655  ;;  %473 = vst.msk [vmem:[%s175_s17 + $0x14] sm:$0xf] %vm467_vm1, %v580_v21 }
 0x124   : > { %v658_v25 = vpop.eup %657  ;;  %v429_v22 = vmul.f32 %v656_v24, %v762_v41 }
 0x125   : > { %v660_v26 = vpop.eup %659  ;;  %v433_v27 = vmul.f32 %v658_v25, %v764_v42 }
 0x126   : > { %v662_v28 = vpop.eup %661  ;;  %v577_v29 = vpack.c.bf16 %v429_v22, %v429_v22  ;;  %v430_v30 = vmul.f32 %v660_v26, %v768_v49 }
 0x127   : > { %v581_v31 = vpack.c.bf16 %v433_v27, %v433_v27  ;;  %v434_v32 = vmul.f32 %v662_v28, %v770_v50 }
 0x128   : > { %470 = vst.msk [vmem:[%s175_s17 + $0x8] sm:$0xf] %vm467_vm1, %v577_v29  ;;  %v578_v33 = vpack.c.bf16 %v430_v30, %v430_v30 }
 0x129   : > { %474 = vst.msk [vmem:[%s175_s17 + $0x18] sm:$0xf] %vm467_vm1, %v581_v31  ;;  %v582_v34 = vpack.c.bf16 %v434_v32, %v434_v32 }
 0x12a   : > { %471 = vst.msk [vmem:[%s175_s17 + $0xc] sm:$0xf] %vm467_vm1, %v578_v33 }
 0x12b   : > { %475 = vst.msk [vmem:[%s175_s17 + $0x1c] sm:$0xf] %vm467_vm1, %v582_v34 }
 0x12c PF: > { %s13_s12 = sadd.s32 1, %s669_s12  }
 0x12d   : > { %p10_p4 = scmp.ge.s32.totalorder %s13_s12, 4  }
 0x12f   :  { %12 = sbr.rel (!%p10_p4) target bundleno = 1 (0x1), region = 62 }

// kernel: yolox_forward.24
= control target key start
LH: loop header
LB: loop body
LE: loop exit
PB: predicated region body
PF: predicated region fallthrough
CT: control target
= control target key end

     0   :  { %s940_s12 = smov 0   ;;  %s1082_s0 = inlined_call_operand.vmem [shape: bf16[128,288], index: 0, kind: input, shape index: {}]   ;;  %s1083_s1 = inlined_call_operand.vmem [shape: bf16[288,64], index: 1, kind: input, shape index: {}]   ;;  %s1084_s2 = inlined_call_operand.vmem [shape: f32[1,64], index: 2, kind: input, shape index: {}]   ;;  %s1085_s3 = inlined_call_operand.vmem [shape: bf16[128,64], index: 3, kind: output, shape index: {}]  }
   0x1 LB: > { %s701_s13 = sadd.s32 4294967295, %s918_s12   ;;  %p705_p0 = scmp.ge.s32.totalorder %s918_s12, 1  ;;  %s918_s12 = sphi %s940_s12, %s13_s12  }
   0x2   : > { %p139_p1 = scmp.lt.s32.totalorder %s918_s12, 3 }
   0x4   : > { %p140_p2 = pnand %p705_p0, %p139_p1 }
   0x5   : > { %v846_v0 = vld [vmem:[%s1083_s1 + $0x40] sm:$0xff] (!%p140_p2)   ;;  %s706_s16 = sshll.u32 (!%p140_p2), %s701_s13, 3  ;;  %v848_v2 = vld [vmem:[%s1083_s1 + $0x48] sm:$0xff] (!%p140_p2)   ;;  %v850_v4 = vld [vmem:[%s1083_s1 + $0x50] sm:$0xff] (!%p140_p2)   ;;  %vm405_vm0 = vcmask (!%p140_p2), 261120   ;;  %vm636_vm1 = vcmask (!%p140_p2), 519168  }
   0x6   : > { %143 = sbr.rel (%p140_p2) target bundleno = 308 (0x134), region = 32  ;;  %v847_v1 = vld [vmem:[%s1083_s1] sm:$0xff] (!%p140_p2)   ;;  %763 = vmatprep.subr.bf16.mxu0 (!%p140_p2), %v846_v0  ;;  %821 = vmatprep.subr.bf16.mxu1 (!%p140_p2), %v846_v0  ;;  %p165_p3 = scmp.lt.s32.totalorder (!%p140_p2), %s706_s16, 15  ;;  %v849_v3 = vld [vmem:[%s1083_s1 + $0x8] sm:$0xff] (!%p140_p2)   ;;  %v851_v5 = vld [vmem:[%s1083_s1 + $0x10] sm:$0xff] (!%p140_p2)  }
   0x7   : > { %764 = vmatpush3.bf16.msra.mxu0 (!%p140_p2), %v847_v1  ;;  %829 = vmatpush3.bf16.msra.mxu1 (!%p140_p2), %v847_v1  ;;  %v852_v6 = vld [vmem:[%s1083_s1 + $0x58] sm:$0xff] (!%p140_p2)   ;;  %v854_v8 = vld [vmem:[%s1083_s1 + $0x60] sm:$0xff] (!%p140_p2)   ;;  %v856_v10 = vld [vmem:[%s1083_s1 + $0x68] sm:$0xff] (!%p140_p2)  }
   0x8   : > { %765 = vmatprep.subr.bf16.mxu0 (!%p140_p2), %v848_v2  ;;  %822 = vmatprep.subr.bf16.mxu1 (!%p140_p2), %v848_v2  ;;  %v853_v7 = vld [vmem:[%s1083_s1 + $0x18] sm:$0xff] (!%p140_p2)   ;;  %v855_v9 = vld [vmem:[%s1083_s1 + $0x20] sm:$0xff] (!%p140_p2)   ;;  %v857_v13 = vld [vmem:[%s1083_s1 + $0x28] sm:$0xff] (!%p140_p2)  }
   0x9   : > { %v858_v14 = vld [vmem:[%s1083_s1 + $0x70] sm:$0xff] (!%p140_p2)   ;;  %v860_v16 = vld [vmem:[%s1083_s1 + $0x78] sm:$0xff] (!%p140_p2)   ;;  %v868_v18 = vld [vmem:[%s1083_s1 + $0x80] sm:$0xff] (!%p140_p2)  }
   0xa   : > { %v859_v15 = vld [vmem:[%s1083_s1 + $0x30] sm:$0xff] (!%p140_p2)   ;;  %v861_v17 = vld [vmem:[%s1083_s1 + $0x38] sm:$0xff] (!%p140_p2)   ;;  %v869_v22 = vld [vmem:[%s1083_s1 + $0x88] sm:$0xff] (!%p140_p2)  }
   0xb   : > { %766 = vmatpush3.bf16.msra.mxu0 (!%p140_p2), %v849_v3  ;;  %830 = vmatpush3.bf16.msra.mxu1 (!%p140_p2), %v849_v3  ;;  %v710_v42 = vld [vmem:[%s1084_s2] ss:$0 sm:$0xff] (!%p140_p2) }
   0xc   : > { %767 = vmatprep.subr.bf16.mxu0 (!%p140_p2), %v850_v4  ;;  %823 = vmatprep.subr.bf16.mxu1 (!%p140_p2), %v850_v4 }
   0xd   : > { %s1087_s16 = smov (!%p165_p3, %s706_s16), 15 }
   0xe   : > { %s837_s29 = smul.u32 12, %s1087_s16  ;;  %s709_s5 = sshll.u32 %s1087_s16, 2 }
   0xf   : > { %768 = vmatpush3.bf16.msra.mxu0 %v851_v5  ;;  %831 = vmatpush3.bf16.msra.mxu1 %v851_v5  ;;  %s1055_s8 = scalar_lea.vmem %s1085_s3, %s709_s5 }
  0x10   : > { %769 = vmatprep.subr.bf16.mxu0 %v852_v6  ;;  %824 = vmatprep.subr.bf16.mxu1 %v852_v6  ;;  %s981_s9 = scalar_lea.vmem %s1082_s0, %s837_s29 }
  0x11   : > { %v864_v11 = vld [vmem:[%s981_s9 + $0x4] ss:$12 sps:$4 sm:$0xff]   ;;  %v867_v12 = vld [vmem:[%s981_s9 + $0x4c] ss:$12 sps:$4 sm:$0xff]   ;;  %v865_v20 = vld [vmem:[%s981_s9 + $0x48] ss:$12 sps:$4 sm:$0xff]  }
  0x12   : > { %450 = vmatprep.mubr.bf16.mxu0 %v864_v11  ;;  %474 = vmatprep.mubr.bf16.mxu1 %v867_v12  ;;  %v862_v19 = vld [vmem:[%s981_s9] ss:$12 sps:$4 sm:$0xff]   ;;  %v870_v21 = vld [vmem:[%s981_s9 + $0x1c] ss:$12 sps:$4 sm:$0xff]   ;;  %v873_v24 = vld [vmem:[%s981_s9 + $0x18] ss:$12 sps:$4 sm:$0xff]  }
  0x13   : > { %770 = vmatpush3.bf16.msra.mxu0 %v853_v7  ;;  %832 = vmatpush3.bf16.msra.mxu1 %v853_v7  ;;  %v872_v23 = vld [vmem:[%s981_s9 + $0x8] ss:$12 sps:$4 sm:$0xff]   ;;  %v874_v25 = vld [vmem:[%s981_s9 + $0x20] ss:$12 sps:$4 sm:$0xff]   ;;  %v877_v27 = vld [vmem:[%s981_s9 + $0x38] ss:$12 sps:$4 sm:$0xff]  }
  0x14   : > { %771 = vmatprep.subr.bf16.mxu0 %v854_v8  ;;  %825 = vmatprep.subr.bf16.mxu1 %v854_v8  ;;  %v875_v26 = vld [vmem:[%s981_s9 + $0x34] ss:$12 sps:$4 sm:$0xff]   ;;  %v878_v28 = vld [vmem:[%s981_s9 + $0x30] ss:$12 sps:$4 sm:$0xff]  }
  0x15   : > { %v879_v29 = vld [vmem:[%s981_s9 + $0x50] ss:$12 sps:$4 sm:$0xff]  }
  0x17   : > { %772 = vmatpush3.bf16.msra.mxu0 %v855_v9  ;;  %833 = vmatpush3.bf16.msra.mxu1 %v855_v9 }
  0x18   : > { %773 = vmatprep.subr.bf16.mxu0 %v856_v10  ;;  %826 = vmatprep.subr.bf16.mxu1 %v856_v10 }
  0x1b   : > { %774 = vmatpush3.bf16.msra.mxu0 %v857_v13  ;;  %834 = vmatpush3.bf16.msra.mxu1 %v857_v13 }
  0x1c   : > { %775 = vmatprep.subr.bf16.mxu0 %v858_v14  ;;  %827 = vmatprep.subr.bf16.mxu1 %v858_v14 }
  0x1f   : > { %776 = vmatpush3.bf16.msra.mxu0 %v859_v15  ;;  %835 = vmatpush3.bf16.msra.mxu1 %v859_v15 }
  0x20   : > { %777 = vmatprep.subr.bf16.mxu0 %v860_v16  ;;  %828 = vmatprep.subr.bf16.mxu1 %v860_v16 }
  0x23   : > { %778 = vmatpush3.bf16.msra.mxu0 %v861_v17  ;;  %836 = vmatpush3.bf16.msra.mxu1 %v861_v17 }
  0x24   : > { %809 = vmatprep.subr.bf16.mxu1 %v868_v18 }
  0x26   : > { %451 = vmatmul.mubr.bf16.vlgmr.msra.gmra.mrb[0].mxu0 %v862_v19  ;;  %475 = vmatmul.mubr.bf16.vlgmr.msra.gmra.mrb[0].mxu1 %v865_v20 }
  0x27   : > { %810 = vmatpush3.bf16.msra.mxu1 %v868_v18  ;;  %458 = vmatprep.mubr.bf16.mxu0 %v870_v21 }
  0x28   : > { %811 = vmatprep.subr.bf16.mxu1 %v869_v22  ;;  %813 = vmatprep.mubr.msk.bf16.mxu1 %vm405_vm0, %v872_v23 }
  0x2b   : > { %812 = vmatpush3.bf16.msra.mxu1 %v869_v22 }
  0x2e   : > { %459 = vmatmul.mubr.bf16.gmra.mrb[4].mxu0 %v873_v24  ;;  %814 = vmatmul.mubr.msk.bf16.vlgmr.msra.gmra.mrb[4].mxu1 %vm405_vm0, %v874_v25 }
  0x2f   : > { %466 = vmatprep.mubr.bf16.mxu0 %v875_v26  ;;  %817 = vmatprep.mubr.msk.bf16.mxu1 %vm405_vm0, %v877_v27 }
  0x36   : > { %467 = vmatmul.mubr.bf16.gmra.mrb[8].mxu0 %v878_v28  ;;  %818 = vmatmul.mubr.msk.bf16.gmra.mrb[8].mxu1 %vm405_vm0, %v879_v29 }
  0xf9   : > { %v779_v30 = vpop.f32.mrb[0].mxu0  ;;  %v797_v31 = vpop.f32.mrb[0].mxu1 }
  0xfa   : > { %v780_v32 = vpop.f32.mrb[1].mxu0  ;;  %v798_v33 = vpop.f32.mrb[1].mxu1 }
  0xfb   : > { %v781_v34 = vadd.f32 %v780_v32, %v779_v30  ;;  %v782_v35 = vpop.f32.mrb[2].mxu0  ;;  %v799_v36 = vadd.f32 %v798_v33, %v797_v31  ;;  %v800_v37 = vpop.f32.mrb[2].mxu1 }
  0xfc   : > { %v783_v38 = vpop.f32.mrb[3].mxu0  ;;  %v801_v39 = vpop.f32.mrb[3].mxu1 }
  0xfd   : > { %v784_v40 = vadd.f32 %v783_v38, %v782_v35  ;;  %v802_v41 = vadd.f32 %v801_v39, %v800_v37  ;;  %v453_v45 = vadd.f32 %v781_v34, %v710_v42  ;;  %v477_v63 = vadd.f32 %v799_v36, %v710_v42 }
  0xff   : > { %v456_v52 = vadd.f32 %v784_v40, %v710_v42  ;;  %v480_v8 = vadd.f32 %v802_v41, %v710_v42 }
 0x101   : > { %v785_v43 = vpop.f32.mrb[4].mxu0  ;;  %v815_v44 = vpop.f32.mrb[4].mxu1 }
 0x102   : > { %v786_v46 = vpop.f32.mrb[5].mxu0  ;;  %v517_v47 = vpop.f32.mrb[5].mxu1 }
 0x103   : > { %v787_v48 = vadd.f32 %v786_v46, %v785_v43  ;;  %v1029_v49 = vadd.f32 %v517_v47, %v453_v45  ;;  %v788_v50 = vpop.f32.mrb[6].mxu0  ;;  %v816_v51 = vpop.f32.mrb[6].mxu1 }
 0x104   : > { %v789_v53 = vpop.f32.mrb[7].mxu0  ;;  %v520_v54 = vpop.f32.mrb[7].mxu1 }
 0x105   : > { %v461_v55 = vadd.f32 %v787_v48, %v710_v42  ;;  %v548_v56 = vsub.f32 0.0, %v1029_v49  ;;  %v790_v57 = vadd.f32 %v789_v53, %v788_v50  ;;  %v1032_v58 = vadd.f32 %v520_v54, %v456_v52 }
 0x107   : > { %v1034_v59 = vadd.f32 %v815_v44, %v461_v55  ;;  %v556_v60 = vmul.f32 1.442695, %v548_v56  ;;  %v464_v61 = vadd.f32 %v790_v57, %v710_v42  ;;  %v549_v62 = vsub.f32 0.0, %v1032_v58 }
 0x109   : > { %v550_v0 = vsub.f32 0.0, %v1034_v59  ;;  %880 = vpow2.f32 %v556_v60  ;;  %v1038_v1 = vadd.f32 %v816_v51, %v464_v61  ;;  %v558_v2 = vmul.f32 1.442695, %v549_v62  ;;  %v791_v3 = vpop.f32.mrb[8].mxu0  ;;  %v819_v4 = vpop.f32.mrb[8].mxu1 }
 0x10a   : > { %v1040_v5 = vadd.f32 %v819_v4, %v477_v63  ;;  %v792_v6 = vpop.f32.mrb[9].mxu0  ;;  %v533_v7 = vpop.f32.mrb[9].mxu1 }
 0x10b   : > { %v560_v9 = vmul.f32 1.442695, %v550_v0  ;;  %v551_v10 = vsub.f32 0.0, %v1038_v1  ;;  %882 = vpow2.f32 %v558_v2  ;;  %v793_v11 = vadd.f32 %v792_v6, %v791_v3  ;;  %v794_v12 = vpop.f32.mrb[10].mxu0  ;;  %v820_v13 = vpop.f32.mrb[10].mxu1 }
 0x10c   : > { %v554_v14 = vsub.f32 0.0, %v1040_v5  ;;  %v1044_v15 = vadd.f32 %v820_v13, %v480_v8  ;;  %v795_v16 = vpop.f32.mrb[11].mxu0  ;;  %v536_v17 = vpop.f32.mrb[11].mxu1 }
 0x10d   : > { %884 = vpow2.f32 %v560_v9  ;;  %v562_v18 = vmul.f32 1.442695, %v551_v10  ;;  %v469_v19 = vadd.f32 %v793_v11, %v710_v42  ;;  %v796_v20 = vadd.f32 %v795_v16, %v794_v12 }
 0x10e   : > { %v568_v21 = vmul.f32 1.442695, %v554_v14  ;;  %v555_v22 = vsub.f32 0.0, %v1044_v15 }
 0x10f   : > { %886 = vpow2.f32 %v562_v18  ;;  %v1047_v23 = vadd.f32 %v533_v7, %v469_v19  ;;  %v472_v24 = vadd.f32 %v796_v20, %v710_v42 }
 0x110   : > { %888 = vpow2.f32 %v568_v21  ;;  %v570_v25 = vmul.f32 1.442695, %v555_v22 }
 0x111   : > { %v552_v26 = vsub.f32 0.0, %v1047_v23  ;;  %v537_v27 = vadd.f32 %v536_v17, %v472_v24 }
 0x112   : > { %890 = vpow2.f32 %v570_v25 }
 0x113   : > { %v881_v28 = vpop.eup %880  ;;  %v564_v29 = vmul.f32 1.442695, %v552_v26  ;;  %v553_v30 = vsub.f32 0.0, %v537_v27 }
 0x114   : > { %v572_v31 = vadd.f32 1.0, %v881_v28 }
 0x115   : > { %v883_v32 = vpop.eup %882  ;;  %892 = vpow2.f32 %v564_v29  ;;  %v566_v33 = vmul.f32 1.442695, %v553_v30 }
 0x116   : > { %894 = vrcp.f32 %v572_v31  ;;  %v573_v34 = vadd.f32 1.0, %v883_v32 }
 0x117   : > { %v885_v35 = vpop.eup %884  ;;  %896 = vpow2.f32 %v566_v33 }
 0x118   : > { %v574_v36 = vadd.f32 1.0, %v885_v35  ;;  %898 = vrcp.f32 %v573_v34 }
 0x119   : > { %v887_v37 = vpop.eup %886 }
 0x11a   : > { %v889_v38 = vpop.eup %888  ;;  %900 = vrcp.f32 %v574_v36  ;;  %v575_v39 = vadd.f32 1.0, %v887_v37 }
 0x11b   : > { %v578_v40 = vadd.f32 1.0, %v889_v38 }
 0x11c   : > { %v891_v41 = vpop.eup %890  ;;  %902 = vrcp.f32 %v575_v39 }
 0x11d   : > { %904 = vrcp.f32 %v578_v40  ;;  %v579_v42 = vadd.f32 1.0, %v891_v41 }
 0x11f   : > { %v893_v43 = vpop.eup %892  ;;  %906 = vrcp.f32 %v579_v42 }
 0x120   : > { %v895_v44 = vpop.eup %894  ;;  %v576_v45 = vadd.f32 1.0, %v893_v43 }
 0x121   : > { %v897_v46 = vpop.eup %896  ;;  %v596_v47 = vmul.f32 %v895_v44, %v1029_v49 }
 0x122   : > { %v899_v48 = vpop.eup %898  ;;  %908 = vrcp.f32 %v576_v45  ;;  %v577_v50 = vadd.f32 1.0, %v897_v46 }
 0x123   : > { %v755_v51 = vpack.c.bf16 %v596_v47, %v596_v47  ;;  %v597_v52 = vmul.f32 %v899_v48, %v1032_v58 }
 0x124   : > { %v901_v53 = vpop.eup %900  ;;  %910 = vrcp.f32 %v577_v50 }
 0x125   : > { %v598_v49 = vmul.f32 %v901_v53, %v1034_v59  ;;  %637 = vst.msk [vmem:[%s1055_s8] sm:$0xf] %vm636_vm1, %v755_v51  ;;  %v756_v54 = vpack.c.bf16 %v597_v52, %v597_v52 }
 0x126   : > { %v903_v55 = vpop.eup %902 }
 0x127   : > { %v905_v56 = vpop.eup %904  ;;  %v757_v57 = vpack.c.bf16 %v598_v49, %v598_v49  ;;  %v599_v60 = vmul.f32 %v903_v55, %v1038_v1  ;;  %638 = vst.msk [vmem:[%s1055_s8 + $0x4] sm:$0xf] %vm636_vm1, %v756_v54 }
 0x128   : > { %v602_v58 = vmul.f32 %v905_v56, %v1040_v5 }
 0x129   : > { %v907_v61 = vpop.eup %906  ;;  %639 = vst.msk [vmem:[%s1055_s8 + $0x8] sm:$0xf] %vm636_vm1, %v757_v57  ;;  %v758_v59 = vpack.c.bf16 %v599_v60, %v599_v60 }
 0x12a   : > { %v761_v62 = vpack.c.bf16 %v602_v58, %v602_v58  ;;  %v603_v63 = vmul.f32 %v907_v61, %v1044_v15 }
 0x12b   : > { %640 = vst.msk [vmem:[%s1055_s8 + $0xc] sm:$0xf] %vm636_vm1, %v758_v59 }
 0x12c   : > { %v909_v0 = vpop.eup %908  ;;  %643 = vst.msk [vmem:[%s1055_s8 + $0x18] sm:$0xf] %vm636_vm1, %v761_v62  ;;  %v762_v2 = vpack.c.bf16 %v603_v63, %v603_v63 }
 0x12d   : > { %v600_v1 = vmul.f32 %v909_v0, %v1047_v23 }
 0x12e   : > { %v911_v3 = vpop.eup %910  ;;  %644 = vst.msk [vmem:[%s1055_s8 + $0x1c] sm:$0xf] %vm636_vm1, %v762_v2 }
 0x12f   : > { %v759_v4 = vpack.c.bf16 %v600_v1, %v600_v1  ;;  %v601_v5 = vmul.f32 %v911_v3, %v537_v27 }
 0x131   : > { %641 = vst.msk [vmem:[%s1055_s8 + $0x10] sm:$0xf] %vm636_vm1, %v759_v4  ;;  %v760_v6 = vpack.c.bf16 %v601_v5, %v601_v5 }
 0x133   : > { %642 = vst.msk [vmem:[%s1055_s8 + $0x14] sm:$0xf] %vm636_vm1, %v760_v6 }
 0x134 PF: > { %s13_s12 = sadd.s32 1, %s918_s12  }
 0x135   : > { %p10_p4 = scmp.ge.s32.totalorder %s13_s12, 4  }
 0x137   :  { %12 = sbr.rel (!%p10_p4) target bundleno = 1 (0x1), region = 62 }

// kernel: yolox_forward.25
= control target key start
LH: loop header
LB: loop body
LE: loop exit
PB: predicated region body
PF: predicated region fallthrough
CT: control target
= control target key end

     0   :  { %s715_s15 = smov 0   ;;  %s828_s0 = inlined_call_operand.vmem [shape: bf16[128,64], index: 0, kind: input, shape index: {}]   ;;  %s829_s1 = inlined_call_operand.vmem [shape: bf16[64,8], index: 1, kind: input, shape index: {}]   ;;  %s830_s2 = inlined_call_operand.vmem [shape: f32[1,8], index: 2, kind: input, shape index: {}]   ;;  %s831_s3 = inlined_call_operand.vmem [shape: f32[128,2], index: 3, kind: input, shape index: {}]   ;;  %s832_s4 = inlined_call_operand.vmem [shape: f32[128,8], index: 4, kind: output, shape index: {}]  }
   0x1 LB: > { %s560_s16 = sadd.s32 4294967295, %s688_s15   ;;  %p564_p0 = scmp.ge.s32.totalorder %s688_s15, 1  ;;  %s688_s15 = sphi %s715_s15, %s14_s15  }
   0x2   : > { %p174_p1 = scmp.lt.s32.totalorder %s688_s15, 3 }
   0x4   : > { %p175_p2 = pnand %p564_p0, %p174_p1 }
   0x5   : > { %v626_v0 = vld [vmem:[%s829_s1] sm:$0xff] (!%p175_p2)   ;;  %s565_s19 = sshll.u32 (!%p175_p2), %s560_s16, 3  ;;  %v627_v1 = vld [vmem:[%s829_s1 + $0x8] sm:$0xff] (!%p175_p2)   ;;  %v628_v2 = vld [vmem:[%s829_s1 + $0x10] sm:$0xff] (!%p175_p2)   ;;  %vm291_vm0 = vcmask (!%p175_p2), 523264   ;;  %vm465_vm1 = vcmask (!%p175_p2), 15360  }
   0x6   : > { %178 = sbr.rel (%p175_p2) target bundleno = 280 (0x118), region = 36  ;;  %p206_p3 = scmp.lt.s32.totalorder (!%p175_p2), %s565_s19, 15  ;;  %594 = vmatprep.subr.bf16.mxu0 (!%p175_p2), %v626_v0  ;;  %610 = vmatprep.subr.bf16.mxu1 (!%p175_p2), %v626_v0  ;;  %v629_v3 = vld [vmem:[%s829_s1 + $0x18] sm:$0xff] (!%p175_p2)   ;;  %v754_v8 = vld [vmem:[%s830_s2] ss:$0 sm:$0xff] (!%p175_p2)  ;;  %vm474_vm2 = vcmask (!%p175_p2), 31760  }
   0x7   : > { %595 = vmatpush3.bf16.msra.mxu0 (!%p175_p2), %v626_v0  ;;  %614 = vmatpush3.bf16.msra.mxu1 (!%p175_p2), %v626_v0  ;;  %vm483_vm3 = vcmask (!%p175_p2), 64544  }
   0x8   : > { %596 = vmatprep.subr.bf16.mxu0 (!%p175_p2), %v627_v1  ;;  %611 = vmatprep.subr.bf16.mxu1 (!%p175_p2), %v627_v1 }
   0xb   : > { %597 = vmatpush3.bf16.msra.mxu0 (!%p175_p2), %v627_v1  ;;  %615 = vmatpush3.bf16.msra.mxu1 (!%p175_p2), %v627_v1 }
   0xc   : > { %598 = vmatprep.subr.bf16.mxu0 (!%p175_p2), %v628_v2  ;;  %612 = vmatprep.subr.bf16.mxu1 (!%p175_p2), %v628_v2 }
   0xd   : > { %s834_s19 = smov (!%p206_p3, %s565_s19), 15 }
   0xe   : > { %s566_s24 = sshll.u32 %s834_s19, 2  ;;  %s568_s30 = sshll.u32 %s834_s19, 3 }
   0xf   : > { %s209_s29 = scalar_lea.vmem %s828_s0, %s566_s24  ;;  %599 = vmatpush3.bf16.msra.mxu0 %v628_v2  ;;  %616 = vmatpush3.bf16.msra.mxu1 %v628_v2  ;;  %s749_s7 = scalar_lea.vmem %s831_s3, %s568_s30 }
  0x10   : > { %v630_v4 = vld [vmem:[%s209_s29] sm:$0xff]   ;;  %v631_v5 = vld [vmem:[%s209_s29 + $0x10] sm:$0xff]   ;;  %600 = vmatprep.subr.bf16.mxu0 %v629_v3  ;;  %613 = vmatprep.subr.bf16.mxu1 %v629_v3  ;;  %v632_v6 = vld [vmem:[%s209_s29 + $0x8] sm:$0xff]   ;;  %s766_s12 = scalar_lea.vmem %s832_s4, %s568_s30 }
  0x11   : > { %602 = vmatprep.mubr.msk.bf16.mxu0 %vm291_vm0, %v630_v4  ;;  %606 = vmatprep.mubr.msk.bf16.mxu1 %vm291_vm0, %v631_v5  ;;  %v633_v7 = vld [vmem:[%s209_s29 + $0x18] sm:$0xff]   ;;  %v371_v10 = vld [vmem:[%s749_s7 + $0x10] sm:$0xff]  ;;  %v369_v16 = vld [vmem:[%s749_s7] sm:$0xff] }
  0x12   : > { %v375_v12 = vld [vmem:[%s749_s7 + $0x30] sm:$0xff]  ;;  %v373_v32 = vld [vmem:[%s749_s7 + $0x20] sm:$0xff]  ;;  %v372_v42 = vld [vmem:[%s749_s7 + $0x18] sm:$0xff] }
  0x13   : > { %601 = vmatpush3.bf16.msra.mxu0 %v629_v3  ;;  %617 = vmatpush3.bf16.msra.mxu1 %v629_v3  ;;  %v376_v46 = vld [vmem:[%s749_s7 + $0x38] sm:$0xff]  ;;  %v370_v50 = vld [vmem:[%s749_s7 + $0x8] sm:$0xff] }
  0x14   : > { %v374_v63 = vld [vmem:[%s749_s7 + $0x28] sm:$0xff] }
  0x16   : > { %603 = vmatmul.mubr.msk.bf16.vlgmr.msra.gmra.mrb[0].mxu0 %vm291_vm0, %v632_v6  ;;  %607 = vmatmul.mubr.msk.bf16.vlgmr.msra.gmra.mrb[0].mxu1 %vm291_vm0, %v633_v7 }
  0xe9   : > { %v604_v9 = vpop.f32.mrb[0].mxu0  ;;  %v608_v11 = vpop.f32.mrb[0].mxu1 }
  0xea   : > { %v347_v13 = vadd.f32 %v604_v9, %v754_v8  ;;  %v363_v14 = vadd.f32 %v608_v11, %v754_v8  ;;  %v338_v15 = vpop.f32.mrb[1].mxu0  ;;  %v354_v17 = vpop.f32.mrb[1].mxu1 }
  0xeb   : > { %v339_v18 = vadd.f32 %v754_v8, %v338_v15  ;;  %v355_v19 = vadd.f32 %v754_v8, %v354_v17  ;;  %v605_v20 = vpop.f32.mrb[2].mxu0  ;;  %v609_v21 = vpop.f32.mrb[2].mxu1 }
  0xec   : > { %v379_v22 = vadd.f32 %v371_v10, %v347_v13  ;;  %v397_v23 = vmul.f32 1.442695, %v347_v13  ;;  %v419_v24 = vsub.f32 0.0, %v347_v13  ;;  %v383_v25 = vadd.f32 %v375_v12, %v363_v14  ;;  %v341_v26 = vpop.f32.mrb[3].mxu0  ;;  %v357_v27 = vpop.f32.mrb[3].mxu1 }
  0xed   : > { %v405_v28 = vmul.f32 1.442695, %v363_v14  ;;  %v423_v29 = vsub.f32 0.0, %v363_v14  ;;  %v377_v30 = vadd.f32 %v369_v16, %v339_v18  ;;  %v393_v31 = vmul.f32 1.442695, %v339_v18 }
  0xee   : > { %v387_v33 = vmul.f32 4.0, %v379_v22  ;;  %634 = vpow2.f32 %v397_v23  ;;  %v429_v34 = vmul.f32 1.442695, %v419_v24  ;;  %v391_v35 = vmul.f32 4.0, %v383_v25 }
  0xef   : > { %636 = vpow2.f32 %v405_v28  ;;  %v437_v36 = vmul.f32 1.442695, %v423_v29  ;;  %v385_v37 = vmul.f32 4.0, %v377_v30  ;;  %v417_v38 = vsub.f32 0.0, %v339_v18 }
  0xf0   : > { %638 = vpow2.f32 %v429_v34  ;;  %468 = vst.msk [vmem:[%s766_s12 + $0x10] sm:$0xff] %vm465_vm1, %v387_v33  ;;  %472 = vst.msk [vmem:[%s766_s12 + $0x30] sm:$0xff] %vm465_vm1, %v391_v35  ;;  %v381_v39 = vadd.f32 %v373_v32, %v355_v19  ;;  %v401_v40 = vmul.f32 1.442695, %v355_v19  ;;  %v421_v41 = vsub.f32 0.0, %v355_v19 }
  0xf1   : > { %640 = vpow2.f32 %v437_v36  ;;  %v425_v43 = vmul.f32 1.442695, %v417_v38  ;;  %466 = vst.msk [vmem:[%s766_s12] sm:$0xff] %vm465_vm1, %v385_v37  ;;  %v350_v44 = vadd.f32 %v605_v20, %v754_v8  ;;  %v366_v45 = vadd.f32 %v609_v21, %v754_v8 }
  0xf2   : > { %642 = vpow2.f32 %v393_v31  ;;  %v389_v47 = vmul.f32 4.0, %v381_v39  ;;  %v433_v48 = vmul.f32 1.442695, %v421_v41  ;;  %v342_v49 = vadd.f32 %v754_v8, %v341_v26 }
  0xf3   : > { %644 = vpow2.f32 %v425_v43  ;;  %v380_v51 = vadd.f32 %v372_v42, %v350_v44  ;;  %v399_v52 = vmul.f32 1.442695, %v350_v44  ;;  %v420_v53 = vsub.f32 0.0, %v350_v44 }
  0xf4   : > { %646 = vpow2.f32 %v401_v40  ;;  %470 = vst.msk [vmem:[%s766_s12 + $0x20] sm:$0xff] %vm465_vm1, %v389_v47  ;;  %v384_v54 = vadd.f32 %v376_v46, %v366_v45  ;;  %v407_v55 = vmul.f32 1.442695, %v366_v45  ;;  %v424_v56 = vsub.f32 0.0, %v366_v45 }
  0xf5   : > { %648 = vpow2.f32 %v433_v48  ;;  %v388_v57 = vmul.f32 4.0, %v380_v51  ;;  %v431_v58 = vmul.f32 1.442695, %v420_v53  ;;  %v378_v59 = vadd.f32 %v370_v50, %v342_v49 }
  0xf6   : > { %650 = vpow2.f32 %v399_v52  ;;  %v392_v60 = vmul.f32 4.0, %v384_v54  ;;  %v439_v61 = vmul.f32 1.442695, %v424_v56  ;;  %v395_v62 = vmul.f32 1.442695, %v342_v49 }
  0xf7   : > { %652 = vpow2.f32 %v431_v58  ;;  %469 = vst.msk [vmem:[%s766_s12 + $0x18] sm:$0xff] %vm465_vm1, %v388_v57  ;;  %v386_v0 = vmul.f32 4.0, %v378_v59  ;;  %v418_v1 = vsub.f32 0.0, %v342_v49  ;;  %v358_v2 = vadd.f32 %v754_v8, %v357_v27 }
  0xf8   : > { %v635_v3 = vpop.eup %634  ;;  %654 = vpow2.f32 %v407_v55  ;;  %473 = vst.msk [vmem:[%s766_s12 + $0x38] sm:$0xff] %vm465_vm1, %v392_v60 }
  0xf9   : > { %v637_v4 = vpop.eup %636  ;;  %v411_v5 = vmul.f32 4.0, %v635_v3  ;;  %656 = vpow2.f32 %v439_v61  ;;  %v427_v6 = vmul.f32 1.442695, %v418_v1  ;;  %467 = vst.msk [vmem:[%s766_s12 + $0x8] sm:$0xff] %vm465_vm1, %v386_v0  ;;  %v382_v7 = vadd.f32 %v374_v63, %v358_v2 }
  0xfa   : > { %v639_v9 = vpop.eup %638  ;;  %v415_v10 = vmul.f32 4.0, %v637_v4  ;;  %658 = vpow2.f32 %v395_v62  ;;  %v403_v11 = vmul.f32 1.442695, %v358_v2  ;;  %v422_v8 = vsub.f32 0.0, %v358_v2 }
  0xfb   : > { %v641_v12 = vpop.eup %640  ;;  %v443_v13 = vadd.f32 1.0, %v639_v9  ;;  %477 = vst.msk [vmem:[%s766_s12 + $0x10] sm:$0xff] %vm474_vm2, %v411_v5  ;;  %660 = vpow2.f32 %v427_v6  ;;  %v390_v14 = vmul.f32 4.0, %v382_v7 }
  0xfc   : > { %v643_v15 = vpop.eup %642  ;;  %v447_v16 = vadd.f32 1.0, %v641_v12  ;;  %481 = vst.msk [vmem:[%s766_s12 + $0x30] sm:$0xff] %vm474_vm2, %v415_v10  ;;  %662 = vpow2.f32 %v403_v11  ;;  %v435_v17 = vmul.f32 1.442695, %v422_v8 }
  0xfd   : > { %v645_v18 = vpop.eup %644  ;;  %664 = vrcp.f32 %v443_v13  ;;  %v409_v19 = vmul.f32 4.0, %v643_v15  ;;  %471 = vst.msk [vmem:[%s766_s12 + $0x28] sm:$0xff] %vm465_vm1, %v390_v14 }
  0xfe   : > { %v647_v20 = vpop.eup %646  ;;  %666 = vrcp.f32 %v447_v16  ;;  %v441_v21 = vadd.f32 1.0, %v645_v18 }
  0xff   : > { %v649_v22 = vpop.eup %648  ;;  %475 = vst.msk [vmem:[%s766_s12] sm:$0xff] %vm474_vm2, %v409_v19  ;;  %v413_v23 = vmul.f32 4.0, %v647_v20  ;;  %668 = vpow2.f32 %v435_v17 }
 0x100   : > { %v651_v24 = vpop.eup %650  ;;  %670 = vrcp.f32 %v441_v21  ;;  %v445_v25 = vadd.f32 1.0, %v649_v22 }
 0x101   : > { %v653_v26 = vpop.eup %652  ;;  %479 = vst.msk [vmem:[%s766_s12 + $0x20] sm:$0xff] %vm474_vm2, %v413_v23  ;;  %v412_v27 = vmul.f32 4.0, %v651_v24 }
 0x102   : > { %v655_v28 = vpop.eup %654  ;;  %672 = vrcp.f32 %v445_v25  ;;  %v444_v29 = vadd.f32 1.0, %v653_v26 }
 0x103   : > { %v657_v30 = vpop.eup %656  ;;  %478 = vst.msk [vmem:[%s766_s12 + $0x18] sm:$0xff] %vm474_vm2, %v412_v27  ;;  %v416_v31 = vmul.f32 4.0, %v655_v28 }
 0x104   : > { %v659_v32 = vpop.eup %658  ;;  %674 = vrcp.f32 %v444_v29  ;;  %v448_v33 = vadd.f32 1.0, %v657_v30 }
 0x105   : > { %v661_v34 = vpop.eup %660  ;;  %482 = vst.msk [vmem:[%s766_s12 + $0x38] sm:$0xff] %vm474_vm2, %v416_v31  ;;  %v410_v35 = vmul.f32 4.0, %v659_v32 }
 0x106   : > { %v663_v36 = vpop.eup %662  ;;  %676 = vrcp.f32 %v448_v33  ;;  %v442_v37 = vadd.f32 1.0, %v661_v34 }
 0x107   : > { %v665_v38 = vpop.eup %664  ;;  %476 = vst.msk [vmem:[%s766_s12 + $0x8] sm:$0xff] %vm474_vm2, %v410_v35  ;;  %v414_v39 = vmul.f32 4.0, %v663_v36 }
 0x108   : > { %v667_v40 = vpop.eup %666  ;;  %486 = vst.msk [vmem:[%s766_s12 + $0x10] sm:$0xff] %vm483_vm3, %v665_v38  ;;  %678 = vrcp.f32 %v442_v37 }
 0x109   : > { %v669_v41 = vpop.eup %668  ;;  %490 = vst.msk [vmem:[%s766_s12 + $0x30] sm:$0xff] %vm483_vm3, %v667_v40 }
 0x10a   : > { %480 = vst.msk [vmem:[%s766_s12 + $0x28] sm:$0xff] %vm474_vm2, %v414_v39  ;;  %v671_v42 = vpop.eup %670  ;;  %v446_v43 = vadd.f32 1.0, %v669_v41 }
 0x10b   : > { %484 = vst.msk [vmem:[%s766_s12] sm:$0xff] %vm483_vm3, %v671_v42 }
 0x10c   : > { %v673_v44 = vpop.eup %672  ;;  %680 = vrcp.f32 %v446_v43 }
 0x10d   : > { %488 = vst.msk [vmem:[%s766_s12 + $0x20] sm:$0xff] %vm483_vm3, %v673_v44 }
 0x10e   : > { %v675_v45 = vpop.eup %674 }
 0x10f   : > { %487 = vst.msk [vmem:[%s766_s12 + $0x18] sm:$0xff] %vm483_vm3, %v675_v45 }
 0x110   : > { %v677_v46 = vpop.eup %676 }
 0x111   : > { %491 = vst.msk [vmem:[%s766_s12 + $0x38] sm:$0xff] %vm483_vm3, %v677_v46 }
 0x112   : > { %v679_v47 = vpop.eup %678 }
 0x113   : > { %485 = vst.msk [vmem:[%s766_s12 + $0x8] sm:$0xff] %vm483_vm3, %v679_v47 }
 0x116   : > { %v681_v48 = vpop.eup %680 }
 0x117   : > { %489 = vst.msk [vmem:[%s766_s12 + $0x28] sm:$0xff] %vm483_vm3, %v681_v48 }
 0x118 PF: > { %s14_s15 = sadd.s32 1, %s688_s15  }
 0x119   : > { %p11_p4 = scmp.ge.s32.totalorder %s14_s15, 4  }
 0x11b   :  { %13 = sbr.rel (!%p11_p4) target bundleno = 1 (0x1), region = 69 }

// kernel: yolox_forward.21
= control target key start
LH: loop header
LB: loop body
LE: loop exit
PB: predicated region body
PF: predicated region fallthrough
CT: control target
= control target key end

     0   :  { %s439_s12 = smov 0   ;;  %s478_s0 = inlined_call_operand.vmem [shape: bf16[32,64], index: 0, kind: input, shape index: {}]   ;;  %s479_s1 = inlined_call_operand.vmem [shape: bf16[64,64], index: 1, kind: input, shape index: {}]   ;;  %s480_s2 = inlined_call_operand.vmem [shape: f32[1,64], index: 2, kind: input, shape index: {}]   ;;  %s481_s3 = inlined_call_operand.vmem [shape: bf16[32,64], index: 3, kind: output, shape index: {}]  }
   0x1 LB: > { %s347_s13 = sadd.s32 4294967295, %s415_s12   ;;  %p351_p0 = scmp.ge.s32.totalorder %s415_s12, 1  ;;  %s415_s12 = sphi %s439_s12, %s13_s12  }
   0x2   : > { %p138_p1 = scmp.lt.s32.totalorder %s415_s12, 3 }
   0x4   : > { %p139_p2 = pnand %p351_p0, %p138_p1 }
   0x5   : > { %v396_v0 = vld [vmem:[%s479_s1] sm:$0xff] (!%p139_p2)   ;;  %v417_v1 = vmov (!%p139_p2), 0.0   ;;  %v397_v2 = vld [vmem:[%s479_s1 + $0x8] sm:$0xff] (!%p139_p2)   ;;  %vm418_vm0 = vmmov (!%p139_p2), 0   ;;  %s352_s18 = sshll.u32 (!%p139_p2), %s347_s13, 1  ;;  %v398_v3 = vld [vmem:[%s479_s1 + $0x10] sm:$0xff] (!%p139_p2)  }
   0x6   : > { %142 = sbr.rel (%p139_p2) target bundleno = 271 (0x10f), region = 32  ;;  %374 = vmatprep.subr.bf16.mxu0 (!%p139_p2), %v417_v1  ;;  %382 = vmatprep.mubr.msk.bf16.mxu0 (!%p139_p2), %vm418_vm0, %v417_v1  ;;  %p163_p3 = scmp.lt.s32.totalorder (!%p139_p2), %s352_s18, 3  ;;  %v399_v4 = vld [vmem:[%s479_s1 + $0x18] sm:$0xff] (!%p139_p2)   ;;  %vm221_vm1 = vcmask (!%p139_p2), 523264   ;;  %v356_v6 = vld [vmem:[%s480_s2] ss:$0 sm:$0xff] (!%p139_p2) }
   0x7   : > { %375 = vmatpush3.bf16.msra.mxu0 (!%p139_p2), %v396_v0  ;;  %vm288_vm2 = vcmask (!%p139_p2), 519168  }
   0x8   : > { %376 = vmatprep.subr.bf16.mxu0 (!%p139_p2), %v417_v1 }
   0xb   : > { %377 = vmatpush3.bf16.msra.mxu0 (!%p139_p2), %v397_v2 }
   0xc   : > { %378 = vmatprep.subr.bf16.mxu0 (!%p139_p2), %v417_v1 }
   0xd   : > { %s483_s18 = smov (!%p163_p3, %s352_s18), 3 }
   0xe   : > { %s353_s21 = sshll.u32 %s483_s18, 2 }
   0xf   : > { %s166_s24 = scalar_lea.vmem %s478_s0, %s353_s21  ;;  %379 = vmatpush3.bf16.msra.mxu0 %v398_v3  ;;  %s172_s4 = scalar_lea.vmem %s481_s3, %s353_s21 }
  0x10   : > { %380 = vmatprep.subr.bf16.mxu0 %v417_v1  ;;  %v400_v5 = vld [vmem:[%s166_s24] sm:$0xff]  }
  0x13   : > { %381 = vmatpush3.bf16.msra.mxu0 %v399_v4 }
  0x16   : > { %383 = vmatmul.mubr.msk.bf16.vlgmr.msra.gmra.mrb[0].mxu0 %vm221_vm1, %v400_v5 }
  0xe9   : > { %v259_v7 = vpop.f32.mrb[0].mxu0 }
  0xea   : > { %v260_v8 = vadd.f32 %v356_v6, %v259_v7  ;;  %v384_v9 = vpop.f32.mrb[1].mxu0 }
  0xeb   : > { %v262_v10 = vpop.f32.mrb[2].mxu0 }
  0xec   : > { %v266_v11 = vsub.f32 0.0, %v260_v8  ;;  %v263_v12 = vadd.f32 %v356_v6, %v262_v10  ;;  %v385_v13 = vpop.f32.mrb[3].mxu0 }
  0xee   : > { %v268_v14 = vmul.f32 1.442695, %v266_v11  ;;  %v267_v15 = vsub.f32 0.0, %v263_v12 }
  0xf0   : > { %401 = vpow2.f32 %v268_v14  ;;  %v270_v16 = vmul.f32 1.442695, %v267_v15 }
  0xf2   : > { %403 = vpow2.f32 %v270_v16 }
  0xfa   : > { %v402_v17 = vpop.eup %401 }
  0xfb   : > { %v272_v18 = vadd.f32 1.0, %v402_v17 }
  0xfc   : > { %v404_v19 = vpop.eup %403 }
  0xfd   : > { %405 = vrcp.f32 %v272_v18  ;;  %v273_v20 = vadd.f32 1.0, %v404_v19 }
  0xff   : > { %407 = vrcp.f32 %v273_v20 }
 0x107   : > { %v406_v21 = vpop.eup %405 }
 0x108   : > { %v278_v22 = vmul.f32 %v406_v21, %v260_v8 }
 0x109   : > { %v408_v23 = vpop.eup %407 }
 0x10a   : > { %v367_v24 = vpack.c.bf16 %v278_v22, %v278_v22  ;;  %v279_v25 = vmul.f32 %v408_v23, %v263_v12 }
 0x10c   : > { %289 = vst.msk [vmem:[%s172_s4] sm:$0xf] %vm288_vm2, %v367_v24  ;;  %v368_v26 = vpack.c.bf16 %v279_v25, %v279_v25 }
 0x10e   : > { %290 = vst.msk [vmem:[%s172_s4 + $0x4] sm:$0xf] %vm288_vm2, %v368_v26 }
 0x10f PF: > { %s13_s12 = sadd.s32 1, %s415_s12  }
 0x110   : > { %p10_p4 = scmp.ge.s32.totalorder %s13_s12, 4  }
 0x112   :  { %12 = sbr.rel (!%p10_p4) target bundleno = 1 (0x1), region = 62 }

// kernel: yolox_forward.26
= control target key start
LH: loop header
LB: loop body
LE: loop exit
PB: predicated region body
PF: predicated region fallthrough
CT: control target
= control target key end

     0   :  { %s439_s12 = smov 0   ;;  %s478_s0 = inlined_call_operand.vmem [shape: bf16[32,64], index: 0, kind: input, shape index: {}]   ;;  %s479_s1 = inlined_call_operand.vmem [shape: bf16[64,32], index: 1, kind: input, shape index: {}]   ;;  %s480_s2 = inlined_call_operand.vmem [shape: f32[1,32], index: 2, kind: input, shape index: {}]   ;;  %s481_s3 = inlined_call_operand.vmem [shape: bf16[32,32], index: 3, kind: output, shape index: {}]  }
   0x1 LB: > { %s347_s13 = sadd.s32 4294967295, %s415_s12   ;;  %p351_p0 = scmp.ge.s32.totalorder %s415_s12, 1  ;;  %s415_s12 = sphi %s439_s12, %s13_s12  }
   0x2   : > { %p138_p1 = scmp.lt.s32.totalorder %s415_s12, 3 }
   0x4   : > { %p139_p2 = pnand %p351_p0, %p138_p1 }
   0x5   : > { %v396_v0 = vld [vmem:[%s479_s1] sm:$0xff] (!%p139_p2)   ;;  %v417_v1 = vmov (!%p139_p2), 0.0   ;;  %v397_v2 = vld [vmem:[%s479_s1 + $0x8] sm:$0xff] (!%p139_p2)   ;;  %vm418_vm0 = vmmov (!%p139_p2), 0   ;;  %s352_s18 = sshll.u32 (!%p139_p2), %s347_s13, 1  ;;  %v398_v3 = vld [vmem:[%s479_s1 + $0x10] sm:$0xff] (!%p139_p2)  }
   0x6   : > { %142 = sbr.rel (%p139_p2) target bundleno = 271 (0x10f), region = 32  ;;  %374 = vmatprep.subr.bf16.mxu0 (!%p139_p2), %v417_v1  ;;  %382 = vmatprep.mubr.msk.bf16.mxu0 (!%p139_p2), %vm418_vm0, %v417_v1  ;;  %p163_p3 = scmp.lt.s32.totalorder (!%p139_p2), %s352_s18, 3  ;;  %v399_v4 = vld [vmem:[%s479_s1 + $0x18] sm:$0xff] (!%p139_p2)   ;;  %vm221_vm1 = vcmask (!%p139_p2), 523264   ;;  %v356_v6 = vld [vmem:[%s480_s2] ss:$0 sm:$0xff] (!%p139_p2) }
   0x7   : > { %375 = vmatpush3.bf16.msra.mxu0 (!%p139_p2), %v396_v0  ;;  %vm288_vm2 = vcmask (!%p139_p2), 257024  }
   0x8   : > { %376 = vmatprep.subr.bf16.mxu0 (!%p139_p2), %v417_v1 }
   0xb   : > { %377 = vmatpush3.bf16.msra.mxu0 (!%p139_p2), %v397_v2 }
   0xc   : > { %378 = vmatprep.subr.bf16.mxu0 (!%p139_p2), %v417_v1 }
   0xd   : > { %s483_s18 = smov (!%p163_p3, %s352_s18), 3 }
   0xe   : > { %s353_s21 = sshll.u32 %s483_s18, 2 }
   0xf   : > { %s166_s24 = scalar_lea.vmem %s478_s0, %s353_s21  ;;  %379 = vmatpush3.bf16.msra.mxu0 %v398_v3  ;;  %s172_s4 = scalar_lea.vmem %s481_s3, %s353_s21 }
  0x10   : > { %380 = vmatprep.subr.bf16.mxu0 %v417_v1  ;;  %v400_v5 = vld [vmem:[%s166_s24] sm:$0xff]  }
  0x13   : > { %381 = vmatpush3.bf16.msra.mxu0 %v399_v4 }
  0x16   : > { %383 = vmatmul.mubr.msk.bf16.vlgmr.msra.gmra.mrb[0].mxu0 %vm221_vm1, %v400_v5 }
  0xe9   : > { %v259_v7 = vpop.f32.mrb[0].mxu0 }
  0xea   : > { %v260_v8 = vadd.f32 %v356_v6, %v259_v7  ;;  %v384_v9 = vpop.f32.mrb[1].mxu0 }
  0xeb   : > { %v262_v10 = vpop.f32.mrb[2].mxu0 }
  0xec   : > { %v266_v11 = vsub.f32 0.0, %v260_v8  ;;  %v263_v12 = vadd.f32 %v356_v6, %v262_v10  ;;  %v385_v13 = vpop.f32.mrb[3].mxu0 }
  0xee   : > { %v268_v14 = vmul.f32 1.442695, %v266_v11  ;;  %v267_v15 = vsub.f32 0.0, %v263_v12 }
  0xf0   : > { %401 = vpow2.f32 %v268_v14  ;;  %v270_v16 = vmul.f32 1.442695, %v267_v15 }
  0xf2   : > { %403 = vpow2.f32 %v270_v16 }
  0xfa   : > { %v402_v17 = vpop.eup %401 }
  0xfb   : > { %v272_v18 = vadd.f32 1.0, %v402_v17 }
  0xfc   : > { %v404_v19 = vpop.eup %403 }
  0xfd   : > { %405 = vrcp.f32 %v272_v18  ;;  %v273_v20 = vadd.f32 1.0, %v404_v19 }
  0xff   : > { %407 = vrcp.f32 %v273_v20 }
 0x107   : > { %v406_v21 = vpop.eup %405 }
 0x108   : > { %v278_v22 = vmul.f32 %v406_v21, %v260_v8 }
 0x109   : > { %v408_v23 = vpop.eup %407 }
 0x10a   : > { %v367_v24 = vpack.c.bf16 %v278_v22, %v278_v22  ;;  %v279_v25 = vmul.f32 %v408_v23, %v263_v12 }
 0x10c   : > { %289 = vst.msk [vmem:[%s172_s4] sm:$0xf] %vm288_vm2, %v367_v24  ;;  %v368_v26 = vpack.c.bf16 %v279_v25, %v279_v25 }
 0x10e   : > { %290 = vst.msk [vmem:[%s172_s4 + $0x4] sm:$0xf] %vm288_vm2, %v368_v26 }
 0x10f PF: > { %s13_s12 = sadd.s32 1, %s415_s12  }
 0x110   : > { %p10_p4 = scmp.ge.s32.totalorder %s13_s12, 4  }
 0x112   :  { %12 = sbr.rel (!%p10_p4) target bundleno = 1 (0x1), region = 62 }

// kernel: yolox_forward.18
= control target key start
LH: loop header
LB: loop body
LE: loop exit
PB: predicated region body
PF: predicated region fallthrough
CT: control target
= control target key end

     0   :  { %s657_s12 = smov 0   ;;  %s735_s0 = inlined_call_operand.vmem [shape: bf16[32,288], index: 0, kind: input, shape index: {}]   ;;  %s736_s1 = inlined_call_operand.vmem [shape: bf16[288,64], index: 1, kind: input, shape index: {}]   ;;  %s737_s2 = inlined_call_operand.vmem [shape: f32[1,64], index: 2, kind: input, shape index: {}]   ;;  %s738_s3 = inlined_call_operand.vmem [shape: bf16[32,64], index: 3, kind: output, shape index: {}]  }
   0x1 LB: > { %s515_s13 = sadd.s32 4294967295, %s633_s12   ;;  %p519_p0 = scmp.ge.s32.totalorder %s633_s12, 1  ;;  %s633_s12 = sphi %s657_s12, %s13_s12  }
   0x2   : > { %p139_p1 = scmp.lt.s32.totalorder %s633_s12, 3 }
   0x4   : > { %p140_p2 = pnand %p519_p0, %p139_p1 }
   0x5   : > { %v597_v0 = vld [vmem:[%s736_s1 + $0x40] sm:$0xff] (!%p140_p2)   ;;  %v635_v2 = vmov (!%p140_p2), 0.0   ;;  %s520_s18 = sshll.u32 (!%p140_p2), %s515_s13, 1  ;;  %v599_v3 = vld [vmem:[%s736_s1 + $0x48] sm:$0xff] (!%p140_p2)   ;;  %v601_v5 = vld [vmem:[%s736_s1 + $0x50] sm:$0xff] (!%p140_p2)   ;;  %vm636_vm0 = vmmov (!%p140_p2), 0  }
   0x6   : > { %143 = sbr.rel (%p140_p2) target bundleno = 292 (0x124), region = 32  ;;  %v598_v1 = vld [vmem:[%s736_s1] sm:$0xff] (!%p140_p2)   ;;  %578 = vmatprep.subr.bf16.mxu1 (!%p140_p2), %v635_v2  ;;  %553 = vmatprep.subr.bf16.mxu0 (!%p140_p2), %v597_v0  ;;  %p165_p3 = scmp.lt.s32.totalorder (!%p140_p2), %s520_s18, 3  ;;  %v600_v4 = vld [vmem:[%s736_s1 + $0x8] sm:$0xff] (!%p140_p2)   ;;  %v602_v6 = vld [vmem:[%s736_s1 + $0x10] sm:$0xff] (!%p140_p2)   ;;  %vm348_vm1 = vcmask (!%p140_p2), 261120  }
   0x7   : > { %554 = vmatpush3.bf16.msra.mxu0 (!%p140_p2), %v598_v1  ;;  %582 = vmatprep.mubr.msk.bf16.mxu1 (!%p140_p2), %vm636_vm0, %v635_v2  ;;  %v603_v7 = vld [vmem:[%s736_s1 + $0x58] sm:$0xff] (!%p140_p2)   ;;  %v605_v9 = vld [vmem:[%s736_s1 + $0x60] sm:$0xff] (!%p140_p2)   ;;  %v607_v12 = vld [vmem:[%s736_s1 + $0x68] sm:$0xff] (!%p140_p2)   ;;  %vm456_vm2 = vcmask (!%p140_p2), 519168  }
   0x8   : > { %555 = vmatprep.subr.bf16.mxu0 (!%p140_p2), %v599_v3  ;;  %v604_v8 = vld [vmem:[%s736_s1 + $0x18] sm:$0xff] (!%p140_p2)   ;;  %v611_v10 = vld [vmem:[%s736_s1 + $0x80] sm:$0xff] (!%p140_p2)   ;;  %v608_v13 = vld [vmem:[%s736_s1 + $0x28] sm:$0xff] (!%p140_p2)  }
   0x9   : > { %v606_v11 = vld [vmem:[%s736_s1 + $0x20] sm:$0xff] (!%p140_p2)   ;;  %579 = vmatpush3.bf16.msra.mxu1 (!%p140_p2), %v611_v10  ;;  %v617_v15 = vld [vmem:[%s736_s1 + $0x88] sm:$0xff] (!%p140_p2)   ;;  %v609_v16 = vld [vmem:[%s736_s1 + $0x70] sm:$0xff] (!%p140_p2)  }
   0xa   : > { %580 = vmatprep.subr.bf16.mxu1 (!%p140_p2), %v635_v2  ;;  %v610_v18 = vld [vmem:[%s736_s1 + $0x30] sm:$0xff] (!%p140_p2)   ;;  %v612_v19 = vld [vmem:[%s736_s1 + $0x78] sm:$0xff] (!%p140_p2)   ;;  %v524_v28 = vld [vmem:[%s737_s2] ss:$0 sm:$0xff] (!%p140_p2) }
   0xb   : > { %556 = vmatpush3.bf16.msra.mxu0 (!%p140_p2), %v600_v4  ;;  %v613_v20 = vld [vmem:[%s736_s1 + $0x38] sm:$0xff] (!%p140_p2)  }
   0xc   : > { %557 = vmatprep.subr.bf16.mxu0 (!%p140_p2), %v601_v5 }
   0xd   : > { %s740_s18 = smov (!%p165_p3, %s520_s18), 3  ;;  %581 = vmatpush3.bf16.msra.mxu1 %v617_v15 }
   0xe   : > { %s586_s4 = smul.u32 12, %s740_s18  ;;  %s523_s5 = sshll.u32 %s740_s18, 2 }
   0xf   : > { %558 = vmatpush3.bf16.msra.mxu0 %v602_v6  ;;  %s175_s8 = scalar_lea.vmem %s738_s3, %s523_s5 }
  0x10   : > { %559 = vmatprep.subr.bf16.mxu0 %v603_v7  ;;  %s169_s14 = scalar_lea.vmem %s735_s0, %s586_s4 }
  0x11   : > { %v616_v14 = vld [vmem:[%s169_s14 + $0x4] ss:$12 sps:$4 sm:$0xff]   ;;  %v618_v17 = vld [vmem:[%s169_s14 + $0x8] ss:$12 sps:$4 sm:$0xff]   ;;  %v614_v21 = vld [vmem:[%s169_s14] ss:$12 sps:$4 sm:$0xff]  }
  0x12   : > { %384 = vmatprep.mubr.bf16.mxu0 %v616_v14  ;;  %583 = vmatmul.mubr.msk.bf16.vlgmr.msra.gmra.mrb[0].mxu1 %vm348_vm1, %v618_v17 }
  0x13   : > { %560 = vmatpush3.bf16.msra.mxu0 %v604_v8 }
  0x14   : > { %561 = vmatprep.subr.bf16.mxu0 %v605_v9 }
  0x17   : > { %562 = vmatpush3.bf16.msra.mxu0 %v606_v11 }
  0x18   : > { %563 = vmatprep.subr.bf16.mxu0 %v607_v12 }
  0x1b   : > { %564 = vmatpush3.bf16.msra.mxu0 %v608_v13 }
  0x1c   : > { %565 = vmatprep.subr.bf16.mxu0 %v609_v16 }
  0x1f   : > { %566 = vmatpush3.bf16.msra.mxu0 %v610_v18 }
  0x20   : > { %567 = vmatprep.subr.bf16.mxu0 %v612_v19 }
  0x23   : > { %568 = vmatpush3.bf16.msra.mxu0 %v613_v20 }
  0x26   : > { %385 = vmatmul.mubr.bf16.vlgmr.msra.gmra.mrb[0].mxu0 %v614_v21 }
  0xe5   : > { %v427_v22 = vpop.f32.mrb[0].mxu1 }
  0xe6   : > { %v584_v23 = vpop.f32.mrb[1].mxu1 }
  0xe7   : > { %v430_v24 = vpop.f32.mrb[2].mxu1 }
  0xe8   : > { %v585_v25 = vpop.f32.mrb[3].mxu1 }
  0xf9   : > { %v569_v26 = vpop.f32.mrb[0].mxu0 }
  0xfa   : > { %v570_v27 = vpop.f32.mrb[1].mxu0 }
  0xfb   : > { %v571_v29 = vadd.f32 %v570_v27, %v569_v26  ;;  %v572_v30 = vpop.f32.mrb[2].mxu0 }
  0xfc   : > { %v573_v31 = vpop.f32.mrb[3].mxu0 }
  0xfd   : > { %v387_v32 = vadd.f32 %v571_v29, %v524_v28  ;;  %v574_v33 = vadd.f32 %v573_v31, %v572_v30 }
  0xff   : > { %v428_v34 = vadd.f32 %v427_v22, %v387_v32  ;;  %v390_v35 = vadd.f32 %v574_v33, %v524_v28 }
 0x101   : > { %v434_v36 = vsub.f32 0.0, %v428_v34  ;;  %v431_v37 = vadd.f32 %v430_v24, %v390_v35 }
 0x103   : > { %v436_v38 = vmul.f32 1.442695, %v434_v36  ;;  %v435_v39 = vsub.f32 0.0, %v431_v37 }
 0x105   : > { %619 = vpow2.f32 %v436_v38  ;;  %v438_v40 = vmul.f32 1.442695, %v435_v39 }
 0x107   : > { %621 = vpow2.f32 %v438_v40 }
 0x10f   : > { %v620_v41 = vpop.eup %619 }
 0x110   : > { %v440_v42 = vadd.f32 1.0, %v620_v41 }
 0x111   : > { %v622_v43 = vpop.eup %621 }
 0x112   : > { %623 = vrcp.f32 %v440_v42  ;;  %v441_v44 = vadd.f32 1.0, %v622_v43 }
 0x114   : > { %625 = vrcp.f32 %v441_v44 }
 0x11c   : > { %v624_v45 = vpop.eup %623 }
 0x11d   : > { %v446_v46 = vmul.f32 %v624_v45, %v428_v34 }
 0x11e   : > { %v626_v47 = vpop.eup %625 }
 0x11f   : > { %v551_v48 = vpack.c.bf16 %v446_v46, %v446_v46  ;;  %v447_v49 = vmul.f32 %v626_v47, %v431_v37 }
 0x121   : > { %457 = vst.msk [vmem:[%s175_s8] sm:$0xf] %vm456_vm2, %v551_v48  ;;  %v552_v50 = vpack.c.bf16 %v447_v49, %v447_v49 }
 0x123   : > { %458 = vst.msk [vmem:[%s175_s8 + $0x4] sm:$0xf] %vm456_vm2, %v552_v50 }
 0x124 PF: > { %s13_s12 = sadd.s32 1, %s633_s12  }
 0x125   : > { %p10_p4 = scmp.ge.s32.totalorder %s13_s12, 4  }
 0x127   :  { %12 = sbr.rel (!%p10_p4) target bundleno = 1 (0x1), region = 62 }

// kernel: yolox_forward.28
= control target key start
LH: loop header
LB: loop body
LE: loop exit
PB: predicated region body
PF: predicated region fallthrough
CT: control target
= control target key end

     0   :  { %s515_s15 = smov 0   ;;  %s558_s0 = inlined_call_operand.vmem [shape: bf16[32,64], index: 0, kind: input, shape index: {}]   ;;  %s559_s1 = inlined_call_operand.vmem [shape: bf16[64,8], index: 1, kind: input, shape index: {}]   ;;  %s560_s2 = inlined_call_operand.vmem [shape: f32[1,8], index: 2, kind: input, shape index: {}]   ;;  %s561_s3 = inlined_call_operand.vmem [shape: f32[32,2], index: 3, kind: input, shape index: {}]   ;;  %s562_s4 = inlined_call_operand.vmem [shape: f32[32,8], index: 4, kind: output, shape index: {}]  }
   0x1 LB: > { %s416_s16 = sadd.s32 4294967295, %s486_s15   ;;  %p420_p0 = scmp.ge.s32.totalorder %s486_s15, 1  ;;  %s486_s15 = sphi %s515_s15, %s14_s15  }
   0x2   : > { %p174_p1 = scmp.lt.s32.totalorder %s486_s15, 3 }
   0x4   : > { %p175_p2 = pnand %p420_p0, %p174_p1 }
   0x5   : > { %v463_v0 = vld [vmem:[%s559_s1] sm:$0xff] (!%p175_p2)   ;;  %v488_v1 = vmov (!%p175_p2), 0.0   ;;  %v464_v2 = vld [vmem:[%s559_s1 + $0x8] sm:$0xff] (!%p175_p2)   ;;  %vm489_vm0 = vmmov (!%p175_p2), 0   ;;  %s421_s21 = sshll.u32 (!%p175_p2), %s416_s16, 1  ;;  %v465_v3 = vld [vmem:[%s559_s1 + $0x10] sm:$0xff] (!%p175_p2)  }
   0x6   : > { %178 = sbr.rel (%p175_p2) target bundleno = 268 (0x10c), region = 36  ;;  %441 = vmatprep.subr.bf16.mxu0 (!%p175_p2), %v488_v1  ;;  %449 = vmatprep.mubr.msk.bf16.mxu0 (!%p175_p2), %vm489_vm0, %v488_v1  ;;  %p206_p3 = scmp.lt.s32.totalorder (!%p175_p2), %s421_s21, 3  ;;  %v466_v4 = vld [vmem:[%s559_s1 + $0x18] sm:$0xff] (!%p175_p2)   ;;  %vm270_vm1 = vcmask (!%p175_p2), 523264   ;;  %v427_v6 = vld [vmem:[%s560_s2] ss:$0 sm:$0xff] (!%p175_p2) }
   0x7   : > { %442 = vmatpush3.bf16.msra.mxu0 (!%p175_p2), %v463_v0  ;;  %vm339_vm2 = vcmask (!%p175_p2), 15360   ;;  %vm342_vm3 = vcmask (!%p175_p2), 31760   ;;  %vm345_vm4 = vcmask (!%p175_p2), 64544  }
   0x8   : > { %443 = vmatprep.subr.bf16.mxu0 (!%p175_p2), %v488_v1 }
   0xb   : > { %444 = vmatpush3.bf16.msra.mxu0 (!%p175_p2), %v464_v2 }
   0xc   : > { %445 = vmatprep.subr.bf16.mxu0 (!%p175_p2), %v488_v1 }
   0xd   : > { %s564_s21 = smov (!%p206_p3, %s421_s21), 3 }
   0xe   : > { %s422_s24 = sshll.u32 %s564_s21, 2  ;;  %s424_s30 = sshll.u32 %s564_s21, 3 }
   0xf   : > { %s209_s27 = scalar_lea.vmem %s558_s0, %s422_s24  ;;  %446 = vmatpush3.bf16.msra.mxu0 %v465_v3  ;;  %s215_s7 = scalar_lea.vmem %s561_s3, %s424_s30 }
  0x10   : > { %447 = vmatprep.subr.bf16.mxu0 %v488_v1  ;;  %v467_v5 = vld [vmem:[%s209_s27] sm:$0xff]   ;;  %v316_v12 = vld [vmem:[%s215_s7 + $0x8] sm:$0xff]  ;;  %s547_s12 = scalar_lea.vmem %s562_s4, %s424_s30 }
  0x11   : > { %v315_v8 = vld [vmem:[%s215_s7] sm:$0xff] }
  0x13   : > { %448 = vmatpush3.bf16.msra.mxu0 %v466_v4 }
  0x16   : > { %450 = vmatmul.mubr.msk.bf16.vlgmr.msra.gmra.mrb[0].mxu0 %vm270_vm1, %v467_v5 }
  0xe9   : > { %v308_v7 = vpop.f32.mrb[0].mxu0 }
  0xea   : > { %v309_v9 = vadd.f32 %v427_v6, %v308_v7  ;;  %v451_v10 = vpop.f32.mrb[1].mxu0 }
  0xeb   : > { %v311_v11 = vpop.f32.mrb[2].mxu0 }
  0xec   : > { %v317_v13 = vadd.f32 %v315_v8, %v309_v9  ;;  %v321_v14 = vmul.f32 1.442695, %v309_v9  ;;  %v327_v15 = vsub.f32 0.0, %v309_v9  ;;  %v312_v16 = vadd.f32 %v427_v6, %v311_v11  ;;  %v452_v17 = vpop.f32.mrb[3].mxu0 }
  0xee   : > { %v319_v18 = vmul.f32 8.0, %v317_v13  ;;  %468 = vpow2.f32 %v321_v14  ;;  %v329_v19 = vmul.f32 1.442695, %v327_v15  ;;  %v318_v20 = vadd.f32 %v316_v12, %v312_v16 }
  0xef   : > { %v323_v21 = vmul.f32 1.442695, %v312_v16  ;;  %v328_v22 = vsub.f32 0.0, %v312_v16 }
  0xf0   : > { %470 = vpow2.f32 %v329_v19  ;;  %340 = vst.msk [vmem:[%s547_s12] sm:$0xff] %vm339_vm2, %v319_v18  ;;  %v320_v23 = vmul.f32 8.0, %v318_v20 }
  0xf1   : > { %472 = vpow2.f32 %v323_v21  ;;  %v331_v24 = vmul.f32 1.442695, %v328_v22 }
  0xf2   : > { %341 = vst.msk [vmem:[%s547_s12 + $0x8] sm:$0xff] %vm339_vm2, %v320_v23 }
  0xf3   : > { %474 = vpow2.f32 %v331_v24 }
  0xf8   : > { %v469_v25 = vpop.eup %468 }
  0xf9   : > { %v325_v26 = vmul.f32 8.0, %v469_v25 }
  0xfa   : > { %v471_v27 = vpop.eup %470 }
  0xfb   : > { %v473_v28 = vpop.eup %472  ;;  %v333_v29 = vadd.f32 1.0, %v471_v27  ;;  %343 = vst.msk [vmem:[%s547_s12] sm:$0xff] %vm342_vm3, %v325_v26 }
  0xfc   : > { %v326_v30 = vmul.f32 8.0, %v473_v28 }
  0xfd   : > { %v475_v31 = vpop.eup %474  ;;  %476 = vrcp.f32 %v333_v29 }
  0xfe   : > { %v334_v32 = vadd.f32 1.0, %v475_v31  ;;  %344 = vst.msk [vmem:[%s547_s12 + $0x8] sm:$0xff] %vm342_vm3, %v326_v30 }
 0x100   : > { %478 = vrcp.f32 %v334_v32 }
 0x107   : > { %v477_v33 = vpop.eup %476 }
 0x108   : > { %346 = vst.msk [vmem:[%s547_s12] sm:$0xff] %vm345_vm4, %v477_v33 }
 0x10a   : > { %v479_v34 = vpop.eup %478 }
 0x10b   : > { %347 = vst.msk [vmem:[%s547_s12 + $0x8] sm:$0xff] %vm345_vm4, %v479_v34 }
 0x10c PF: > { %s14_s15 = sadd.s32 1, %s486_s15  }
 0x10d   : > { %p11_p4 = scmp.ge.s32.totalorder %s14_s15, 4  }
 0x10f   :  { %13 = sbr.rel (!%p11_p4) target bundleno = 1 (0x1), region = 69 }

// kernel: yolox_forward.22
= control target key start
LH: loop header
LB: loop body
LE: loop exit
PB: predicated region body
PF: predicated region fallthrough
CT: control target
= control target key end

     0   :  { %v192_v0 = vmov 0.0   ;;  %vm193_vm0 = vmmov 0   ;;  %s247_s1 = inlined_call_operand.vmem [shape: bf16[128,128], index: 1, kind: input, shape index: {}]   ;;  %s248_s0 = inlined_call_operand.vmem [shape: bf16[8,128], index: 0, kind: input, shape index: {}]   ;;  %s249_s2 = inlined_call_operand.vmem [shape: f32[1,128], index: 2, kind: input, shape index: {}]   ;;  %s250_s3 = inlined_call_operand.vmem [shape: bf16[8,128], index: 3, kind: output, shape index: {}]  }
   0x1   :  { %158 = vmatprep.subr.bf16.mxu0 %v192_v0  ;;  %v180_v1 = vld [vmem:[%s247_s1] sm:$0xff]   ;;  %174 = vmatprep.mubr.msk.bf16.mxu0 %vm193_vm0, %v192_v0  ;;  %v181_v2 = vld [vmem:[%s247_s1 + $0x8] sm:$0xff]   ;;  %v182_v3 = vld [vmem:[%s247_s1 + $0x10] sm:$0xff]  }
   0x2   :  { %159 = vmatpush3.bf16.msra.mxu0 %v180_v1  ;;  %v183_v4 = vld [vmem:[%s247_s1 + $0x18] sm:$0xff]   ;;  %v184_v5 = vld [vmem:[%s247_s1 + $0x20] sm:$0xff]   ;;  %v185_v6 = vld [vmem:[%s247_s1 + $0x28] sm:$0xff]  }
   0x3   :  { %160 = vmatprep.subr.bf16.mxu0 %v192_v0  ;;  %v186_v7 = vld [vmem:[%s247_s1 + $0x30] sm:$0xff]   ;;  %v187_v8 = vld [vmem:[%s247_s1 + $0x38] sm:$0xff]   ;;  %v15_v9 = vld [vmem:[%s248_s0] sm:$0xf] }
   0x4   :  { %v140_v10 = vld [vmem:[%s249_s2] ss:$0 sm:$0xff] }
   0x6   :  { %161 = vmatpush3.bf16.msra.mxu0 %v181_v2 }
   0x7   :  { %162 = vmatprep.subr.bf16.mxu0 %v192_v0 }
   0xa   :  { %163 = vmatpush3.bf16.msra.mxu0 %v182_v3 }
   0xb   :  { %164 = vmatprep.subr.bf16.mxu0 %v192_v0 }
   0xe   :  { %165 = vmatpush3.bf16.msra.mxu0 %v183_v4 }
   0xf   :  { %166 = vmatprep.subr.bf16.mxu0 %v192_v0 }
  0x12   :  { %167 = vmatpush3.bf16.msra.mxu0 %v184_v5 }
  0x13   :  { %168 = vmatprep.subr.bf16.mxu0 %v192_v0 }
  0x16   :  { %169 = vmatpush3.bf16.msra.mxu0 %v185_v6 }
  0x17   :  { %170 = vmatprep.subr.bf16.mxu0 %v192_v0 }
  0x1a   :  { %171 = vmatpush3.bf16.msra.mxu0 %v186_v7 }
  0x1b   :  { %172 = vmatprep.subr.bf16.mxu0 %v192_v0 }
  0x1e   :  { %173 = vmatpush3.bf16.msra.mxu0 %v187_v8 }
  0x21   :  { %175 = vmatmul.mubr.bf16.vlgmr.msra.gmra.mrb[0].mxu0 %v15_v9 }
  0xf4   :  { %v121_v11 = vpop.f32.mrb[0].mxu0 }
  0xf5   :  { %v122_v12 = vadd.f32 %v140_v10, %v121_v11  ;;  %v176_v13 = vpop.f32.mrb[1].mxu0 }
  0xf6   :  { %v124_v14 = vpop.f32.mrb[2].mxu0 }
  0xf7   :  { %v127_v15 = vsub.f32 0.0, %v122_v12  ;;  %v177_v16 = vpop.f32.mrb[3].mxu0 }
  0xf9   :  { %v128_v17 = vmul.f32 1.442695, %v127_v15 }
  0xfb   :  { %188 = vpow2.f32 %v128_v17 }
 0x105   :  { %v189_v18 = vpop.eup %188 }
 0x106   :  { %v130_v19 = vadd.f32 1.0, %v189_v18 }
 0x108   :  { %190 = vrcp.f32 %v130_v19 }
 0x112   :  { %v191_v20 = vpop.eup %190 }
 0x113   :  { %v133_v21 = vmul.f32 %v191_v20, %v122_v12 }
 0x115   :  { %v134_v22 = vpack.c.bf16 %v133_v21, %v133_v21 }
 0x117   :  { %135 = vst [vmem:[%s250_s3] sm:$0xf] %v134_v22 }

// kernel: yolox_forward.19
= control target key start
LH: loop header
LB: loop body
LE: loop exit
PB: predicated region body
PF: predicated region fallthrough
CT: control target
= control target key end

     0   :  { %v618_v35 = vmov 0.0   ;;  %vm619_vm0 = vmmov 0   ;;  %vm330_vm1 = vcmask 523264   ;;  %s763_s1 = inlined_call_operand.vmem [shape: bf16[576,128], index: 1, kind: input, shape index: {}]   ;;  %s764_s0 = inlined_call_operand.vmem [shape: bf16[8,576], index: 0, kind: input, shape index: {}]   ;;  %s765_s2 = inlined_call_operand.vmem [shape: f32[1,128], index: 2, kind: input, shape index: {}]   ;;  %s766_s3 = inlined_call_operand.vmem [shape: bf16[8,128], index: 3, kind: output, shape index: {}]  }
   0x1   :  { %v573_v0 = vld [vmem:[%s763_s1 + $0x40] sm:$0xff]   ;;  %v577_v4 = vld [vmem:[%s763_s1 + $0x48] sm:$0xff]   ;;  %v581_v8 = vld [vmem:[%s763_s1 + $0x50] sm:$0xff]  }
   0x2   :  { %v574_v1 = vld [vmem:[%s763_s1] sm:$0xff]   ;;  %510 = vmatprep.subr.bf16.mxu0 %v573_v0  ;;  %v578_v5 = vld [vmem:[%s763_s1 + $0x8] sm:$0xff]   ;;  %v582_v9 = vld [vmem:[%s763_s1 + $0x10] sm:$0xff]  }
   0x3   :  { %v575_v2 = vld [vmem:[%s763_s1 + $0xc0] sm:$0xff]   ;;  %511 = vmatpush3.bf16.msra.mxu0 %v574_v1  ;;  %v579_v6 = vld [vmem:[%s763_s1 + $0xc8] sm:$0xff]   ;;  %v583_v10 = vld [vmem:[%s763_s1 + $0xd0] sm:$0xff]  }
   0x4   :  { %v576_v3 = vld [vmem:[%s763_s1 + $0x80] sm:$0xff]   ;;  %532 = vmatprep.subr.bf16.mxu1 %v575_v2  ;;  %512 = vmatprep.subr.bf16.mxu0 %v577_v4  ;;  %v580_v7 = vld [vmem:[%s763_s1 + $0x88] sm:$0xff]   ;;  %v584_v11 = vld [vmem:[%s763_s1 + $0x90] sm:$0xff]  }
   0x5   :  { %533 = vmatpush3.bf16.msra.mxu1 %v576_v3  ;;  %v585_v12 = vld [vmem:[%s763_s1 + $0x58] sm:$0xff]   ;;  %v589_v16 = vld [vmem:[%s763_s1 + $0x60] sm:$0xff]   ;;  %v593_v20 = vld [vmem:[%s763_s1 + $0x68] sm:$0xff]  }
   0x6   :  { %534 = vmatprep.subr.bf16.mxu1 %v579_v6  ;;  %v586_v13 = vld [vmem:[%s763_s1 + $0x18] sm:$0xff]   ;;  %v590_v17 = vld [vmem:[%s763_s1 + $0x20] sm:$0xff]   ;;  %v594_v21 = vld [vmem:[%s763_s1 + $0x28] sm:$0xff]  }
   0x7   :  { %513 = vmatpush3.bf16.msra.mxu0 %v578_v5  ;;  %v587_v14 = vld [vmem:[%s763_s1 + $0xd8] sm:$0xff]   ;;  %v591_v18 = vld [vmem:[%s763_s1 + $0xe0] sm:$0xff]   ;;  %v595_v22 = vld [vmem:[%s763_s1 + $0xe8] sm:$0xff]  }
   0x8   :  { %514 = vmatprep.subr.bf16.mxu0 %v581_v8  ;;  %v588_v15 = vld [vmem:[%s763_s1 + $0x98] sm:$0xff]   ;;  %v592_v19 = vld [vmem:[%s763_s1 + $0xa0] sm:$0xff]   ;;  %v596_v23 = vld [vmem:[%s763_s1 + $0xa8] sm:$0xff]  }
   0x9   :  { %535 = vmatpush3.bf16.msra.mxu1 %v580_v7  ;;  %v597_v24 = vld [vmem:[%s763_s1 + $0x70] sm:$0xff]   ;;  %v601_v28 = vld [vmem:[%s763_s1 + $0x78] sm:$0xff]   ;;  %v15_v31 = vld [vmem:[%s764_s0] sm:$0xff] }
   0xa   :  { %536 = vmatprep.subr.bf16.mxu1 %v583_v10  ;;  %v598_v25 = vld [vmem:[%s763_s1 + $0x30] sm:$0xff]   ;;  %v602_v29 = vld [vmem:[%s763_s1 + $0x38] sm:$0xff]   ;;  %v468_v32 = vcombine.low %v15_v31, %v15_v31  ;;  %v469_v33 = vcombine.high %v15_v31, %v15_v31  ;;  %v16_v36 = vld [vmem:[%s764_s0 + $0x8] sm:$0xff] }
   0xb   :  { %515 = vmatpush3.bf16.msra.mxu0 %v582_v9  ;;  %v599_v26 = vld [vmem:[%s763_s1 + $0xf0] sm:$0xff]   ;;  %v603_v30 = vld [vmem:[%s763_s1 + $0xf8] sm:$0xff]   ;;  %v470_v37 = vcombine.low %v16_v36, %v16_v36  ;;  %v471_v38 = vcombine.high %v16_v36, %v16_v36  ;;  %v610_v39 = vld [vmem:[%s763_s1 + $0x100] sm:$0xff]  }
   0xc   :  { %516 = vmatprep.subr.bf16.mxu0 %v585_v12  ;;  %v600_v27 = vld [vmem:[%s763_s1 + $0xb0] sm:$0xff]   ;;  %v607_v34 = vld [vmem:[%s763_s1 + $0xb8] sm:$0xff]   ;;  %366 = vmatprep.mubr.bf16.mxu0 %v469_v33  ;;  %v611_v40 = vld [vmem:[%s763_s1 + $0x108] sm:$0xff]  }
   0xd   :  { %537 = vmatpush3.bf16.msra.mxu1 %v584_v11  ;;  %406 = vmatprep.mubr.bf16.mxu1 %v471_v38  ;;  %v612_v41 = vld [vmem:[%s763_s1 + $0x110] sm:$0xff]   ;;  %v613_v42 = vld [vmem:[%s763_s1 + $0x118] sm:$0xff]   ;;  %v467_v45 = vld [vmem:[%s765_s2] ss:$0 sm:$0xff] }
   0xe   :  { %538 = vmatprep.subr.bf16.mxu1 %v587_v14  ;;  %v606_v43 = vld [vmem:[%s764_s0 + $0x10] ss:$0 sps:$4 sm:$0xff]  }
   0xf   :  { %517 = vmatpush3.bf16.msra.mxu0 %v586_v13 }
  0x10   :  { %518 = vmatprep.subr.bf16.mxu0 %v589_v16 }
  0x11   :  { %539 = vmatpush3.bf16.msra.mxu1 %v588_v15 }
  0x12   :  { %540 = vmatprep.subr.bf16.mxu1 %v591_v18 }
  0x13   :  { %519 = vmatpush3.bf16.msra.mxu0 %v590_v17 }
  0x14   :  { %520 = vmatprep.subr.bf16.mxu0 %v593_v20 }
  0x15   :  { %541 = vmatpush3.bf16.msra.mxu1 %v592_v19 }
  0x16   :  { %542 = vmatprep.subr.bf16.mxu1 %v595_v22 }
  0x17   :  { %521 = vmatpush3.bf16.msra.mxu0 %v594_v21 }
  0x18   :  { %522 = vmatprep.subr.bf16.mxu0 %v597_v24 }
  0x19   :  { %543 = vmatpush3.bf16.msra.mxu1 %v596_v23 }
  0x1a   :  { %544 = vmatprep.subr.bf16.mxu1 %v599_v26 }
  0x1b   :  { %523 = vmatpush3.bf16.msra.mxu0 %v598_v25 }
  0x1c   :  { %524 = vmatprep.subr.bf16.mxu0 %v601_v28 }
  0x1d   :  { %545 = vmatpush3.bf16.msra.mxu1 %v600_v27 }
  0x1e   :  { %546 = vmatprep.subr.bf16.mxu1 %v603_v30 }
  0x1f   :  { %525 = vmatpush3.bf16.msra.mxu0 %v602_v29 }
  0x20   :  { %559 = vmatprep.subr.bf16.mxu0 %v618_v35 }
  0x21   :  { %547 = vmatpush3.bf16.msra.mxu1 %v607_v34 }
  0x22   :  { %367 = vmatmul.mubr.bf16.vlgmr.msra.gmra.mrb[0].mxu0 %v468_v32 }
  0x23   :  { %560 = vmatpush3.bf16.msra.mxu0 %v610_v39  ;;  %567 = vmatprep.mubr.msk.bf16.mxu0 %vm619_vm0, %v618_v35 }
  0x24   :  { %407 = vmatmul.mubr.bf16.vlgmr.msra.gmra.mrb[0].mxu1 %v470_v37  ;;  %561 = vmatprep.subr.bf16.mxu0 %v618_v35 }
  0x27   :  { %562 = vmatpush3.bf16.msra.mxu0 %v611_v40 }
  0x28   :  { %563 = vmatprep.subr.bf16.mxu0 %v618_v35 }
  0x2b   :  { %564 = vmatpush3.bf16.msra.mxu0 %v612_v41 }
  0x2c   :  { %565 = vmatprep.subr.bf16.mxu0 %v618_v35 }
  0x2f   :  { %566 = vmatpush3.bf16.msra.mxu0 %v613_v42 }
  0x32   :  { %568 = vmatmul.mubr.msk.bf16.vlgmr.msra.gmra.mrb[4].mxu0 %vm330_vm1, %v606_v43 }
  0xf5   :  { %v526_v44 = vpop.f32.mrb[0].mxu0 }
  0xf6   :  { %v527_v46 = vpop.f32.mrb[1].mxu0 }
  0xf7   :  { %v528_v47 = vadd.f32 %v527_v46, %v526_v44  ;;  %v529_v48 = vpop.f32.mrb[2].mxu0  ;;  %v548_v49 = vpop.f32.mrb[0].mxu1 }
  0xf8   :  { %v530_v50 = vpop.f32.mrb[3].mxu0  ;;  %v549_v51 = vpop.f32.mrb[1].mxu1 }
  0xf9   :  { %v369_v52 = vadd.f32 %v528_v47, %v467_v45  ;;  %v550_v53 = vadd.f32 %v549_v51, %v548_v49  ;;  %v551_v54 = vpop.f32.mrb[2].mxu1 }
  0xfa   :  { %v552_v55 = vpop.f32.mrb[3].mxu1 }
  0xfb   :  { %v409_v56 = vadd.f32 %v550_v53, %v369_v52 }
 0x105   :  { %v448_v57 = vpop.f32.mrb[4].mxu0 }
 0x106   :  { %v449_v58 = vadd.f32 %v448_v57, %v409_v56  ;;  %v569_v59 = vpop.f32.mrb[5].mxu0 }
 0x107   :  { %v451_v60 = vpop.f32.mrb[6].mxu0 }
 0x108   :  { %v454_v61 = vsub.f32 0.0, %v449_v58  ;;  %v570_v62 = vpop.f32.mrb[7].mxu0 }
 0x10a   :  { %v455_v63 = vmul.f32 1.442695, %v454_v61 }
 0x10c   :  { %614 = vpow2.f32 %v455_v63 }
 0x116   :  { %v615_v0 = vpop.eup %614 }
 0x117   :  { %v457_v1 = vadd.f32 1.0, %v615_v0 }
 0x119   :  { %616 = vrcp.f32 %v457_v1 }
 0x123   :  { %v617_v2 = vpop.eup %616 }
 0x124   :  { %v460_v3 = vmul.f32 %v617_v2, %v449_v58 }
 0x126   :  { %v461_v4 = vpack.c.bf16 %v460_v3, %v460_v3 }
 0x128   :  { %462 = vst [vmem:[%s766_s3] sm:$0xf] %v461_v4 }

// kernel: yolox_forward.29
= control target key start
LH: loop header
LB: loop body
LE: loop exit
PB: predicated region body
PF: predicated region fallthrough
CT: control target
= control target key end

     0   :  { %v193_v0 = vmov 0.0   ;;  %vm194_vm0 = vmmov 0   ;;  %vm135_vm1 = vcmask 257024   ;;  %s248_s1 = inlined_call_operand.vmem [shape: bf16[128,32], index: 1, kind: input, shape index: {}]   ;;  %s249_s0 = inlined_call_operand.vmem [shape: bf16[8,128], index: 0, kind: input, shape index: {}]   ;;  %s250_s2 = inlined_call_operand.vmem [shape: f32[1,32], index: 2, kind: input, shape index: {}]   ;;  %s251_s3 = inlined_call_operand.vmem [shape: bf16[8,32], index: 3, kind: output, shape index: {}]  }
   0x1   :  { %159 = vmatprep.subr.bf16.mxu0 %v193_v0  ;;  %v181_v1 = vld [vmem:[%s248_s1] sm:$0xff]   ;;  %175 = vmatprep.mubr.msk.bf16.mxu0 %vm194_vm0, %v193_v0  ;;  %v182_v2 = vld [vmem:[%s248_s1 + $0x8] sm:$0xff]   ;;  %v183_v3 = vld [vmem:[%s248_s1 + $0x10] sm:$0xff]  }
   0x2   :  { %160 = vmatpush3.bf16.msra.mxu0 %v181_v1  ;;  %v184_v4 = vld [vmem:[%s248_s1 + $0x18] sm:$0xff]   ;;  %v185_v5 = vld [vmem:[%s248_s1 + $0x20] sm:$0xff]   ;;  %v186_v6 = vld [vmem:[%s248_s1 + $0x28] sm:$0xff]  }
   0x3   :  { %161 = vmatprep.subr.bf16.mxu0 %v193_v0  ;;  %v187_v7 = vld [vmem:[%s248_s1 + $0x30] sm:$0xff]   ;;  %v188_v8 = vld [vmem:[%s248_s1 + $0x38] sm:$0xff]   ;;  %v15_v9 = vld [vmem:[%s249_s0] sm:$0xf] }
   0x4   :  { %v141_v10 = vld [vmem:[%s250_s2] ss:$0 sm:$0xff] }
   0x6   :  { %162 = vmatpush3.bf16.msra.mxu0 %v182_v2 }
   0x7   :  { %163 = vmatprep.subr.bf16.mxu0 %v193_v0 }
   0xa   :  { %164 = vmatpush3.bf16.msra.mxu0 %v183_v3 }
   0xb   :  { %165 = vmatprep.subr.bf16.mxu0 %v193_v0 }
   0xe   :  { %166 = vmatpush3.bf16.msra.mxu0 %v184_v4 }
   0xf   :  { %167 = vmatprep.subr.bf16.mxu0 %v193_v0 }
  0x12   :  { %168 = vmatpush3.bf16.msra.mxu0 %v185_v5 }
  0x13   :  { %169 = vmatprep.subr.bf16.mxu0 %v193_v0 }
  0x16   :  { %170 = vmatpush3.bf16.msra.mxu0 %v186_v6 }
  0x17   :  { %171 = vmatprep.subr.bf16.mxu0 %v193_v0 }
  0x1a   :  { %172 = vmatpush3.bf16.msra.mxu0 %v187_v7 }
  0x1b   :  { %173 = vmatprep.subr.bf16.mxu0 %v193_v0 }
  0x1e   :  { %174 = vmatpush3.bf16.msra.mxu0 %v188_v8 }
  0x21   :  { %176 = vmatmul.mubr.bf16.vlgmr.msra.gmra.mrb[0].mxu0 %v15_v9 }
  0xf4   :  { %v121_v11 = vpop.f32.mrb[0].mxu0 }
  0xf5   :  { %v122_v12 = vadd.f32 %v141_v10, %v121_v11  ;;  %v177_v13 = vpop.f32.mrb[1].mxu0 }
  0xf6   :  { %v124_v14 = vpop.f32.mrb[2].mxu0 }
  0xf7   :  { %v127_v15 = vsub.f32 0.0, %v122_v12  ;;  %v178_v16 = vpop.f32.mrb[3].mxu0 }
  0xf9   :  { %v128_v17 = vmul.f32 1.442695, %v127_v15 }
  0xfb   :  { %189 = vpow2.f32 %v128_v17 }
 0x105   :  { %v190_v18 = vpop.eup %189 }
 0x106   :  { %v130_v19 = vadd.f32 1.0, %v190_v18 }
 0x108   :  { %191 = vrcp.f32 %v130_v19 }
 0x112   :  { %v192_v20 = vpop.eup %191 }
 0x113   :  { %v133_v21 = vmul.f32 %v192_v20, %v122_v12 }
 0x115   :  { %v134_v22 = vpack.c.bf16 %v133_v21, %v133_v21 }
 0x117   :  { %136 = vst.msk [vmem:[%s251_s3] sm:$0xf] %vm135_vm1, %v134_v22 }

// kernel: yolox_forward.30
= control target key start
LH: loop header
LB: loop body
LE: loop exit
PB: predicated region body
PF: predicated region fallthrough
CT: control target
= control target key end

     0   :  { %v359_v1 = vmov 0.0   ;;  %vm360_vm0 = vmmov 0   ;;  %vm178_vm1 = vcmask 261120   ;;  %vm270_vm2 = vcmask 519168   ;;  %s447_s1 = inlined_call_operand.vmem [shape: bf16[288,64], index: 1, kind: input, shape index: {}]   ;;  %s448_s0 = inlined_call_operand.vmem [shape: bf16[8,288], index: 0, kind: input, shape index: {}]   ;;  %s449_s2 = inlined_call_operand.vmem [shape: f32[1,64], index: 2, kind: input, shape index: {}]   ;;  %s450_s3 = inlined_call_operand.vmem [shape: bf16[8,64], index: 3, kind: output, shape index: {}]  }
   0x1   :  { %v334_v0 = vld [vmem:[%s447_s1 + $0x40] sm:$0xff]   ;;  %324 = vmatprep.subr.bf16.mxu1 %v359_v1  ;;  %328 = vmatprep.mubr.msk.bf16.mxu1 %vm360_vm0, %v359_v1  ;;  %v336_v3 = vld [vmem:[%s447_s1 + $0x48] sm:$0xff]   ;;  %v338_v5 = vld [vmem:[%s447_s1 + $0x50] sm:$0xff]  }
   0x2   :  { %v335_v2 = vld [vmem:[%s447_s1] sm:$0xff]   ;;  %299 = vmatprep.subr.bf16.mxu0 %v334_v0  ;;  %v337_v4 = vld [vmem:[%s447_s1 + $0x8] sm:$0xff]   ;;  %v339_v6 = vld [vmem:[%s447_s1 + $0x10] sm:$0xff]  }
   0x3   :  { %300 = vmatpush3.bf16.msra.mxu0 %v335_v2  ;;  %v340_v7 = vld [vmem:[%s447_s1 + $0x58] sm:$0xff]   ;;  %v342_v9 = vld [vmem:[%s447_s1 + $0x60] sm:$0xff]   ;;  %v344_v12 = vld [vmem:[%s447_s1 + $0x68] sm:$0xff]  }
   0x4   :  { %301 = vmatprep.subr.bf16.mxu0 %v336_v3  ;;  %v341_v8 = vld [vmem:[%s447_s1 + $0x18] sm:$0xff]   ;;  %v348_v10 = vld [vmem:[%s447_s1 + $0x80] sm:$0xff]   ;;  %v354_v15 = vld [vmem:[%s447_s1 + $0x88] sm:$0xff]  }
   0x5   :  { %v343_v11 = vld [vmem:[%s447_s1 + $0x20] sm:$0xff]   ;;  %325 = vmatpush3.bf16.msra.mxu1 %v348_v10  ;;  %v345_v16 = vld [vmem:[%s447_s1 + $0x28] sm:$0xff]   ;;  %v346_v17 = vld [vmem:[%s447_s1 + $0x70] sm:$0xff]  }
   0x6   :  { %326 = vmatprep.subr.bf16.mxu1 %v359_v1  ;;  %v15_v13 = vld [vmem:[%s448_s0] sm:$0xff]  ;;  %v353_v18 = vld [vmem:[%s448_s0 + $0x8] ss:$0 sps:$4 sm:$0xff]   ;;  %v347_v19 = vld [vmem:[%s447_s1 + $0x30] sm:$0xff]  }
   0x7   :  { %302 = vmatpush3.bf16.msra.mxu0 %v337_v4  ;;  %v278_v14 = vcombine.high %v15_v13, %v15_v13  ;;  %v349_v20 = vld [vmem:[%s447_s1 + $0x78] sm:$0xff]   ;;  %v277_v22 = vcombine.low %v15_v13, %v15_v13  ;;  %v276_v29 = vld [vmem:[%s449_s2] ss:$0 sm:$0xff] }
   0x8   :  { %303 = vmatprep.subr.bf16.mxu0 %v338_v5  ;;  %v350_v21 = vld [vmem:[%s447_s1 + $0x38] sm:$0xff]  }
   0x9   :  { %214 = vmatprep.mubr.bf16.mxu0 %v278_v14  ;;  %327 = vmatpush3.bf16.msra.mxu1 %v354_v15 }
   0xb   :  { %304 = vmatpush3.bf16.msra.mxu0 %v339_v6 }
   0xc   :  { %305 = vmatprep.subr.bf16.mxu0 %v340_v7  ;;  %329 = vmatmul.mubr.msk.bf16.vlgmr.msra.gmra.mrb[0].mxu1 %vm178_vm1, %v353_v18 }
   0xf   :  { %306 = vmatpush3.bf16.msra.mxu0 %v341_v8 }
  0x10   :  { %307 = vmatprep.subr.bf16.mxu0 %v342_v9 }
  0x13   :  { %308 = vmatpush3.bf16.msra.mxu0 %v343_v11 }
  0x14   :  { %309 = vmatprep.subr.bf16.mxu0 %v344_v12 }
  0x17   :  { %310 = vmatpush3.bf16.msra.mxu0 %v345_v16 }
  0x18   :  { %311 = vmatprep.subr.bf16.mxu0 %v346_v17 }
  0x1b   :  { %312 = vmatpush3.bf16.msra.mxu0 %v347_v19 }
  0x1c   :  { %313 = vmatprep.subr.bf16.mxu0 %v349_v20 }
  0x1f   :  { %314 = vmatpush3.bf16.msra.mxu0 %v350_v21 }
  0x22   :  { %215 = vmatmul.mubr.bf16.vlgmr.msra.gmra.mrb[0].mxu0 %v277_v22 }
  0xdf   :  { %v256_v23 = vpop.f32.mrb[0].mxu1 }
  0xe0   :  { %v330_v24 = vpop.f32.mrb[1].mxu1 }
  0xe1   :  { %v259_v25 = vpop.f32.mrb[2].mxu1 }
  0xe2   :  { %v331_v26 = vpop.f32.mrb[3].mxu1 }
  0xf5   :  { %v315_v27 = vpop.f32.mrb[0].mxu0 }
  0xf6   :  { %v316_v28 = vpop.f32.mrb[1].mxu0 }
  0xf7   :  { %v317_v30 = vadd.f32 %v316_v28, %v315_v27  ;;  %v318_v31 = vpop.f32.mrb[2].mxu0 }
  0xf8   :  { %v319_v32 = vpop.f32.mrb[3].mxu0 }
  0xf9   :  { %v217_v33 = vadd.f32 %v317_v30, %v276_v29 }
  0xfb   :  { %v257_v34 = vadd.f32 %v256_v23, %v217_v33 }
  0xfd   :  { %v262_v35 = vsub.f32 0.0, %v257_v34 }
  0xff   :  { %v263_v36 = vmul.f32 1.442695, %v262_v35 }
 0x101   :  { %355 = vpow2.f32 %v263_v36 }
 0x10b   :  { %v356_v37 = vpop.eup %355 }
 0x10c   :  { %v265_v38 = vadd.f32 1.0, %v356_v37 }
 0x10e   :  { %357 = vrcp.f32 %v265_v38 }
 0x118   :  { %v358_v39 = vpop.eup %357 }
 0x119   :  { %v268_v40 = vmul.f32 %v358_v39, %v257_v34 }
 0x11b   :  { %v269_v41 = vpack.c.bf16 %v268_v40, %v268_v40 }
 0x11d   :  { %271 = vst.msk [vmem:[%s450_s3] sm:$0xf] %vm270_vm2, %v269_v41 }

// kernel: yolox_forward.31
= control target key start
LH: loop header
LB: loop body
LE: loop exit
PB: predicated region body
PF: predicated region fallthrough
CT: control target
= control target key end

     0   :  { %v159_v0 = vmov 0.0   ;;  %vm160_vm0 = vmmov 0   ;;  %vm58_vm1 = vcmask 523264   ;;  %vm114_vm2 = vcmask 15360   ;;  %s216_s1 = inlined_call_operand.vmem [shape: bf16[64,8], index: 1, kind: input, shape index: {}]   ;;  %s217_s0 = inlined_call_operand.vmem [shape: bf16[8,64], index: 0, kind: input, shape index: {}]   ;;  %s218_s2 = inlined_call_operand.vmem [shape: f32[1,8], index: 2, kind: input, shape index: {}]   ;;  %s219_s3 = inlined_call_operand.vmem [shape: f32[8,2], index: 3, kind: input, shape index: {}]   ;;  %s220_s4 = inlined_call_operand.vmem [shape: f32[8,8], index: 4, kind: output, shape index: {}]  }
   0x1   :  { %135 = vmatprep.subr.bf16.mxu0 %v159_v0  ;;  %v149_v1 = vld [vmem:[%s216_s1] sm:$0xff]   ;;  %143 = vmatprep.mubr.msk.bf16.mxu0 %vm160_vm0, %v159_v0  ;;  %v150_v2 = vld [vmem:[%s216_s1 + $0x8] sm:$0xff]   ;;  %v151_v3 = vld [vmem:[%s216_s1 + $0x10] sm:$0xff]   ;;  %vm116_vm3 = vcmask 31760   ;;  %vm118_vm4 = vcmask 64544  }
   0x2   :  { %136 = vmatpush3.bf16.msra.mxu0 %v149_v1  ;;  %v152_v4 = vld [vmem:[%s216_s1 + $0x18] sm:$0xff]   ;;  %v18_v5 = vld [vmem:[%s217_s0] sm:$0xf] }
   0x3   :  { %137 = vmatprep.subr.bf16.mxu0 %v159_v0  ;;  %v124_v6 = vld [vmem:[%s218_s2] ss:$0 sm:$0xff] }
   0x4   :  { %v102_v8 = vld [vmem:[%s219_s3] sm:$0xff] }
   0x6   :  { %138 = vmatpush3.bf16.msra.mxu0 %v150_v2 }
   0x7   :  { %139 = vmatprep.subr.bf16.mxu0 %v159_v0 }
   0xa   :  { %140 = vmatpush3.bf16.msra.mxu0 %v151_v3 }
   0xb   :  { %141 = vmatprep.subr.bf16.mxu0 %v159_v0 }
   0xe   :  { %142 = vmatpush3.bf16.msra.mxu0 %v152_v4 }
  0x11   :  { %144 = vmatmul.mubr.msk.bf16.vlgmr.msra.gmra.mrb[0].mxu0 %vm58_vm1, %v18_v5 }
  0xe4   :  { %v96_v7 = vpop.f32.mrb[0].mxu0 }
  0xe5   :  { %v97_v9 = vadd.f32 %v124_v6, %v96_v7  ;;  %v145_v10 = vpop.f32.mrb[1].mxu0 }
  0xe6   :  { %v99_v11 = vpop.f32.mrb[2].mxu0 }
  0xe7   :  { %v103_v12 = vadd.f32 %v102_v8, %v97_v9  ;;  %v105_v13 = vmul.f32 1.442695, %v97_v9  ;;  %v108_v14 = vsub.f32 0.0, %v97_v9  ;;  %v146_v15 = vpop.f32.mrb[3].mxu0 }
  0xe9   :  { %v104_v16 = vmul.f32 16.0, %v103_v12  ;;  %153 = vpow2.f32 %v105_v13  ;;  %v109_v17 = vmul.f32 1.442695, %v108_v14 }
  0xeb   :  { %155 = vpow2.f32 %v109_v17  ;;  %115 = vst.msk [vmem:[%s220_s4] sm:$0xff] %vm114_vm2, %v104_v16 }
  0xf3   :  { %v154_v18 = vpop.eup %153 }
  0xf4   :  { %v107_v19 = vmul.f32 16.0, %v154_v18 }
  0xf5   :  { %v156_v20 = vpop.eup %155 }
  0xf6   :  { %v111_v21 = vadd.f32 1.0, %v156_v20  ;;  %117 = vst.msk [vmem:[%s220_s4] sm:$0xff] %vm116_vm3, %v107_v19 }
  0xf8   :  { %157 = vrcp.f32 %v111_v21 }
 0x102   :  { %v158_v22 = vpop.eup %157 }
 0x103   :  { %119 = vst.msk [vmem:[%s220_s4] sm:$0xff] %vm118_vm4, %v158_v22 }

</bundles_post_ra>
